<compile_context>
chip_gen: v6e
topology: v6e:2x2x1
jax: 0.10.0
libtpu: 0.0.40
codegen_flags: <defaults>
</compile_context>

<pallas_src>
import functools

import jax
import jax.numpy as jnp
from jax import lax
from jax.experimental import pallas as pl
from jax.experimental.pallas import tpu as pltpu


def _round_up(x, m):
    return (x + m - 1) // m * m


def _resdnet_block_kernel(x_ref, w13_ref, b13_ref, wn_ref, bn_ref, w2_ref,
                          b2_ref, masks_ref, o_ref, bank_ref, *, H, W,
                          rows_per_chunk):
    lanes = x_ref.shape[2]            # b_tile * H * W (lane axis)
    Cw = wn_ref.shape[1]              # width (4)
    Cmid = 4 * Cw                     # width * 4 (16)
    Cout = w2_ref.shape[0]
    rows_used = 9 * Cw                # 36 live rows per bank chunk
    pad_rows = rows_per_chunk - rows_used

    masks = masks_ref[...]            # (9, lanes) boundary masks, one per 3x3 tap

    # Hoisted per-tap constants: roll shifts (jnp.roll convention) and masks
    # pre-broadcast to (Cw, lanes) exactly once.
    tap_shift = []
    tap_mask = []
    for k in range(9):
        dy, dx = k // 3, k % 3
        s = (dy - 1) * W + (dx - 1)          # want result[:, p] = chunk[:, p + s]
        tap_shift.append((-s) % lanes)       # == jnp.roll(chunk, -s) shift, non-negative
        tap_mask.append(jnp.broadcast_to(masks[k:k + 1, :], (Cw, lanes)))

    pad_block = jnp.zeros((pad_rows, lanes), jnp.float32) if pad_rows else None

    def emit_chunk(chunk, j):
        # chunk: (Cw, lanes).  Build all 9 shifted+masked taps (+ zero pad rows)
        # and write them with a single contiguous, 8-aligned store.
        taps = []
        for k in range(9):
            if tap_shift[k] == 0:
                taps.append(chunk)                         # center tap: identity
            else:
                rolled = pltpu.roll(chunk, shift=tap_shift[k], axis=1)
                taps.append(rolled * tap_mask[k])
        if pad_block is not None:
            taps.append(pad_block)
        block = jnp.concatenate(taps, axis=0)              # (rows_per_chunk, lanes)
        bank_ref[pl.ds(rows_per_chunk * j, rows_per_chunk), :] = block

    x = x_ref[0]                                           # (Cin, lanes), f32

    # Fused conv1 (1x1 -> Cmid) and conv3 (1x1 -> Cout): one matmul.
    tw = jnp.dot(w13_ref[...], x, preferred_element_type=jnp.float32) + b13_ref[...]
    t = tw[:Cmid, :]                                       # conv1 output (Cmid, lanes)
    out1 = tw[Cmid:, :]                                    # conv3 output (Cout, lanes)

    # Seed chunks 0..3 (= x1..x4 of the PyTorch split).
    for j in range(4):
        emit_chunk(t[Cw * j:Cw * (j + 1), :], j)

    # 8 neck 3x3 convs: conv i consumes chunks i..i+3 (one contiguous, 8-aligned
    # 4*rows_per_chunk-row bank window; weights already chunk-major with zero pad
    # rows) and produces chunk i+4.  conv2 is accumulated incrementally.
    acc2 = jnp.zeros((Cout, lanes), jnp.float32)
    for i in range(8):
        col = bank_ref[pl.ds(rows_per_chunk * i, 4 * rows_per_chunk), :]
        y = jnp.dot(wn_ref[i], col, preferred_element_type=jnp.float32) + bn_ref[i]
        if i >= 4:
            j = i - 4
            acc2 = acc2 + jnp.dot(w2_ref[:, Cw * j:Cw * (j + 1)], y,
                                  preferred_element_type=jnp.float32)
        if i < 7:
            emit_chunk(y, i + 4)               # chunk 11 is never read by a 3x3 conv

    out2 = acc2 + b2_ref[...]
    o_ref[0] = jnp.maximum(out1 + out2, 0.0)   # lane-dense (Cout, lanes) store


def init_params(key, in_channels=4, out_channels=4, width=4):
    """Deterministic synthetic parameters in PyTorch (OIHW) layout."""
    cmid = width * 4
    ks = jax.random.split(key, 8)
    s = 0.1
    return dict(
        w1=s * jax.random.normal(ks[0], (cmid, in_channels, 1, 1), jnp.float32),
        b1=s * jax.random.normal(ks[1], (cmid,), jnp.float32),
        w3=s * jax.random.normal(ks[2], (out_channels, in_channels, 1, 1), jnp.float32),
        b3=s * jax.random.normal(ks[3], (out_channels,), jnp.float32),
        wn=s * jax.random.normal(ks[4], (8, width, cmid, 3, 3), jnp.float32),
        bn=s * jax.random.normal(ks[5], (8, width), jnp.float32),
        w2=s * jax.random.normal(ks[6], (out_channels, cmid, 1, 1), jnp.float32),
        b2=s * jax.random.normal(ks[7], (out_channels,), jnp.float32),
    )


def _tap_masks(H, W):
    """(9, H*W) f32 masks: 1 where the 3x3 tap (dy,dx) reads inside the image."""
    h = jnp.arange(H * W, dtype=jnp.int32) // W
    w = jnp.arange(H * W, dtype=jnp.int32) % W
    rows = []
    for dy in range(3):
        for dx in range(3):
            valid = ((h + dy - 1 >= 0) & (h + dy - 1 < H) &
                     (w + dx - 1 >= 0) & (w + dx - 1 < W))
            rows.append(valid.astype(jnp.float32))
    return jnp.stack(rows, axis=0)


def _pick_b_tile(N, HW, bank_rows, budget_bytes=8 << 20):
    """Largest batch-fold that (a) divides N, (b) keeps the f32 bank well under the
    v5e 16 MiB scoped-VMEM default, (c) leaves >=2 grid steps for dual-TC v7x."""
    best = 1
    for b in range(1, N + 1):
        if N % b:
            continue
        if bank_rows * b * HW * 4 > budget_bytes:
            continue
        if N >= 2 and N // b < 2:
            continue
        best = b
    return best


@jax.jit
def resdnet_block_forward(x_nchw, params):
    N, Cin, H, W = x_nchw.shape
    Cout, Cmid = params["w2"].shape[:2]
    width = params["wn"].shape[1]
    HW = H * W

    rows_used = 9 * width
    rows_per_chunk = _round_up(rows_used, 8)     # 36 -> 40 (8-sublane aligned stride)
    bank_rows = rows_per_chunk * 11

    b_tile = _pick_b_tile(N, HW, bank_rows)
    n_tiles = N // b_tile
    lanes = b_tile * HW

    # Lane-folded input: (n_tiles, Cin, b_tile*HW); lane = img_in_tile*HW + h*W + w.
    x = x_nchw.reshape(n_tiles, b_tile, Cin, HW)
    x = jnp.transpose(x, (0, 2, 1, 3)).reshape(n_tiles, Cin, lanes).astype(jnp.float32)

    # Fused 1x1 weights for conv1 + conv3: (Cmid+Cout, Cin), bias (Cmid+Cout, 1).
    w13 = jnp.concatenate([params["w1"][:, :, 0, 0], params["w3"][:, :, 0, 0]], axis=0)
    b13 = jnp.concatenate([params["b1"], params["b3"]], axis=0)[:, None]

    # 3x3 weights: (8, Cw, Cmid, 3, 3) -> chunk-major K (chunk, ky, kx, c_within),
    # zero-padded per chunk from 36 -> rows_per_chunk rows to match the bank layout.
    wn = params["wn"].reshape(8, width, 4, width, 3, 3)
    wn = jnp.transpose(wn, (0, 1, 2, 4, 5, 3)).reshape(8, width, 4, rows_used)
    wn = jnp.pad(wn, ((0, 0), (0, 0), (0, 0), (0, rows_per_chunk - rows_used)))
    wn = wn.reshape(8, width, 4 * rows_per_chunk)
    bn = params["bn"][:, :, None]                             # (8, Cw, 1)

    w2 = params["w2"][:, :, 0, 0]                             # (Cout, Cmid)
    b2 = params["b2"][:, None]                                # (Cout, 1)

    masks = jnp.tile(_tap_masks(H, W), (1, b_tile))           # (9, lanes)

    def full_spec(a):
        nd = a.ndim
        return pl.BlockSpec(a.shape, lambda n, nd=nd: (0,) * nd)

    kernel = functools.partial(_resdnet_block_kernel, H=H, W=W,
                               rows_per_chunk=rows_per_chunk)

    out = pl.pallas_call(
        kernel,
        grid=(n_tiles,),
        in_specs=[
            pl.BlockSpec((1, Cin, lanes), lambda n: (n, 0, 0)),
            full_spec(w13), full_spec(b13),
            full_spec(wn), full_spec(bn),
            full_spec(w2), full_spec(b2),
            full_spec(masks),
        ],
        out_specs=pl.BlockSpec((1, Cout, lanes), lambda n: (n, 0, 0)),
        out_shape=jax.ShapeDtypeStruct((n_tiles, Cout, lanes), jnp.float32),
        scratch_shapes=[pltpu.VMEM((bank_rows, lanes), jnp.float32)],  # column bank
        compiler_params=pltpu.CompilerParams(dimension_semantics=("parallel",)),
    )(x, w13, b13, wn, bn, w2, b2, masks)

    # Un-fold lanes back to NCHW.
    out = out.reshape(n_tiles, Cout, b_tile, HW)
    out = jnp.transpose(out, (0, 2, 1, 3)).reshape(N, Cout, H, W)
    return out


# ----------------------------- pure-JAX reference -----------------------------
def _conv_ref(x, w, b, pad):
    y = lax.conv_general_dilated(x, w, (1, 1), [(pad, pad), (pad, pad)],
                                 dimension_numbers=("NCHW", "OIHW", "NCHW"))
    return y + b[None, :, None, None]


def resdnet_block_reference(x, p):
    out1 = _conv_ref(x, p["w3"], p["b3"], 0)
    t = _conv_ref(x, p["w1"], p["b1"], 0)
    x1, x2, x3, x4 = jnp.split(t, 4, axis=1)
    neck = lambda i, a: _conv_ref(a, p["wn"][i], p["bn"][i], 1)
    cat = lambda parts: jnp.concatenate(parts, axis=1)
    y1 = neck(0, t)
    y2 = neck(1, cat([x2, x3, x4, y1]))
    y3 = neck(2, cat([x3, x4, y1, y2]))
    y4 = neck(3, cat([x4, y1, y2, y3]))
    x1 = neck(4, cat([y1, y2, y3, y4]))
    x2 = neck(5, cat([y2, y3, y4, x1]))
    x3 = neck(6, cat([y3, y4, x1, x2]))
    x4 = neck(7, cat([y4, x1, x2, x3]))
    out2 = _conv_ref(cat([x1, x2, x3, x4]), p["w2"], p["b2"], 0)
    return jnp.maximum(out1 + out2, 0.0)


if __name__ == "__main__":
    key = jax.random.PRNGKey(0)
    kp, kx = jax.random.split(key)

    Cin, Cout, width, H, W = 4, 4, 4, 16, 16
    params = init_params(kp, in_channels=Cin, out_channels=Cout, width=width)

    # N=2 -> b_tile=1 (two parallel grid steps); N=4 -> b_tile=2 (exercises the
    # batch-into-lanes folding and the cross-image roll masking).
    for N in (2, 4):
        x = jax.random.normal(jax.random.fold_in(kx, N), (N, Cin, H, W), jnp.float32)
        out = jax.block_until_ready(resdnet_block_forward(x, params))
        ref = resdnet_block_reference(x, params)
        assert out.shape == (N, Cout, H, W)
        err = float(jnp.max(jnp.abs(out - ref)))
        assert err < 1e-3, f"max abs err {err} at N={N}"

    print("KERNEL_OK")
</pallas_src>

<mosaic_0001>
module attributes {stable_mosaic.version = 11 : i64} {
  func.func @_resdnet_block_kernel(%arg0: i32, %arg1: memref<1x4x256xf32, #tpu.memory_space<vmem>>, %arg2: memref<20x4xf32, #tpu.memory_space<vmem>>, %arg3: memref<20x1xf32, #tpu.memory_space<vmem>>, %arg4: memref<8x4x160xf32, #tpu.memory_space<vmem>>, %arg5: memref<8x4x1xf32, #tpu.memory_space<vmem>>, %arg6: memref<4x16xf32, #tpu.memory_space<vmem>>, %arg7: memref<4x1xf32, #tpu.memory_space<vmem>>, %arg8: memref<9x256xf32, #tpu.memory_space<vmem>>, %arg9: memref<1x4x256xf32, #tpu.memory_space<vmem>>, %arg10: memref<440x256xf32, #tpu.memory_space<vmem>>) attributes {dimension_semantics = [#tpu.dimension_semantics<parallel>], iteration_bounds = array<i64: 2>, scalar_prefetch = 0 : i64, scratch_operands = 1 : i64, tpu.core_type = #tpu.core_type<tc>, window_params = [{transform_indices = @transform_0, window_bounds = array<i64: 1, 4, 256>}, {pipeline_mode = #tpu.pipeline_mode<synchronous>, transform_indices = @transform_1, window_bounds = array<i64: 20, 4>}, {pipeline_mode = #tpu.pipeline_mode<synchronous>, transform_indices = @transform_2, window_bounds = array<i64: 20, 1>}, {pipeline_mode = #tpu.pipeline_mode<synchronous>, transform_indices = @transform_3, window_bounds = array<i64: 8, 4, 160>}, {pipeline_mode = #tpu.pipeline_mode<synchronous>, transform_indices = @transform_4, window_bounds = array<i64: 8, 4, 1>}, {pipeline_mode = #tpu.pipeline_mode<synchronous>, transform_indices = @transform_5, window_bounds = array<i64: 4, 16>}, {pipeline_mode = #tpu.pipeline_mode<synchronous>, transform_indices = @transform_6, window_bounds = array<i64: 4, 1>}, {pipeline_mode = #tpu.pipeline_mode<synchronous>, transform_indices = @transform_7, window_bounds = array<i64: 9, 256>}, {transform_indices = @transform_8, window_bounds = array<i64: 1, 4, 256>}]} {
    %c0 = arith.constant 0 : index
    %c0_0 = arith.constant 0 : index
    %0 = vector.load %arg8[%c0, %c0_0] : memref<9x256xf32, #tpu.memory_space<vmem>>, vector<9x256xf32>
    %1 = vector.extract_strided_slice %0 {offsets = [0, 0], sizes = [1, 256], strides = [1, 1]} : vector<9x256xf32> to vector<1x256xf32>
    %2 = vector.shape_cast %1 : vector<1x256xf32> to vector<1x256xf32>
    %3 = vector.broadcast %2 : vector<1x256xf32> to vector<4x256xf32>
    %4 = vector.extract_strided_slice %0 {offsets = [1, 0], sizes = [1, 256], strides = [1, 1]} : vector<9x256xf32> to vector<1x256xf32>
    %5 = vector.shape_cast %4 : vector<1x256xf32> to vector<1x256xf32>
    %6 = vector.broadcast %5 : vector<1x256xf32> to vector<4x256xf32>
    %7 = vector.extract_strided_slice %0 {offsets = [2, 0], sizes = [1, 256], strides = [1, 1]} : vector<9x256xf32> to vector<1x256xf32>
    %8 = vector.shape_cast %7 : vector<1x256xf32> to vector<1x256xf32>
    %9 = vector.broadcast %8 : vector<1x256xf32> to vector<4x256xf32>
    %10 = vector.extract_strided_slice %0 {offsets = [3, 0], sizes = [1, 256], strides = [1, 1]} : vector<9x256xf32> to vector<1x256xf32>
    %11 = vector.shape_cast %10 : vector<1x256xf32> to vector<1x256xf32>
    %12 = vector.broadcast %11 : vector<1x256xf32> to vector<4x256xf32>
    %13 = vector.extract_strided_slice %0 {offsets = [5, 0], sizes = [1, 256], strides = [1, 1]} : vector<9x256xf32> to vector<1x256xf32>
    %14 = vector.shape_cast %13 : vector<1x256xf32> to vector<1x256xf32>
    %15 = vector.broadcast %14 : vector<1x256xf32> to vector<4x256xf32>
    %16 = vector.extract_strided_slice %0 {offsets = [6, 0], sizes = [1, 256], strides = [1, 1]} : vector<9x256xf32> to vector<1x256xf32>
    %17 = vector.shape_cast %16 : vector<1x256xf32> to vector<1x256xf32>
    %18 = vector.broadcast %17 : vector<1x256xf32> to vector<4x256xf32>
    %19 = vector.extract_strided_slice %0 {offsets = [7, 0], sizes = [1, 256], strides = [1, 1]} : vector<9x256xf32> to vector<1x256xf32>
    %20 = vector.shape_cast %19 : vector<1x256xf32> to vector<1x256xf32>
    %21 = vector.broadcast %20 : vector<1x256xf32> to vector<4x256xf32>
    %22 = vector.extract_strided_slice %0 {offsets = [8, 0], sizes = [1, 256], strides = [1, 1]} : vector<9x256xf32> to vector<1x256xf32>
    %23 = vector.shape_cast %22 : vector<1x256xf32> to vector<1x256xf32>
    %24 = vector.broadcast %23 : vector<1x256xf32> to vector<4x256xf32>
    %cst = arith.constant 0.000000e+00 : f32
    %25 = vector.broadcast %cst : f32 to vector<4x256xf32>
    %c0_1 = arith.constant 0 : index
    %c0_2 = arith.constant 0 : index
    %c0_3 = arith.constant 0 : index
    %26 = vector.load %arg1[%c0_1, %c0_2, %c0_3] : memref<1x4x256xf32, #tpu.memory_space<vmem>>, vector<1x4x256xf32>
    %27 = vector.shape_cast %26 : vector<1x4x256xf32> to vector<4x256xf32>
    %c0_4 = arith.constant 0 : index
    %c0_5 = arith.constant 0 : index
    %28 = vector.load %arg2[%c0_4, %c0_5] : memref<20x4xf32, #tpu.memory_space<vmem>>, vector<20x4xf32>
    %cst_6 = arith.constant dense<0.000000e+00> : vector<20x256xf32>
    %29 = tpu.matmul %28, %27, %cst_6 {dimension_numbers = #tpu.dot_dimension_numbers<[1], [0], [0], [1], [0, 0, 1, 1], [], []>} : vector<20x4xf32>, vector<4x256xf32>, vector<20x256xf32> -> vector<20x256xf32>
    %c0_7 = arith.constant 0 : index
    %c0_8 = arith.constant 0 : index
    %30 = vector.load %arg3[%c0_7, %c0_8] : memref<20x1xf32, #tpu.memory_space<vmem>>, vector<20x1xf32>
    %31 = vector.broadcast %30 : vector<20x1xf32> to vector<20x256xf32>
    %32 = arith.addf %29, %31 : vector<20x256xf32>
    %33 = vector.extract_strided_slice %32 {offsets = [0, 0], sizes = [16, 256], strides = [1, 1]} : vector<20x256xf32> to vector<16x256xf32>
    %34 = vector.extract_strided_slice %32 {offsets = [16, 0], sizes = [4, 256], strides = [1, 1]} : vector<20x256xf32> to vector<4x256xf32>
    %35 = vector.extract_strided_slice %33 {offsets = [0, 0], sizes = [4, 256], strides = [1, 1]} : vector<16x256xf32> to vector<4x256xf32>
    %c17_i32 = arith.constant 17 : i32
    %36 = tpu.dynamic_rotate %35 by %c17_i32 dim 1 : vector<4x256xf32>, i32 -> vector<4x256xf32>
    %37 = arith.mulf %36, %3 : vector<4x256xf32>
    %c16_i32 = arith.constant 16 : i32
    %38 = tpu.dynamic_rotate %35 by %c16_i32 dim 1 : vector<4x256xf32>, i32 -> vector<4x256xf32>
    %39 = arith.mulf %38, %6 : vector<4x256xf32>
    %c15_i32 = arith.constant 15 : i32
    %40 = tpu.dynamic_rotate %35 by %c15_i32 dim 1 : vector<4x256xf32>, i32 -> vector<4x256xf32>
    %41 = arith.mulf %40, %9 : vector<4x256xf32>
    %c1_i32 = arith.constant 1 : i32
    %42 = tpu.dynamic_rotate %35 by %c1_i32 dim 1 : vector<4x256xf32>, i32 -> vector<4x256xf32>
    %43 = arith.mulf %42, %12 : vector<4x256xf32>
    %c255_i32 = arith.constant 255 : i32
    %44 = tpu.dynamic_rotate %35 by %c255_i32 dim 1 : vector<4x256xf32>, i32 -> vector<4x256xf32>
    %45 = arith.mulf %44, %15 : vector<4x256xf32>
    %c241_i32 = arith.constant 241 : i32
    %46 = tpu.dynamic_rotate %35 by %c241_i32 dim 1 : vector<4x256xf32>, i32 -> vector<4x256xf32>
    %47 = arith.mulf %46, %18 : vector<4x256xf32>
    %c240_i32 = arith.constant 240 : i32
    %48 = tpu.dynamic_rotate %35 by %c240_i32 dim 1 : vector<4x256xf32>, i32 -> vector<4x256xf32>
    %49 = arith.mulf %48, %21 : vector<4x256xf32>
    %c239_i32 = arith.constant 239 : i32
    %50 = tpu.dynamic_rotate %35 by %c239_i32 dim 1 : vector<4x256xf32>, i32 -> vector<4x256xf32>
    %51 = arith.mulf %50, %24 : vector<4x256xf32>
    %52 = tpu.concatenate %37, %39, %41, %43, %35, %45, %47, %49, %51, %25 in 0 : vector<4x256xf32>, vector<4x256xf32>, vector<4x256xf32>, vector<4x256xf32>, vector<4x256xf32>, vector<4x256xf32>, vector<4x256xf32>, vector<4x256xf32>, vector<4x256xf32>, vector<4x256xf32> -> vector<40x256xf32>
    %c0_9 = arith.constant 0 : index
    %c0_10 = arith.constant 0 : index
    %53 = vector.load %arg10[%c0_9, %c0_10] : memref<440x256xf32, #tpu.memory_space<vmem>>, vector<40x256xf32>
    tpu.vector_store %arg10[%c0_9, %c0_10], %52 {strides = array<i32>} : memref<440x256xf32, #tpu.memory_space<vmem>>, vector<40x256xf32>,
    %54 = vector.extract_strided_slice %33 {offsets = [4, 0], sizes = [4, 256], strides = [1, 1]} : vector<16x256xf32> to vector<4x256xf32>
    %c17_i32_11 = arith.constant 17 : i32
    %55 = tpu.dynamic_rotate %54 by %c17_i32_11 dim 1 : vector<4x256xf32>, i32 -> vector<4x256xf32>
    %56 = arith.mulf %55, %3 : vector<4x256xf32>
    %c16_i32_12 = arith.constant 16 : i32
    %57 = tpu.dynamic_rotate %54 by %c16_i32_12 dim 1 : vector<4x256xf32>, i32 -> vector<4x256xf32>
    %58 = arith.mulf %57, %6 : vector<4x256xf32>
    %c15_i32_13 = arith.constant 15 : i32
    %59 = tpu.dynamic_rotate %54 by %c15_i32_13 dim 1 : vector<4x256xf32>, i32 -> vector<4x256xf32>
    %60 = arith.mulf %59, %9 : vector<4x256xf32>
    %c1_i32_14 = arith.constant 1 : i32
    %61 = tpu.dynamic_rotate %54 by %c1_i32_14 dim 1 : vector<4x256xf32>, i32 -> vector<4x256xf32>
    %62 = arith.mulf %61, %12 : vector<4x256xf32>
    %c255_i32_15 = arith.constant 255 : i32
    %63 = tpu.dynamic_rotate %54 by %c255_i32_15 dim 1 : vector<4x256xf32>, i32 -> vector<4x256xf32>
    %64 = arith.mulf %63, %15 : vector<4x256xf32>
    %c241_i32_16 = arith.constant 241 : i32
    %65 = tpu.dynamic_rotate %54 by %c241_i32_16 dim 1 : vector<4x256xf32>, i32 -> vector<4x256xf32>
    %66 = arith.mulf %65, %18 : vector<4x256xf32>
    %c240_i32_17 = arith.constant 240 : i32
    %67 = tpu.dynamic_rotate %54 by %c240_i32_17 dim 1 : vector<4x256xf32>, i32 -> vector<4x256xf32>
    %68 = arith.mulf %67, %21 : vector<4x256xf32>
    %c239_i32_18 = arith.constant 239 : i32
    %69 = tpu.dynamic_rotate %54 by %c239_i32_18 dim 1 : vector<4x256xf32>, i32 -> vector<4x256xf32>
    %70 = arith.mulf %69, %24 : vector<4x256xf32>
    %71 = tpu.concatenate %56, %58, %60, %62, %54, %64, %66, %68, %70, %25 in 0 : vector<4x256xf32>, vector<4x256xf32>, vector<4x256xf32>, vector<4x256xf32>, vector<4x256xf32>, vector<4x256xf32>, vector<4x256xf32>, vector<4x256xf32>, vector<4x256xf32>, vector<4x256xf32> -> vector<40x256xf32>
    %c40 = arith.constant 40 : index
    %c0_19 = arith.constant 0 : index
    %72 = vector.load %arg10[%c40, %c0_19] : memref<440x256xf32, #tpu.memory_space<vmem>>, vector<40x256xf32>
    tpu.vector_store %arg10[%c40, %c0_19], %71 {strides = array<i32>} : memref<440x256xf32, #tpu.memory_space<vmem>>, vector<40x256xf32>,
    %73 = vector.extract_strided_slice %33 {offsets = [8, 0], sizes = [4, 256], strides = [1, 1]} : vector<16x256xf32> to vector<4x256xf32>
    %c17_i32_20 = arith.constant 17 : i32
    %74 = tpu.dynamic_rotate %73 by %c17_i32_20 dim 1 : vector<4x256xf32>, i32 -> vector<4x256xf32>
    %75 = arith.mulf %74, %3 : vector<4x256xf32>
    %c16_i32_21 = arith.constant 16 : i32
    %76 = tpu.dynamic_rotate %73 by %c16_i32_21 dim 1 : vector<4x256xf32>, i32 -> vector<4x256xf32>
    %77 = arith.mulf %76, %6 : vector<4x256xf32>
    %c15_i32_22 = arith.constant 15 : i32
    %78 = tpu.dynamic_rotate %73 by %c15_i32_22 dim 1 : vector<4x256xf32>, i32 -> vector<4x256xf32>
    %79 = arith.mulf %78, %9 : vector<4x256xf32>
    %c1_i32_23 = arith.constant 1 : i32
    %80 = tpu.dynamic_rotate %73 by %c1_i32_23 dim 1 : vector<4x256xf32>, i32 -> vector<4x256xf32>
    %81 = arith.mulf %80, %12 : vector<4x256xf32>
    %c255_i32_24 = arith.constant 255 : i32
    %82 = tpu.dynamic_rotate %73 by %c255_i32_24 dim 1 : vector<4x256xf32>, i32 -> vector<4x256xf32>
    %83 = arith.mulf %82, %15 : vector<4x256xf32>
    %c241_i32_25 = arith.constant 241 : i32
    %84 = tpu.dynamic_rotate %73 by %c241_i32_25 dim 1 : vector<4x256xf32>, i32 -> vector<4x256xf32>
    %85 = arith.mulf %84, %18 : vector<4x256xf32>
    %c240_i32_26 = arith.constant 240 : i32
    %86 = tpu.dynamic_rotate %73 by %c240_i32_26 dim 1 : vector<4x256xf32>, i32 -> vector<4x256xf32>
    %87 = arith.mulf %86, %21 : vector<4x256xf32>
    %c239_i32_27 = arith.constant 239 : i32
    %88 = tpu.dynamic_rotate %73 by %c239_i32_27 dim 1 : vector<4x256xf32>, i32 -> vector<4x256xf32>
    %89 = arith.mulf %88, %24 : vector<4x256xf32>
    %90 = tpu.concatenate %75, %77, %79, %81, %73, %83, %85, %87, %89, %25 in 0 : vector<4x256xf32>, vector<4x256xf32>, vector<4x256xf32>, vector<4x256xf32>, vector<4x256xf32>, vector<4x256xf32>, vector<4x256xf32>, vector<4x256xf32>, vector<4x256xf32>, vector<4x256xf32> -> vector<40x256xf32>
    %c80 = arith.constant 80 : index
    %c0_28 = arith.constant 0 : index
    %91 = vector.load %arg10[%c80, %c0_28] : memref<440x256xf32, #tpu.memory_space<vmem>>, vector<40x256xf32>
    tpu.vector_store %arg10[%c80, %c0_28], %90 {strides = array<i32>} : memref<440x256xf32, #tpu.memory_space<vmem>>, vector<40x256xf32>,
    %92 = vector.extract_strided_slice %33 {offsets = [12, 0], sizes = [4, 256], strides = [1, 1]} : vector<16x256xf32> to vector<4x256xf32>
    %c17_i32_29 = arith.constant 17 : i32
    %93 = tpu.dynamic_rotate %92 by %c17_i32_29 dim 1 : vector<4x256xf32>, i32 -> vector<4x256xf32>
    %94 = arith.mulf %93, %3 : vector<4x256xf32>
    %c16_i32_30 = arith.constant 16 : i32
    %95 = tpu.dynamic_rotate %92 by %c16_i32_30 dim 1 : vector<4x256xf32>, i32 -> vector<4x256xf32>
    %96 = arith.mulf %95, %6 : vector<4x256xf32>
    %c15_i32_31 = arith.constant 15 : i32
    %97 = tpu.dynamic_rotate %92 by %c15_i32_31 dim 1 : vector<4x256xf32>, i32 -> vector<4x256xf32>
    %98 = arith.mulf %97, %9 : vector<4x256xf32>
    %c1_i32_32 = arith.constant 1 : i32
    %99 = tpu.dynamic_rotate %92 by %c1_i32_32 dim 1 : vector<4x256xf32>, i32 -> vector<4x256xf32>
    %100 = arith.mulf %99, %12 : vector<4x256xf32>
    %c255_i32_33 = arith.constant 255 : i32
    %101 = tpu.dynamic_rotate %92 by %c255_i32_33 dim 1 : vector<4x256xf32>, i32 -> vector<4x256xf32>
    %102 = arith.mulf %101, %15 : vector<4x256xf32>
    %c241_i32_34 = arith.constant 241 : i32
    %103 = tpu.dynamic_rotate %92 by %c241_i32_34 dim 1 : vector<4x256xf32>, i32 -> vector<4x256xf32>
    %104 = arith.mulf %103, %18 : vector<4x256xf32>
    %c240_i32_35 = arith.constant 240 : i32
    %105 = tpu.dynamic_rotate %92 by %c240_i32_35 dim 1 : vector<4x256xf32>, i32 -> vector<4x256xf32>
    %106 = arith.mulf %105, %21 : vector<4x256xf32>
    %c239_i32_36 = arith.constant 239 : i32
    %107 = tpu.dynamic_rotate %92 by %c239_i32_36 dim 1 : vector<4x256xf32>, i32 -> vector<4x256xf32>
    %108 = arith.mulf %107, %24 : vector<4x256xf32>
    %109 = tpu.concatenate %94, %96, %98, %100, %92, %102, %104, %106, %108, %25 in 0 : vector<4x256xf32>, vector<4x256xf32>, vector<4x256xf32>, vector<4x256xf32>, vector<4x256xf32>, vector<4x256xf32>, vector<4x256xf32>, vector<4x256xf32>, vector<4x256xf32>, vector<4x256xf32> -> vector<40x256xf32>
    %c120 = arith.constant 120 : index
    %c0_37 = arith.constant 0 : index
    %110 = vector.load %arg10[%c120, %c0_37] : memref<440x256xf32, #tpu.memory_space<vmem>>, vector<40x256xf32>
    tpu.vector_store %arg10[%c120, %c0_37], %109 {strides = array<i32>} : memref<440x256xf32, #tpu.memory_space<vmem>>, vector<40x256xf32>,
    %cst_38 = arith.constant 0.000000e+00 : f32
    %111 = vector.broadcast %cst_38 : f32 to vector<4x256xf32>
    %c0_39 = arith.constant 0 : index
    %c0_40 = arith.constant 0 : index
    %112 = vector.load %arg10[%c0_39, %c0_40] : memref<440x256xf32, #tpu.memory_space<vmem>>, vector<160x256xf32>
    %c0_41 = arith.constant 0 : index
    %c0_42 = arith.constant 0 : index
    %c0_43 = arith.constant 0 : index
    %113 = vector.load %arg4[%c0_41, %c0_42, %c0_43] : memref<8x4x160xf32, #tpu.memory_space<vmem>>, vector<1x4x160xf32>
    %114 = vector.shape_cast %113 : vector<1x4x160xf32> to vector<4x160xf32>
    %cst_44 = arith.constant dense<0.000000e+00> : vector<4x256xf32>
    %115 = tpu.matmul %114, %112, %cst_44 {dimension_numbers = #tpu.dot_dimension_numbers<[1], [0], [0], [1], [0, 0, 1, 1], [], []>} : vector<4x160xf32>, vector<160x256xf32>, vector<4x256xf32> -> vector<4x256xf32>
    %c0_45 = arith.constant 0 : index
    %c0_46 = arith.constant 0 : index
    %c0_47 = arith.constant 0 : index
    %116 = vector.load %arg5[%c0_45, %c0_46, %c0_47] : memref<8x4x1xf32, #tpu.memory_space<vmem>>, vector<1x4x1xf32>
    %117 = vector.shape_cast %116 : vector<1x4x1xf32> to vector<4x1xf32>
    %118 = vector.broadcast %117 : vector<4x1xf32> to vector<4x256xf32>
    %119 = arith.addf %115, %118 : vector<4x256xf32>
    %c17_i32_48 = arith.constant 17 : i32
    %120 = tpu.dynamic_rotate %119 by %c17_i32_48 dim 1 : vector<4x256xf32>, i32 -> vector<4x256xf32>
    %121 = arith.mulf %120, %3 : vector<4x256xf32>
    %c16_i32_49 = arith.constant 16 : i32
    %122 = tpu.dynamic_rotate %119 by %c16_i32_49 dim 1 : vector<4x256xf32>, i32 -> vector<4x256xf32>
    %123 = arith.mulf %122, %6 : vector<4x256xf32>
    %c15_i32_50 = arith.constant 15 : i32
    %124 = tpu.dynamic_rotate %119 by %c15_i32_50 dim 1 : vector<4x256xf32>, i32 -> vector<4x256xf32>
    %125 = arith.mulf %124, %9 : vector<4x256xf32>
    %c1_i32_51 = arith.constant 1 : i32
    %126 = tpu.dynamic_rotate %119 by %c1_i32_51 dim 1 : vector<4x256xf32>, i32 -> vector<4x256xf32>
    %127 = arith.mulf %126, %12 : vector<4x256xf32>
    %c255_i32_52 = arith.constant 255 : i32
    %128 = tpu.dynamic_rotate %119 by %c255_i32_52 dim 1 : vector<4x256xf32>, i32 -> vector<4x256xf32>
    %129 = arith.mulf %128, %15 : vector<4x256xf32>
    %c241_i32_53 = arith.constant 241 : i32
    %130 = tpu.dynamic_rotate %119 by %c241_i32_53 dim 1 : vector<4x256xf32>, i32 -> vector<4x256xf32>
    %131 = arith.mulf %130, %18 : vector<4x256xf32>
    %c240_i32_54 = arith.constant 240 : i32
    %132 = tpu.dynamic_rotate %119 by %c240_i32_54 dim 1 : vector<4x256xf32>, i32 -> vector<4x256xf32>
    %133 = arith.mulf %132, %21 : vector<4x256xf32>
    %c239_i32_55 = arith.constant 239 : i32
    %134 = tpu.dynamic_rotate %119 by %c239_i32_55 dim 1 : vector<4x256xf32>, i32 -> vector<4x256xf32>
    %135 = arith.mulf %134, %24 : vector<4x256xf32>
    %136 = tpu.concatenate %121, %123, %125, %127, %119, %129, %131, %133, %135, %25 in 0 : vector<4x256xf32>, vector<4x256xf32>, vector<4x256xf32>, vector<4x256xf32>, vector<4x256xf32>, vector<4x256xf32>, vector<4x256xf32>, vector<4x256xf32>, vector<4x256xf32>, vector<4x256xf32> -> vector<40x256xf32>
    %c160 = arith.constant 160 : index
    %c0_56 = arith.constant 0 : index
    %137 = vector.load %arg10[%c160, %c0_56] : memref<440x256xf32, #tpu.memory_space<vmem>>, vector<40x256xf32>
    tpu.vector_store %arg10[%c160, %c0_56], %136 {strides = array<i32>} : memref<440x256xf32, #tpu.memory_space<vmem>>, vector<40x256xf32>,
    %c40_57 = arith.constant 40 : index
    %c0_58 = arith.constant 0 : index
    %138 = vector.load %arg10[%c40_57, %c0_58] : memref<440x256xf32, #tpu.memory_space<vmem>>, vector<160x256xf32>
    %c1 = arith.constant 1 : index
    %c0_59 = arith.constant 0 : index
    %c0_60 = arith.constant 0 : index
    %139 = vector.load %arg4[%c1, %c0_59, %c0_60] : memref<8x4x160xf32, #tpu.memory_space<vmem>>, vector<1x4x160xf32>
    %140 = vector.shape_cast %139 : vector<1x4x160xf32> to vector<4x160xf32>
    %cst_61 = arith.constant dense<0.000000e+00> : vector<4x256xf32>
    %141 = tpu.matmul %140, %138, %cst_61 {dimension_numbers = #tpu.dot_dimension_numbers<[1], [0], [0], [1], [0, 0, 1, 1], [], []>} : vector<4x160xf32>, vector<160x256xf32>, vector<4x256xf32> -> vector<4x256xf32>
    %c1_62 = arith.constant 1 : index
    %c0_63 = arith.constant 0 : index
    %c0_64 = arith.constant 0 : index
    %142 = vector.load %arg5[%c1_62, %c0_63, %c0_64] : memref<8x4x1xf32, #tpu.memory_space<vmem>>, vector<1x4x1xf32>
    %143 = vector.shape_cast %142 : vector<1x4x1xf32> to vector<4x1xf32>
    %144 = vector.broadcast %143 : vector<4x1xf32> to vector<4x256xf32>
    %145 = arith.addf %141, %144 : vector<4x256xf32>
    %c17_i32_65 = arith.constant 17 : i32
    %146 = tpu.dynamic_rotate %145 by %c17_i32_65 dim 1 : vector<4x256xf32>, i32 -> vector<4x256xf32>
    %147 = arith.mulf %146, %3 : vector<4x256xf32>
    %c16_i32_66 = arith.constant 16 : i32
    %148 = tpu.dynamic_rotate %145 by %c16_i32_66 dim 1 : vector<4x256xf32>, i32 -> vector<4x256xf32>
    %149 = arith.mulf %148, %6 : vector<4x256xf32>
    %c15_i32_67 = arith.constant 15 : i32
    %150 = tpu.dynamic_rotate %145 by %c15_i32_67 dim 1 : vector<4x256xf32>, i32 -> vector<4x256xf32>
    %151 = arith.mulf %150, %9 : vector<4x256xf32>
    %c1_i32_68 = arith.constant 1 : i32
    %152 = tpu.dynamic_rotate %145 by %c1_i32_68 dim 1 : vector<4x256xf32>, i32 -> vector<4x256xf32>
    %153 = arith.mulf %152, %12 : vector<4x256xf32>
    %c255_i32_69 = arith.constant 255 : i32
    %154 = tpu.dynamic_rotate %145 by %c255_i32_69 dim 1 : vector<4x256xf32>, i32 -> vector<4x256xf32>
    %155 = arith.mulf %154, %15 : vector<4x256xf32>
    %c241_i32_70 = arith.constant 241 : i32
    %156 = tpu.dynamic_rotate %145 by %c241_i32_70 dim 1 : vector<4x256xf32>, i32 -> vector<4x256xf32>
    %157 = arith.mulf %156, %18 : vector<4x256xf32>
    %c240_i32_71 = arith.constant 240 : i32
    %158 = tpu.dynamic_rotate %145 by %c240_i32_71 dim 1 : vector<4x256xf32>, i32 -> vector<4x256xf32>
    %159 = arith.mulf %158, %21 : vector<4x256xf32>
    %c239_i32_72 = arith.constant 239 : i32
    %160 = tpu.dynamic_rotate %145 by %c239_i32_72 dim 1 : vector<4x256xf32>, i32 -> vector<4x256xf32>
    %161 = arith.mulf %160, %24 : vector<4x256xf32>
    %162 = tpu.concatenate %147, %149, %151, %153, %145, %155, %157, %159, %161, %25 in 0 : vector<4x256xf32>, vector<4x256xf32>, vector<4x256xf32>, vector<4x256xf32>, vector<4x256xf32>, vector<4x256xf32>, vector<4x256xf32>, vector<4x256xf32>, vector<4x256xf32>, vector<4x256xf32> -> vector<40x256xf32>
    %c200 = arith.constant 200 : index
    %c0_73 = arith.constant 0 : index
    %163 = vector.load %arg10[%c200, %c0_73] : memref<440x256xf32, #tpu.memory_space<vmem>>, vector<40x256xf32>
    tpu.vector_store %arg10[%c200, %c0_73], %162 {strides = array<i32>} : memref<440x256xf32, #tpu.memory_space<vmem>>, vector<40x256xf32>,
    %c80_74 = arith.constant 80 : index
    %c0_75 = arith.constant 0 : index
    %164 = vector.load %arg10[%c80_74, %c0_75] : memref<440x256xf32, #tpu.memory_space<vmem>>, vector<160x256xf32>
    %c2 = arith.constant 2 : index
    %c0_76 = arith.constant 0 : index
    %c0_77 = arith.constant 0 : index
    %165 = vector.load %arg4[%c2, %c0_76, %c0_77] : memref<8x4x160xf32, #tpu.memory_space<vmem>>, vector<1x4x160xf32>
    %166 = vector.shape_cast %165 : vector<1x4x160xf32> to vector<4x160xf32>
    %cst_78 = arith.constant dense<0.000000e+00> : vector<4x256xf32>
    %167 = tpu.matmul %166, %164, %cst_78 {dimension_numbers = #tpu.dot_dimension_numbers<[1], [0], [0], [1], [0, 0, 1, 1], [], []>} : vector<4x160xf32>, vector<160x256xf32>, vector<4x256xf32> -> vector<4x256xf32>
    %c2_79 = arith.constant 2 : index
    %c0_80 = arith.constant 0 : index
    %c0_81 = arith.constant 0 : index
    %168 = vector.load %arg5[%c2_79, %c0_80, %c0_81] : memref<8x4x1xf32, #tpu.memory_space<vmem>>, vector<1x4x1xf32>
    %169 = vector.shape_cast %168 : vector<1x4x1xf32> to vector<4x1xf32>
    %170 = vector.broadcast %169 : vector<4x1xf32> to vector<4x256xf32>
    %171 = arith.addf %167, %170 : vector<4x256xf32>
    %c17_i32_82 = arith.constant 17 : i32
    %172 = tpu.dynamic_rotate %171 by %c17_i32_82 dim 1 : vector<4x256xf32>, i32 -> vector<4x256xf32>
    %173 = arith.mulf %172, %3 : vector<4x256xf32>
    %c16_i32_83 = arith.constant 16 : i32
    %174 = tpu.dynamic_rotate %171 by %c16_i32_83 dim 1 : vector<4x256xf32>, i32 -> vector<4x256xf32>
    %175 = arith.mulf %174, %6 : vector<4x256xf32>
    %c15_i32_84 = arith.constant 15 : i32
    %176 = tpu.dynamic_rotate %171 by %c15_i32_84 dim 1 : vector<4x256xf32>, i32 -> vector<4x256xf32>
    %177 = arith.mulf %176, %9 : vector<4x256xf32>
    %c1_i32_85 = arith.constant 1 : i32
    %178 = tpu.dynamic_rotate %171 by %c1_i32_85 dim 1 : vector<4x256xf32>, i32 -> vector<4x256xf32>
    %179 = arith.mulf %178, %12 : vector<4x256xf32>
    %c255_i32_86 = arith.constant 255 : i32
    %180 = tpu.dynamic_rotate %171 by %c255_i32_86 dim 1 : vector<4x256xf32>, i32 -> vector<4x256xf32>
    %181 = arith.mulf %180, %15 : vector<4x256xf32>
    %c241_i32_87 = arith.constant 241 : i32
    %182 = tpu.dynamic_rotate %171 by %c241_i32_87 dim 1 : vector<4x256xf32>, i32 -> vector<4x256xf32>
    %183 = arith.mulf %182, %18 : vector<4x256xf32>
    %c240_i32_88 = arith.constant 240 : i32
    %184 = tpu.dynamic_rotate %171 by %c240_i32_88 dim 1 : vector<4x256xf32>, i32 -> vector<4x256xf32>
    %185 = arith.mulf %184, %21 : vector<4x256xf32>
    %c239_i32_89 = arith.constant 239 : i32
    %186 = tpu.dynamic_rotate %171 by %c239_i32_89 dim 1 : vector<4x256xf32>, i32 -> vector<4x256xf32>
    %187 = arith.mulf %186, %24 : vector<4x256xf32>
    %188 = tpu.concatenate %173, %175, %177, %179, %171, %181, %183, %185, %187, %25 in 0 : vector<4x256xf32>, vector<4x256xf32>, vector<4x256xf32>, vector<4x256xf32>, vector<4x256xf32>, vector<4x256xf32>, vector<4x256xf32>, vector<4x256xf32>, vector<4x256xf32>, vector<4x256xf32> -> vector<40x256xf32>
    %c240 = arith.constant 240 : index
    %c0_90 = arith.constant 0 : index
    %189 = vector.load %arg10[%c240, %c0_90] : memref<440x256xf32, #tpu.memory_space<vmem>>, vector<40x256xf32>
    tpu.vector_store %arg10[%c240, %c0_90], %188 {strides = array<i32>} : memref<440x256xf32, #tpu.memory_space<vmem>>, vector<40x256xf32>,
    %c120_91 = arith.constant 120 : index
    %c0_92 = arith.constant 0 : index
    %190 = vector.load %arg10[%c120_91, %c0_92] : memref<440x256xf32, #tpu.memory_space<vmem>>, vector<160x256xf32>
    %c3 = arith.constant 3 : index
    %c0_93 = arith.constant 0 : index
    %c0_94 = arith.constant 0 : index
    %191 = vector.load %arg4[%c3, %c0_93, %c0_94] : memref<8x4x160xf32, #tpu.memory_space<vmem>>, vector<1x4x160xf32>
    %192 = vector.shape_cast %191 : vector<1x4x160xf32> to vector<4x160xf32>
    %cst_95 = arith.constant dense<0.000000e+00> : vector<4x256xf32>
    %193 = tpu.matmul %192, %190, %cst_95 {dimension_numbers = #tpu.dot_dimension_numbers<[1], [0], [0], [1], [0, 0, 1, 1], [], []>} : vector<4x160xf32>, vector<160x256xf32>, vector<4x256xf32> -> vector<4x256xf32>
    %c3_96 = arith.constant 3 : index
    %c0_97 = arith.constant 0 : index
    %c0_98 = arith.constant 0 : index
    %194 = vector.load %arg5[%c3_96, %c0_97, %c0_98] : memref<8x4x1xf32, #tpu.memory_space<vmem>>, vector<1x4x1xf32>
    %195 = vector.shape_cast %194 : vector<1x4x1xf32> to vector<4x1xf32>
    %196 = vector.broadcast %195 : vector<4x1xf32> to vector<4x256xf32>
    %197 = arith.addf %193, %196 : vector<4x256xf32>
    %c17_i32_99 = arith.constant 17 : i32
    %198 = tpu.dynamic_rotate %197 by %c17_i32_99 dim 1 : vector<4x256xf32>, i32 -> vector<4x256xf32>
    %199 = arith.mulf %198, %3 : vector<4x256xf32>
    %c16_i32_100 = arith.constant 16 : i32
    %200 = tpu.dynamic_rotate %197 by %c16_i32_100 dim 1 : vector<4x256xf32>, i32 -> vector<4x256xf32>
    %201 = arith.mulf %200, %6 : vector<4x256xf32>
    %c15_i32_101 = arith.constant 15 : i32
    %202 = tpu.dynamic_rotate %197 by %c15_i32_101 dim 1 : vector<4x256xf32>, i32 -> vector<4x256xf32>
    %203 = arith.mulf %202, %9 : vector<4x256xf32>
    %c1_i32_102 = arith.constant 1 : i32
    %204 = tpu.dynamic_rotate %197 by %c1_i32_102 dim 1 : vector<4x256xf32>, i32 -> vector<4x256xf32>
    %205 = arith.mulf %204, %12 : vector<4x256xf32>
    %c255_i32_103 = arith.constant 255 : i32
    %206 = tpu.dynamic_rotate %197 by %c255_i32_103 dim 1 : vector<4x256xf32>, i32 -> vector<4x256xf32>
    %207 = arith.mulf %206, %15 : vector<4x256xf32>
    %c241_i32_104 = arith.constant 241 : i32
    %208 = tpu.dynamic_rotate %197 by %c241_i32_104 dim 1 : vector<4x256xf32>, i32 -> vector<4x256xf32>
    %209 = arith.mulf %208, %18 : vector<4x256xf32>
    %c240_i32_105 = arith.constant 240 : i32
    %210 = tpu.dynamic_rotate %197 by %c240_i32_105 dim 1 : vector<4x256xf32>, i32 -> vector<4x256xf32>
    %211 = arith.mulf %210, %21 : vector<4x256xf32>
    %c239_i32_106 = arith.constant 239 : i32
    %212 = tpu.dynamic_rotate %197 by %c239_i32_106 dim 1 : vector<4x256xf32>, i32 -> vector<4x256xf32>
    %213 = arith.mulf %212, %24 : vector<4x256xf32>
    %214 = tpu.concatenate %199, %201, %203, %205, %197, %207, %209, %211, %213, %25 in 0 : vector<4x256xf32>, vector<4x256xf32>, vector<4x256xf32>, vector<4x256xf32>, vector<4x256xf32>, vector<4x256xf32>, vector<4x256xf32>, vector<4x256xf32>, vector<4x256xf32>, vector<4x256xf32> -> vector<40x256xf32>
    %c280 = arith.constant 280 : index
    %c0_107 = arith.constant 0 : index
    %215 = vector.load %arg10[%c280, %c0_107] : memref<440x256xf32, #tpu.memory_space<vmem>>, vector<40x256xf32>
    tpu.vector_store %arg10[%c280, %c0_107], %214 {strides = array<i32>} : memref<440x256xf32, #tpu.memory_space<vmem>>, vector<40x256xf32>,
    %c160_108 = arith.constant 160 : index
    %c0_109 = arith.constant 0 : index
    %216 = vector.load %arg10[%c160_108, %c0_109] : memref<440x256xf32, #tpu.memory_space<vmem>>, vector<160x256xf32>
    %c4 = arith.constant 4 : index
    %c0_110 = arith.constant 0 : index
    %c0_111 = arith.constant 0 : index
    %217 = vector.load %arg4[%c4, %c0_110, %c0_111] : memref<8x4x160xf32, #tpu.memory_space<vmem>>, vector<1x4x160xf32>
    %218 = vector.shape_cast %217 : vector<1x4x160xf32> to vector<4x160xf32>
    %cst_112 = arith.constant dense<0.000000e+00> : vector<4x256xf32>
    %219 = tpu.matmul %218, %216, %cst_112 {dimension_numbers = #tpu.dot_dimension_numbers<[1], [0], [0], [1], [0, 0, 1, 1], [], []>} : vector<4x160xf32>, vector<160x256xf32>, vector<4x256xf32> -> vector<4x256xf32>
    %c4_113 = arith.constant 4 : index
    %c0_114 = arith.constant 0 : index
    %c0_115 = arith.constant 0 : index
    %220 = vector.load %arg5[%c4_113, %c0_114, %c0_115] : memref<8x4x1xf32, #tpu.memory_space<vmem>>, vector<1x4x1xf32>
    %221 = vector.shape_cast %220 : vector<1x4x1xf32> to vector<4x1xf32>
    %222 = vector.broadcast %221 : vector<4x1xf32> to vector<4x256xf32>
    %223 = arith.addf %219, %222 : vector<4x256xf32>
    %c0_116 = arith.constant 0 : index
    %c0_117 = arith.constant 0 : index
    %224 = vector.load %arg6[%c0_116, %c0_117] : memref<4x16xf32, #tpu.memory_space<vmem>>, vector<4x4xf32>
    %cst_118 = arith.constant dense<0.000000e+00> : vector<4x256xf32>
    %225 = tpu.matmul %224, %223, %cst_118 {dimension_numbers = #tpu.dot_dimension_numbers<[1], [0], [0], [1], [0, 0, 1, 1], [], []>} : vector<4x4xf32>, vector<4x256xf32>, vector<4x256xf32> -> vector<4x256xf32>
    %226 = arith.addf %111, %225 : vector<4x256xf32>
    %c17_i32_119 = arith.constant 17 : i32
    %227 = tpu.dynamic_rotate %223 by %c17_i32_119 dim 1 : vector<4x256xf32>, i32 -> vector<4x256xf32>
    %228 = arith.mulf %227, %3 : vector<4x256xf32>
    %c16_i32_120 = arith.constant 16 : i32
    %229 = tpu.dynamic_rotate %223 by %c16_i32_120 dim 1 : vector<4x256xf32>, i32 -> vector<4x256xf32>
    %230 = arith.mulf %229, %6 : vector<4x256xf32>
    %c15_i32_121 = arith.constant 15 : i32
    %231 = tpu.dynamic_rotate %223 by %c15_i32_121 dim 1 : vector<4x256xf32>, i32 -> vector<4x256xf32>
    %232 = arith.mulf %231, %9 : vector<4x256xf32>
    %c1_i32_122 = arith.constant 1 : i32
    %233 = tpu.dynamic_rotate %223 by %c1_i32_122 dim 1 : vector<4x256xf32>, i32 -> vector<4x256xf32>
    %234 = arith.mulf %233, %12 : vector<4x256xf32>
    %c255_i32_123 = arith.constant 255 : i32
    %235 = tpu.dynamic_rotate %223 by %c255_i32_123 dim 1 : vector<4x256xf32>, i32 -> vector<4x256xf32>
    %236 = arith.mulf %235, %15 : vector<4x256xf32>
    %c241_i32_124 = arith.constant 241 : i32
    %237 = tpu.dynamic_rotate %223 by %c241_i32_124 dim 1 : vector<4x256xf32>, i32 -> vector<4x256xf32>
    %238 = arith.mulf %237, %18 : vector<4x256xf32>
    %c240_i32_125 = arith.constant 240 : i32
    %239 = tpu.dynamic_rotate %223 by %c240_i32_125 dim 1 : vector<4x256xf32>, i32 -> vector<4x256xf32>
    %240 = arith.mulf %239, %21 : vector<4x256xf32>
    %c239_i32_126 = arith.constant 239 : i32
    %241 = tpu.dynamic_rotate %223 by %c239_i32_126 dim 1 : vector<4x256xf32>, i32 -> vector<4x256xf32>
    %242 = arith.mulf %241, %24 : vector<4x256xf32>
    %243 = tpu.concatenate %228, %230, %232, %234, %223, %236, %238, %240, %242, %25 in 0 : vector<4x256xf32>, vector<4x256xf32>, vector<4x256xf32>, vector<4x256xf32>, vector<4x256xf32>, vector<4x256xf32>, vector<4x256xf32>, vector<4x256xf32>, vector<4x256xf32>, vector<4x256xf32> -> vector<40x256xf32>
    %c320 = arith.constant 320 : index
    %c0_127 = arith.constant 0 : index
    %244 = vector.load %arg10[%c320, %c0_127] : memref<440x256xf32, #tpu.memory_space<vmem>>, vector<40x256xf32>
    tpu.vector_store %arg10[%c320, %c0_127], %243 {strides = array<i32>} : memref<440x256xf32, #tpu.memory_space<vmem>>, vector<40x256xf32>,
    %c200_128 = arith.constant 200 : index
    %c0_129 = arith.constant 0 : index
    %245 = vector.load %arg10[%c200_128, %c0_129] : memref<440x256xf32, #tpu.memory_space<vmem>>, vector<160x256xf32>
    %c5 = arith.constant 5 : index
    %c0_130 = arith.constant 0 : index
    %c0_131 = arith.constant 0 : index
    %246 = vector.load %arg4[%c5, %c0_130, %c0_131] : memref<8x4x160xf32, #tpu.memory_space<vmem>>, vector<1x4x160xf32>
    %247 = vector.shape_cast %246 : vector<1x4x160xf32> to vector<4x160xf32>
    %cst_132 = arith.constant dense<0.000000e+00> : vector<4x256xf32>
    %248 = tpu.matmul %247, %245, %cst_132 {dimension_numbers = #tpu.dot_dimension_numbers<[1], [0], [0], [1], [0, 0, 1, 1], [], []>} : vector<4x160xf32>, vector<160x256xf32>, vector<4x256xf32> -> vector<4x256xf32>
    %c5_133 = arith.constant 5 : index
    %c0_134 = arith.constant 0 : index
    %c0_135 = arith.constant 0 : index
    %249 = vector.load %arg5[%c5_133, %c0_134, %c0_135] : memref<8x4x1xf32, #tpu.memory_space<vmem>>, vector<1x4x1xf32>
    %250 = vector.shape_cast %249 : vector<1x4x1xf32> to vector<4x1xf32>
    %251 = vector.broadcast %250 : vector<4x1xf32> to vector<4x256xf32>
    %252 = arith.addf %248, %251 : vector<4x256xf32>
    %c0_136 = arith.constant 0 : index
    %c4_137 = arith.constant 4 : index
    %253 = vector.load %arg6[%c0_136, %c4_137] : memref<4x16xf32, #tpu.memory_space<vmem>>, vector<4x4xf32>
    %cst_138 = arith.constant dense<0.000000e+00> : vector<4x256xf32>
    %254 = tpu.matmul %253, %252, %cst_138 {dimension_numbers = #tpu.dot_dimension_numbers<[1], [0], [0], [1], [0, 0, 1, 1], [], []>} : vector<4x4xf32>, vector<4x256xf32>, vector<4x256xf32> -> vector<4x256xf32>
    %255 = arith.addf %226, %254 : vector<4x256xf32>
    %c17_i32_139 = arith.constant 17 : i32
    %256 = tpu.dynamic_rotate %252 by %c17_i32_139 dim 1 : vector<4x256xf32>, i32 -> vector<4x256xf32>
    %257 = arith.mulf %256, %3 : vector<4x256xf32>
    %c16_i32_140 = arith.constant 16 : i32
    %258 = tpu.dynamic_rotate %252 by %c16_i32_140 dim 1 : vector<4x256xf32>, i32 -> vector<4x256xf32>
    %259 = arith.mulf %258, %6 : vector<4x256xf32>
    %c15_i32_141 = arith.constant 15 : i32
    %260 = tpu.dynamic_rotate %252 by %c15_i32_141 dim 1 : vector<4x256xf32>, i32 -> vector<4x256xf32>
    %261 = arith.mulf %260, %9 : vector<4x256xf32>
    %c1_i32_142 = arith.constant 1 : i32
    %262 = tpu.dynamic_rotate %252 by %c1_i32_142 dim 1 : vector<4x256xf32>, i32 -> vector<4x256xf32>
    %263 = arith.mulf %262, %12 : vector<4x256xf32>
    %c255_i32_143 = arith.constant 255 : i32
    %264 = tpu.dynamic_rotate %252 by %c255_i32_143 dim 1 : vector<4x256xf32>, i32 -> vector<4x256xf32>
    %265 = arith.mulf %264, %15 : vector<4x256xf32>
    %c241_i32_144 = arith.constant 241 : i32
    %266 = tpu.dynamic_rotate %252 by %c241_i32_144 dim 1 : vector<4x256xf32>, i32 -> vector<4x256xf32>
    %267 = arith.mulf %266, %18 : vector<4x256xf32>
    %c240_i32_145 = arith.constant 240 : i32
    %268 = tpu.dynamic_rotate %252 by %c240_i32_145 dim 1 : vector<4x256xf32>, i32 -> vector<4x256xf32>
    %269 = arith.mulf %268, %21 : vector<4x256xf32>
    %c239_i32_146 = arith.constant 239 : i32
    %270 = tpu.dynamic_rotate %252 by %c239_i32_146 dim 1 : vector<4x256xf32>, i32 -> vector<4x256xf32>
    %271 = arith.mulf %270, %24 : vector<4x256xf32>
    %272 = tpu.concatenate %257, %259, %261, %263, %252, %265, %267, %269, %271, %25 in 0 : vector<4x256xf32>, vector<4x256xf32>, vector<4x256xf32>, vector<4x256xf32>, vector<4x256xf32>, vector<4x256xf32>, vector<4x256xf32>, vector<4x256xf32>, vector<4x256xf32>, vector<4x256xf32> -> vector<40x256xf32>
    %c360 = arith.constant 360 : index
    %c0_147 = arith.constant 0 : index
    %273 = vector.load %arg10[%c360, %c0_147] : memref<440x256xf32, #tpu.memory_space<vmem>>, vector<40x256xf32>
    tpu.vector_store %arg10[%c360, %c0_147], %272 {strides = array<i32>} : memref<440x256xf32, #tpu.memory_space<vmem>>, vector<40x256xf32>,
    %c240_148 = arith.constant 240 : index
    %c0_149 = arith.constant 0 : index
    %274 = vector.load %arg10[%c240_148, %c0_149] : memref<440x256xf32, #tpu.memory_space<vmem>>, vector<160x256xf32>
    %c6 = arith.constant 6 : index
    %c0_150 = arith.constant 0 : index
    %c0_151 = arith.constant 0 : index
    %275 = vector.load %arg4[%c6, %c0_150, %c0_151] : memref<8x4x160xf32, #tpu.memory_space<vmem>>, vector<1x4x160xf32>
    %276 = vector.shape_cast %275 : vector<1x4x160xf32> to vector<4x160xf32>
    %cst_152 = arith.constant dense<0.000000e+00> : vector<4x256xf32>
    %277 = tpu.matmul %276, %274, %cst_152 {dimension_numbers = #tpu.dot_dimension_numbers<[1], [0], [0], [1], [0, 0, 1, 1], [], []>} : vector<4x160xf32>, vector<160x256xf32>, vector<4x256xf32> -> vector<4x256xf32>
    %c6_153 = arith.constant 6 : index
    %c0_154 = arith.constant 0 : index
    %c0_155 = arith.constant 0 : index
    %278 = vector.load %arg5[%c6_153, %c0_154, %c0_155] : memref<8x4x1xf32, #tpu.memory_space<vmem>>, vector<1x4x1xf32>
    %279 = vector.shape_cast %278 : vector<1x4x1xf32> to vector<4x1xf32>
    %280 = vector.broadcast %279 : vector<4x1xf32> to vector<4x256xf32>
    %281 = arith.addf %277, %280 : vector<4x256xf32>
    %c0_156 = arith.constant 0 : index
    %c8 = arith.constant 8 : index
    %282 = vector.load %arg6[%c0_156, %c8] : memref<4x16xf32, #tpu.memory_space<vmem>>, vector<4x4xf32>
    %cst_157 = arith.constant dense<0.000000e+00> : vector<4x256xf32>
    %283 = tpu.matmul %282, %281, %cst_157 {dimension_numbers = #tpu.dot_dimension_numbers<[1], [0], [0], [1], [0, 0, 1, 1], [], []>} : vector<4x4xf32>, vector<4x256xf32>, vector<4x256xf32> -> vector<4x256xf32>
    %284 = arith.addf %255, %283 : vector<4x256xf32>
    %c17_i32_158 = arith.constant 17 : i32
    %285 = tpu.dynamic_rotate %281 by %c17_i32_158 dim 1 : vector<4x256xf32>, i32 -> vector<4x256xf32>
    %286 = arith.mulf %285, %3 : vector<4x256xf32>
    %c16_i32_159 = arith.constant 16 : i32
    %287 = tpu.dynamic_rotate %281 by %c16_i32_159 dim 1 : vector<4x256xf32>, i32 -> vector<4x256xf32>
    %288 = arith.mulf %287, %6 : vector<4x256xf32>
    %c15_i32_160 = arith.constant 15 : i32
    %289 = tpu.dynamic_rotate %281 by %c15_i32_160 dim 1 : vector<4x256xf32>, i32 -> vector<4x256xf32>
    %290 = arith.mulf %289, %9 : vector<4x256xf32>
    %c1_i32_161 = arith.constant 1 : i32
    %291 = tpu.dynamic_rotate %281 by %c1_i32_161 dim 1 : vector<4x256xf32>, i32 -> vector<4x256xf32>
    %292 = arith.mulf %291, %12 : vector<4x256xf32>
    %c255_i32_162 = arith.constant 255 : i32
    %293 = tpu.dynamic_rotate %281 by %c255_i32_162 dim 1 : vector<4x256xf32>, i32 -> vector<4x256xf32>
    %294 = arith.mulf %293, %15 : vector<4x256xf32>
    %c241_i32_163 = arith.constant 241 : i32
    %295 = tpu.dynamic_rotate %281 by %c241_i32_163 dim 1 : vector<4x256xf32>, i32 -> vector<4x256xf32>
    %296 = arith.mulf %295, %18 : vector<4x256xf32>
    %c240_i32_164 = arith.constant 240 : i32
    %297 = tpu.dynamic_rotate %281 by %c240_i32_164 dim 1 : vector<4x256xf32>, i32 -> vector<4x256xf32>
    %298 = arith.mulf %297, %21 : vector<4x256xf32>
    %c239_i32_165 = arith.constant 239 : i32
    %299 = tpu.dynamic_rotate %281 by %c239_i32_165 dim 1 : vector<4x256xf32>, i32 -> vector<4x256xf32>
    %300 = arith.mulf %299, %24 : vector<4x256xf32>
    %301 = tpu.concatenate %286, %288, %290, %292, %281, %294, %296, %298, %300, %25 in 0 : vector<4x256xf32>, vector<4x256xf32>, vector<4x256xf32>, vector<4x256xf32>, vector<4x256xf32>, vector<4x256xf32>, vector<4x256xf32>, vector<4x256xf32>, vector<4x256xf32>, vector<4x256xf32> -> vector<40x256xf32>
    %c400 = arith.constant 400 : index
    %c0_166 = arith.constant 0 : index
    %302 = vector.load %arg10[%c400, %c0_166] : memref<440x256xf32, #tpu.memory_space<vmem>>, vector<40x256xf32>
    tpu.vector_store %arg10[%c400, %c0_166], %301 {strides = array<i32>} : memref<440x256xf32, #tpu.memory_space<vmem>>, vector<40x256xf32>,
    %c280_167 = arith.constant 280 : index
    %c0_168 = arith.constant 0 : index
    %303 = vector.load %arg10[%c280_167, %c0_168] : memref<440x256xf32, #tpu.memory_space<vmem>>, vector<160x256xf32>
    %c7 = arith.constant 7 : index
    %c0_169 = arith.constant 0 : index
    %c0_170 = arith.constant 0 : index
    %304 = vector.load %arg4[%c7, %c0_169, %c0_170] : memref<8x4x160xf32, #tpu.memory_space<vmem>>, vector<1x4x160xf32>
    %305 = vector.shape_cast %304 : vector<1x4x160xf32> to vector<4x160xf32>
    %cst_171 = arith.constant dense<0.000000e+00> : vector<4x256xf32>
    %306 = tpu.matmul %305, %303, %cst_171 {dimension_numbers = #tpu.dot_dimension_numbers<[1], [0], [0], [1], [0, 0, 1, 1], [], []>} : vector<4x160xf32>, vector<160x256xf32>, vector<4x256xf32> -> vector<4x256xf32>
    %c7_172 = arith.constant 7 : index
    %c0_173 = arith.constant 0 : index
    %c0_174 = arith.constant 0 : index
    %307 = vector.load %arg5[%c7_172, %c0_173, %c0_174] : memref<8x4x1xf32, #tpu.memory_space<vmem>>, vector<1x4x1xf32>
    %308 = vector.shape_cast %307 : vector<1x4x1xf32> to vector<4x1xf32>
    %309 = vector.broadcast %308 : vector<4x1xf32> to vector<4x256xf32>
    %310 = arith.addf %306, %309 : vector<4x256xf32>
    %c0_175 = arith.constant 0 : index
    %c12 = arith.constant 12 : index
    %311 = vector.load %arg6[%c0_175, %c12] : memref<4x16xf32, #tpu.memory_space<vmem>>, vector<4x4xf32>
    %cst_176 = arith.constant dense<0.000000e+00> : vector<4x256xf32>
    %312 = tpu.matmul %311, %310, %cst_176 {dimension_numbers = #tpu.dot_dimension_numbers<[1], [0], [0], [1], [0, 0, 1, 1], [], []>} : vector<4x4xf32>, vector<4x256xf32>, vector<4x256xf32> -> vector<4x256xf32>
    %313 = arith.addf %284, %312 : vector<4x256xf32>
    %c0_177 = arith.constant 0 : index
    %c0_178 = arith.constant 0 : index
    %314 = vector.load %arg7[%c0_177, %c0_178] : memref<4x1xf32, #tpu.memory_space<vmem>>, vector<4x1xf32>
    %315 = vector.broadcast %314 : vector<4x1xf32> to vector<4x256xf32>
    %316 = arith.addf %313, %315 : vector<4x256xf32>
    %317 = arith.addf %34, %316 : vector<4x256xf32>
    %cst_179 = arith.constant 0.000000e+00 : f32
    %318 = vector.broadcast %cst_179 : f32 to vector<4x256xf32>
    %319 = arith.maximumf %317, %318 : vector<4x256xf32>
    %c0_180 = arith.constant 0 : index
    %c0_181 = arith.constant 0 : index
    %c0_182 = arith.constant 0 : index
    %320 = vector.load %arg9[%c0_180, %c0_181, %c0_182] : memref<1x4x256xf32, #tpu.memory_space<vmem>>, vector<1x4x256xf32>
    %321 = vector.shape_cast %320 : vector<1x4x256xf32> to vector<4x256xf32>
    %322 = vector.shape_cast %319 : vector<4x256xf32> to vector<1x4x256xf32>
    tpu.vector_store %arg9[%c0_180, %c0_181, %c0_182], %322 {strides = array<i32>} : memref<1x4x256xf32, #tpu.memory_space<vmem>>, vector<1x4x256xf32>,
    return
  }
  func.func @transform_0(%arg0: i32) -> (i32, i32, i32) {
    %c0_i32 = arith.constant 0 : i32
    %c0_i32_0 = arith.constant 0 : i32
    %c0_i32_1 = arith.constant 0 : i32
    return %arg0, %c0_i32, %c0_i32_0 : i32, i32, i32
  }
  func.func @transform_1(%arg0: i32) -> (i32, i32) {
    %c0_i32 = arith.constant 0 : i32
    %c0_i32_0 = arith.constant 0 : i32
    %c0_i32_1 = arith.constant 0 : i32
    return %c0_i32, %c0_i32_0 : i32, i32
  }
  func.func @transform_2(%arg0: i32) -> (i32, i32) {
    %c0_i32 = arith.constant 0 : i32
    %c0_i32_0 = arith.constant 0 : i32
    %c0_i32_1 = arith.constant 0 : i32
    return %c0_i32, %c0_i32_0 : i32, i32
  }
  func.func @transform_3(%arg0: i32) -> (i32, i32, i32) {
    %c0_i32 = arith.constant 0 : i32
    %c0_i32_0 = arith.constant 0 : i32
    %c0_i32_1 = arith.constant 0 : i32
    %c0_i32_2 = arith.constant 0 : i32
    return %c0_i32, %c0_i32_0, %c0_i32_1 : i32, i32, i32
  }
  func.func @transform_4(%arg0: i32) -> (i32, i32, i32) {
    %c0_i32 = arith.constant 0 : i32
    %c0_i32_0 = arith.constant 0 : i32
    %c0_i32_1 = arith.constant 0 : i32
    %c0_i32_2 = arith.constant 0 : i32
    return %c0_i32, %c0_i32_0, %c0_i32_1 : i32, i32, i32
  }
  func.func @transform_5(%arg0: i32) -> (i32, i32) {
    %c0_i32 = arith.constant 0 : i32
    %c0_i32_0 = arith.constant 0 : i32
    %c0_i32_1 = arith.constant 0 : i32
    return %c0_i32, %c0_i32_0 : i32, i32
  }
  func.func @transform_6(%arg0: i32) -> (i32, i32) {
    %c0_i32 = arith.constant 0 : i32
    %c0_i32_0 = arith.constant 0 : i32
    %c0_i32_1 = arith.constant 0 : i32
    return %c0_i32, %c0_i32_0 : i32, i32
  }
  func.func @transform_7(%arg0: i32) -> (i32, i32) {
    %c0_i32 = arith.constant 0 : i32
    %c0_i32_0 = arith.constant 0 : i32
    %c0_i32_1 = arith.constant 0 : i32
    return %c0_i32, %c0_i32_0 : i32, i32
  }
  func.func @transform_8(%arg0: i32) -> (i32, i32, i32) {
    %c0_i32 = arith.constant 0 : i32
    %c0_i32_0 = arith.constant 0 : i32
    %c0_i32_1 = arith.constant 0 : i32
    return %arg0, %c0_i32, %c0_i32_0 : i32, i32, i32
  }
}

</mosaic_0001>

<bundles_post_ra>
// kernel: resdnet_block_forward.1
= control target key start
LH: loop header
LB: loop body
LE: loop exit
PB: predicated region body
PF: predicated region fallthrough
CT: control target
= control target key end

     0   :  { %s3323_s27 = smov 0   ;;  %s5402_s0 = inlined_call_operand.vmem [shape: f32[2,4,256], index: 0, kind: input, shape index: {}]   ;;  %s5403_s1 = inlined_call_operand.vmem [shape: f32[20,4], index: 1, kind: input, shape index: {}]   ;;  %s5404_s2 = inlined_call_operand.vmem [shape: f32[20,1], index: 2, kind: input, shape index: {}]   ;;  %s5405_s3 = inlined_call_operand.vmem [shape: f32[8,4,160], index: 3, kind: input, shape index: {}]   ;;  %s5406_s4 = inlined_call_operand.vmem [shape: f32[8,4,1], index: 4, kind: input, shape index: {}]   ;;  %s5407_s5 = inlined_call_operand.vmem [shape: f32[4,16], index: 5, kind: input, shape index: {}]   ;;  %s5408_s6 = inlined_call_operand.vmem [shape: f32[4,1], index: 6, kind: input, shape index: {}]   ;;  %s5409_s7 = inlined_call_operand.vmem [shape: f32[9,256], index: 7, kind: input, shape index: {}]   ;;  %s5410_s8 = inlined_call_operand.vmem [shape: f32[2,4,256], index: 8, kind: output, shape index: {}]  }
   0x1 LB: > { %s3103_s28 = sadd.s32 4294967295, %s3263_s27   ;;  %p3107_p0 = scmp.ge.s32.totalorder %s3263_s27, 1  ;;  %s3263_s27 = sphi %s3323_s27, %s18_s27  }
   0x2   : > { %p262_p1 = scmp.lt.s32.totalorder %s3263_s27, 3 }
   0x4   : > { %p263_p2 = pnand %p3107_p0, %p262_p1 }
   0x6   : > { %266 = sbr.rel (%p263_p2) target bundleno = 3392 (0xd40), region = 52 }
   0xb   : > { %p296_p3 = scmp.lt.s32.totalorder %s3103_s28, 1  ;;  %v5411_v0 = vmov 0.0   ;;  %v379_v1 = vld [vmem:[%s5404_s2 + $0x8] sm:$0xff]  ;;  %v3266_v2 = vmov 0   ;;  %v378_v3 = vld [vmem:[%s5404_s2] sm:$0xff]  ;;  %vm408_vm0 = vcmask 1043456   ;;  %v310_v57 = vlaneseq }
   0xc   : > { %477 = vmatprep.mubr.f32.mxu0 %v5411_v0  ;;  %3242 = vset.pattern.permute.xlu0 %v3266_v2  ;;  %v375_v6 = vld [vmem:[%s5403_s1] sm:$0xff]  ;;  %vm398_vm1 = vcmask 31744   ;;  %v376_v7 = vld [vmem:[%s5403_s1 + $0x8] sm:$0xff]  ;;  %s3267_s19 = smov 112   ;;  %s3268_s20 = smov 111   ;;  %vm999_vm2 = vcmask 261120  }
   0xd   : > { %s5515_s28 = smov (!%p296_p3, %s3103_s28), 1  ;;  %3243 = vset.pattern.permute.xlu1 %v3266_v2  ;;  %388 = vperm.xlu0 %3242, %v379_v1   ;;  %s3269_s21 = smov 127   ;;  %v3507_v25 = vld [vmem:[%s5405_s3] sm:$0xff]  ;;  %v311_v60 = vshrl.u32 %v310_v57, 7  ;;  %v3587_v62 = vand.u32 127, %v310_v57 }
   0xe   : > { %s3155_s9 = sshll.u32 %s5515_s28, 3  ;;  %s3270_s22 = smov 113   ;;  %5449 = vst [vmem:[#allocation9_spill] sm:$0xff] %v3507_v25  ;;  %v998_v27 = vcombine.high %v3507_v25, %v3507_v25  ;;  %v991_v28 = vld [vmem:[%s5406_s4] sm:$0xf] }
   0xf   : > { %s300_s14 = scalar_lea.vmem %s5402_s0, %s3155_s9  ;;  %s3271_s23 = smov 1   ;;  %v360_v1 = vsub.s32 7, %v311_v60  ;;  %vm556_vm3 = vcmp.lt.s32.totalorder %v3587_v62, 112  ;;  %vm565_vm4 = vcmp.lt.s32.totalorder %v3587_v62, 111  ;;  %vm538_vm5 = vcmp.lt.s32.totalorder %v3587_v62, 127 }
  0x10   : > { %v374_v4 = vld [vmem:[%s300_s14] sm:$0xff]  ;;  %s3272_s24 = smov 16   ;;  %s3273_s25 = smov 15   ;;  %3119 = vmatprep.mubr.msk.f32.mxu1 %vm999_vm2, %v998_v27  ;;  %v328_v27 = vsub.s32 2, %v311_v60  ;;  %vm547_vm6 = vcmp.lt.s32.totalorder %v3587_v62, 113  ;;  %vm511_vm7 = vcmp.lt.s32.totalorder %v3587_v62, 16 }
  0x11   : > { %v397_v5 = vcombine.high %v374_v4, %v374_v4  ;;  %383 = vperm.xlu0 %3242, %v378_v3   ;;  %s3274_s26 = smov 17   ;;  %v306_v3 = vld [vmem:[%s5409_s7] sm:$0xff]  ;;  %vm502_vm8 = vcmp.lt.s32.totalorder %v3587_v62, 17  ;;  %vm529_vm9 = vcmp.lt.s32.totalorder %v3587_v62, 1  ;;  %vm520_vm10 = vcmp.lt.s32.totalorder %v3587_v62, 15  ;;  %s3275_s17 = smov 124  }
  0x12   : > { %s3276_s13 = smov 120   ;;  %s305_s12 = scalar_lea.vmem %s5410_s8, %s3155_s9 }
  0x13   : > { %3114 = vmatprep.subr.msk.mxu0 %vm408_vm0, %v397_v5  ;;  %v307_v5 = vld [vmem:[%s5409_s7 + $0x8] sm:$0xff] }
  0x14   : > { %3115 = vmatpush1.msk.msra.mxu0 %vm408_vm0, %v374_v4 }
  0x15   : > { %3116 = vmatmul.mubr.msk.f32.vlgmr.msra.gmra.mxu0 %vm398_vm1, %v375_v6  ;;  %v344_v6 = vsub.s32 5, %v311_v60 }
  0x16   : > { %483 = vmatprep.mubr.f32.mxu0 %v5411_v0 }
  0x17   : > { %v3616_v57 = vrot.slane %v306_v3, %v344_v6 }
  0x19   : > { %3117 = vmatmul.mubr.msk.f32.gmra.mxu0 %vm398_vm1, %v376_v7  ;;  %v352_v7 = vsub.s32 6, %v311_v60 }
  0x1a   : > { %489 = vmatprep.mubr.f32.mxu0 %v5411_v0  ;;  %v3618_v0 = vrot.slane %v307_v5, %v344_v6 }
  0x1b   : > { %v3620_v25 = vrot.slane %v306_v3, %v352_v7 }
  0x88   : > { %v389_v8 = vpop.permute.xlu0 %388 }
  0x8c   : > { %v384_v9 = vpop.permute.xlu0 %383 }
  0xd5   : > { %v479_v10 = vpop.f32.mrf.mxu0 }
  0xd6   : > { %v3358_v11 = vadd.f32 %v479_v10, %v384_v9 }
  0xd7   : > { %v481_v12 = vpop.f32.mrf.mxu0 }
  0xd8   : > { %5443 = vst [vmem:[#allocation3_spill] sm:$0xff] %v3358_v11  ;;  %v3360_v13 = vadd.f32 %v481_v12, %v384_v9  ;;  %552 = vrot.lane.b32.xlu0 %v3358_v11, %s3267_s19  ;;  %v3379_v14 = vrot.slane %v3358_v11, 4  ;;  %v336_v9 = vsub.s32 3, %v311_v60 }
  0xd9   : > { %v485_v16 = vpop.f32.mrf.mxu0 }
  0xda   : > { %5444 = vst [vmem:[#allocation4_spill] sm:$0xff] %v3360_v13  ;;  %554 = vrot.lane.b32.xlu1 %v3360_v13, %s3267_s19  ;;  %5445 = vst [vmem:[#allocation5_spill] sm:$0xff] %v3379_v14  ;;  %v3384_v15 = vrot.slane %v3360_v13, 4  ;;  %v3412_v17 = vadd.f32 %v485_v16, %v389_v8  ;;  %v320_v16 = vsub.s32 1, %v311_v60 }
  0xdb   : > { %v487_v19 = vpop.f32.mrf.mxu0 }
  0xdc   : > { %561 = vrot.lane.b32.xlu0 %v3358_v11, %s3268_s20  ;;  %5446 = vst [vmem:[#allocation6_spill] sm:$0xff] %v3384_v15  ;;  %v3421_v18 = vrot.slane %v3412_v17, 4  ;;  %v3425_v20 = vadd.f32 %v487_v19, %v389_v8  ;;  %v3602_v8 = vrot.slane %v306_v3, %v360_v1  ;;  %v3610_v19 = vrot.slane %v307_v5, %v360_v1 }
  0xde   : > { %563 = vrot.lane.b32.xlu1 %v3360_v13, %s3268_s20  ;;  %5447 = vst [vmem:[#allocation7_spill] sm:$0xff] %v3421_v18  ;;  %v3462_v21 = vrot.slane %v3425_v20, 4  ;;  %5454 = vst [vmem:[#allocation14_spill] sm:$0xff] %v3602_v8 }
  0xdf   : > { %5455 = vst [vmem:[#allocation15_spill] sm:$0xff] %v3610_v19 }
  0xe0   : > { %534 = vrot.lane.b32.xlu0 %v3358_v11, %s3269_s21  ;;  %5448 = vst [vmem:[#allocation8_spill] sm:$0xff] %v3462_v21 }
  0xe2   : > { %536 = vrot.lane.b32.xlu1 %v3360_v13, %s3269_s21 }
  0xe4   : > { %543 = vrot.lane.b32.xlu0 %v3358_v11, %s3270_s22 }
  0xe6   : > { %545 = vrot.lane.b32.xlu1 %v3360_v13, %s3270_s22 }
  0xe8   : > { %668 = vrot.lane.b32.xlu0 %v3379_v14, %s3267_s19 }
  0xea   : > { %670 = vrot.lane.b32.xlu1 %v3384_v15, %s3267_s19 }
  0xec   : > { %676 = vrot.lane.b32.xlu0 %v3379_v14, %s3268_s20 }
  0xee   : > { %678 = vrot.lane.b32.xlu1 %v3384_v15, %s3268_s20 }
  0xf0   : > { %652 = vrot.lane.b32.xlu0 %v3379_v14, %s3269_s21 }
  0xf2   : > { %654 = vrot.lane.b32.xlu1 %v3384_v15, %s3269_s21 }
  0xf4   : > { %660 = vrot.lane.b32.xlu0 %v3379_v14, %s3270_s22 }
  0xf6   : > { %662 = vrot.lane.b32.xlu1 %v3384_v15, %s3270_s22 }
  0xf8   : > { %644 = vrot.lane.b32.xlu0 %v3379_v14, %s3271_s23 }
  0xfa   : > { %646 = vrot.lane.b32.xlu1 %v3384_v15, %s3271_s23 }
  0xfc   : > { %628 = vrot.lane.b32.xlu0 %v3379_v14, %s3272_s24 }
  0xfe   : > { %630 = vrot.lane.b32.xlu1 %v3384_v15, %s3272_s24 }
 0x100   : > { %636 = vrot.lane.b32.xlu0 %v3379_v14, %s3273_s25 }
 0x102   : > { %638 = vrot.lane.b32.xlu1 %v3384_v15, %s3273_s25 }
 0x104   : > { %620 = vrot.lane.b32.xlu0 %v3379_v14, %s3274_s26 }
 0x106   : > { %622 = vrot.lane.b32.xlu1 %v3384_v15, %s3274_s26  ;;  %v3637_v15 = vrot.slane %v307_v5, %v336_v9 }
 0x108   : > { %776 = vrot.lane.b32.xlu0 %v3412_v17, %s3267_s19 }
 0x10a   : > { %850 = vrot.lane.b32.xlu1 %v3421_v18, %s3272_s24 }
 0x10c   : > { %784 = vrot.lane.b32.xlu0 %v3412_v17, %s3268_s20 }
 0x10e   : > { %778 = vrot.lane.b32.xlu1 %v3425_v20, %s3267_s19 }
 0x110   : > { %760 = vrot.lane.b32.xlu0 %v3412_v17, %s3269_s21 }
 0x112   : > { %786 = vrot.lane.b32.xlu1 %v3425_v20, %s3268_s20 }
 0x114   : > { %768 = vrot.lane.b32.xlu0 %v3412_v17, %s3270_s22 }
 0x116   : > { %762 = vrot.lane.b32.xlu1 %v3425_v20, %s3269_s21 }
 0x118   : > { %752 = vrot.lane.b32.xlu0 %v3412_v17, %s3271_s23 }
 0x11a   : > { %770 = vrot.lane.b32.xlu1 %v3425_v20, %s3270_s22 }
 0x11c   : > { %736 = vrot.lane.b32.xlu0 %v3412_v17, %s3272_s24 }
 0x11e   : > { %754 = vrot.lane.b32.xlu1 %v3425_v20, %s3271_s23 }
 0x120   : > { %744 = vrot.lane.b32.xlu0 %v3412_v17, %s3273_s25 }
 0x122   : > { %738 = vrot.lane.b32.xlu1 %v3425_v20, %s3272_s24 }
 0x124   : > { %728 = vrot.lane.b32.xlu0 %v3412_v17, %s3274_s26 }
 0x126   : > { %746 = vrot.lane.b32.xlu1 %v3425_v20, %s3273_s25 }
 0x128   : > { %842 = vrot.lane.b32.xlu0 %v3421_v18, %s3274_s26 }
 0x12a   : > { %730 = vrot.lane.b32.xlu1 %v3425_v20, %s3274_s26 }
 0x12c   : > { %525 = vrot.lane.b32.xlu0 %v3358_v11, %s3271_s23 }
 0x12e   : > { %852 = vrot.lane.b32.xlu1 %v3462_v21, %s3272_s24 }
 0x130   : > { %507 = vrot.lane.b32.xlu0 %v3358_v11, %s3272_s24 }
 0x132   : > { %844 = vrot.lane.b32.xlu1 %v3462_v21, %s3274_s26 }
 0x134   : > { %516 = vrot.lane.b32.xlu0 %v3358_v11, %s3273_s25 }
 0x136   : > { %527 = vrot.lane.b32.xlu1 %v3360_v13, %s3271_s23 }
 0x138   : > { %496 = vrot.lane.b32.xlu0 %v3358_v11, %s3274_s26  ;;  %v3631_v11 = vrot.slane %v306_v3, %v336_v9 }
 0x13a   : > { %509 = vrot.lane.b32.xlu1 %v3360_v13, %s3272_s24 }
 0x13c   : > { %890 = vrot.lane.b32.xlu0 %v3421_v18, %s3267_s19 }
 0x13e   : > { %518 = vrot.lane.b32.xlu1 %v3360_v13, %s3273_s25 }
 0x140   : > { %898 = vrot.lane.b32.xlu0 %v3421_v18, %s3268_s20 }
 0x142   : > { %498 = vrot.lane.b32.xlu1 %v3360_v13, %s3274_s26  ;;  %v312_v13 = vsub.s32 0, %v311_v60  ;;  %v3649_v60 = vrot.slane %v306_v3, %v328_v27 }
 0x144   : > { %874 = vrot.lane.b32.xlu0 %v3421_v18, %s3269_s21 }
 0x146   : > { %892 = vrot.lane.b32.xlu1 %v3462_v21, %s3267_s19 }
 0x148   : > { %882 = vrot.lane.b32.xlu0 %v3421_v18, %s3270_s22 }
 0x14a   : > { %900 = vrot.lane.b32.xlu1 %v3462_v21, %s3268_s20  ;;  %v3494_v22 = vpop.permute.xlu0 %552 }
 0x14c   : > { %v3496_v23 = vpop.permute.xlu1 %554  ;;  %866 = vrot.lane.b32.xlu0 %v3421_v18, %s3271_s23 }
 0x14d   : > { %v557_v12 = vsel %vm556_vm3, %v3494_v22, %v3496_v23  ;;  %v558_v6 = vsel %vm556_vm3, %v3496_v23, %v3494_v22 }
 0x14e   : > { %876 = vrot.lane.b32.xlu1 %v3462_v21, %s3269_s21  ;;  %v3502_v24 = vpop.permute.xlu0 %561 }
 0x150   : > { %v3509_v26 = vpop.permute.xlu1 %563  ;;  %858 = vrot.lane.b32.xlu0 %v3421_v18, %s3273_s25  ;;  %v3622_v18 = vrot.slane %v307_v5, %v352_v7  ;;  %v3639_v7 = vrot.slane %v306_v3, %v320_v16 }
 0x152   : > { %884 = vrot.lane.b32.xlu1 %v3462_v21, %s3270_s22  ;;  %v3520_v29 = vpop.permute.xlu0 %534 }
 0x154   : > { %v3523_v30 = vpop.permute.xlu1 %536  ;;  %994 = vperm.xlu0 %3242, %v991_v28  }
 0x155   : > { %v540_v23 = vsel %vm538_vm5, %v3523_v30, %v3520_v29 }
 0x156   : > { %868 = vrot.lane.b32.xlu1 %v3462_v21, %s3271_s23  ;;  %v3527_v31 = vpop.permute.xlu0 %543 }
 0x157   : > { %5450 = vst [vmem:[#allocation10_spill] sm:$0xff] %v3527_v31  ;;  %v539_v31 = vsel %vm538_vm5, %v3520_v29, %v3523_v30  ;;  %v3674_v29 = vrot.slane %v307_v5, %v312_v13 }
 0x158   : > { %v3529_v32 = vpop.permute.xlu1 %545 }
 0x159   : > { %5451 = vst [vmem:[#allocation11_spill] sm:$0xff] %v3529_v32  ;;  %v3651_v32 = vrot.slane %v307_v5, %v328_v27  ;;  %v3668_v27 = vmul.f32 %v558_v6, %v3610_v19  ;;  %v3715_v6 = vld [vmem:[%s5409_s7 + $0x10] ss:$0 sm:$0xff] }
 0x15a   : > { %860 = vrot.lane.b32.xlu1 %v3462_v21, %s3273_s25  ;;  %v3533_v33 = vpop.permute.xlu0 %668  ;;  %v3625_v21 = vmul.f32 %v557_v12, %v3602_v8  ;;  %v3641_v12 = vrot.slane %v307_v5, %v320_v16 }
 0x15b   : > { %5457 = vst [vmem:[#allocation17_spill] sm:$0xff] %v3668_v27 }
 0x15c   : > { %v3535_v34 = vpop.permute.xlu1 %670  ;;  %5456 = vst [vmem:[#allocation16_spill] sm:$0xff] %v3625_v21 }
 0x15d   : > { %v673_v1 = vsel %vm556_vm3, %v3535_v34, %v3533_v33  ;;  %v672_v9 = vsel %vm556_vm3, %v3533_v33, %v3535_v34  ;;  %v3682_v33 = vsel %vm565_vm4, %v3502_v24, %v3509_v26  ;;  %v3688_v34 = vsel %vm565_vm4, %v3509_v26, %v3502_v24 }
 0x15e   : > { %v3537_v35 = vpop.permute.xlu0 %676  ;;  %v3664_v16 = vmul.f32 %v673_v1, %v3610_v19  ;;  %5458 = vst [vmem:[#allocation18_spill] sm:$0xff] %v3682_v33  ;;  %5459 = vst [vmem:[#allocation19_spill] sm:$0xff] %v3688_v34  ;;  %v3691_v1 = vmul.f32 %v539_v31, %v3616_v57  ;;  %v3701_v5 = vmul.f32 %v672_v9, %v3602_v8 }
 0x160   : > { %v3539_v36 = vpop.permute.xlu1 %678  ;;  %5460 = vst [vmem:[#allocation20_spill] sm:$0xff] %v3691_v1 }
 0x162   : > { %v3541_v37 = vpop.permute.xlu0 %652 }
 0x164   : > { %v3543_v38 = vpop.permute.xlu1 %654 }
 0x166   : > { %v3545_v39 = vpop.permute.xlu0 %660 }
 0x168   : > { %v3547_v40 = vpop.permute.xlu1 %662 }
 0x16a   : > { %v3549_v41 = vpop.permute.xlu0 %644 }
 0x16c   : > { %v3551_v42 = vpop.permute.xlu1 %646 }
 0x16e   : > { %v3553_v43 = vpop.permute.xlu0 %628 }
 0x170   : > { %v3555_v44 = vpop.permute.xlu1 %630 }
 0x172   : > { %v3557_v45 = vpop.permute.xlu0 %636 }
 0x174   : > { %v3559_v46 = vpop.permute.xlu1 %638 }
 0x176   : > { %v3561_v47 = vpop.permute.xlu0 %620 }
 0x177   : > { %5452 = vst [vmem:[#allocation12_spill] sm:$0xff] %v3561_v47 }
 0x178   : > { %v3563_v48 = vpop.permute.xlu1 %622 }
 0x179   : > { %5453 = vst [vmem:[#allocation13_spill] sm:$0xff] %v3563_v48  ;;  %v3672_v48 = vrot.slane %v306_v3, %v312_v13  ;;  %v680_v13 = vsel %vm565_vm4, %v3537_v35, %v3539_v36  ;;  %v3698_v3 = vmul.f32 %v540_v23, %v3618_v0 }
 0x17a   : > { %v3565_v49 = vpop.permute.xlu0 %776  ;;  %v3735_v23 = vmul.f32 %v3715_v6, %v680_v13 }
 0x17c   : > { %v3567_v50 = vpop.permute.xlu1 %850 }
 0x17e   : > { %v3569_v51 = vpop.permute.xlu0 %784 }
 0x180   : > { %v3571_v52 = vpop.permute.xlu1 %778 }
 0x181   : > { %v780_v24 = vsel %vm556_vm3, %v3565_v49, %v3571_v52  ;;  %v781_v26 = vsel %vm556_vm3, %v3571_v52, %v3565_v49  ;;  %v3732_v52 = vsel %vm565_vm4, %v3539_v36, %v3537_v35  ;;  %v657_v35 = vsel %vm538_vm5, %v3543_v38, %v3541_v37 }
 0x182   : > { %v3573_v53 = vpop.permute.xlu0 %760  ;;  %v782_v36 = vmul.f32 %v780_v24, %v3602_v8  ;;  %v783_v13 = vmul.f32 %v781_v26, %v3610_v19 }
 0x184   : > { %v3575_v54 = vpop.permute.xlu1 %786  ;;  %v813_v34 = vrot.slane %v783_v13, 4 }
 0x186   : > { %v3577_v55 = vpop.permute.xlu0 %768 }
 0x188   : > { %v3579_v56 = vpop.permute.xlu1 %762 }
 0x189   : > { %v765_v9 = vsel %vm538_vm5, %v3579_v56, %v3573_v53 }
 0x18a   : > { %v3581_v58 = vpop.permute.xlu0 %752 }
 0x18c   : > { %v3583_v59 = vpop.permute.xlu1 %770 }
 0x18d   : > { %v772_v24 = vsel %vm547_vm6, %v3577_v55, %v3583_v59  ;;  %v773_v26 = vsel %vm547_vm6, %v3583_v59, %v3577_v55 }
 0x18e   : > { %v3585_v61 = vpop.permute.xlu0 %736 }
 0x190   : > { %v3589_v63 = vpop.permute.xlu1 %754 }
 0x191   : > { %v756_v59 = vsel %vm529_vm9, %v3581_v58, %v3589_v63 }
 0x192   : > { %v3591_v2 = vpop.permute.xlu0 %744 }
 0x194   : > { %v3597_v4 = vpop.permute.xlu1 %738 }
 0x196   : > { %v3604_v10 = vpop.permute.xlu0 %728 }
 0x198   : > { %v3614_v28 = vpop.permute.xlu1 %746 }
 0x19a   : > { %v843_v14 = vpop.permute.xlu0 %842 }
 0x19c   : > { %v3653_v22 = vpop.permute.xlu1 %730 }
 0x19e   : > { %v3676_v30 = vpop.permute.xlu0 %525 }
 0x1a0   : > { %v853_v31 = vpop.permute.xlu1 %852 }
 0x1a1   : > { %v854_v47 = vsel %vm511_vm7, %v3567_v50, %v853_v31  ;;  %v855_v49 = vsel %vm511_vm7, %v853_v31, %v3567_v50  ;;  %v656_v50 = vsel %vm538_vm5, %v3541_v37, %v3543_v38  ;;  %v789_v31 = vsel %vm565_vm4, %v3575_v54, %v3569_v51 }
 0x1a2   : > { %v856_v21 = vmul.f32 %v855_v49, %v3639_v7  ;;  %v857_v1 = vmul.f32 %v854_v47, %v3641_v12  ;;  %v3739_v33 = vpop.permute.xlu0 %507  ;;  %v788_v47 = vsel %vm565_vm4, %v3569_v51, %v3575_v54  ;;  %v764_v49 = vsel %vm538_vm5, %v3573_v53, %v3579_v56 }
 0x1a3   : > { %v767_v37 = vmul.f32 %v765_v9, %v3618_v0  ;;  %v3781_v27 = vmul.f32 %v3715_v6, %v788_v47  ;;  %v766_v55 = vmul.f32 %v764_v49, %v3616_v57 }
 0x1a4   : > { %v845_v38 = vpop.permute.xlu1 %844  ;;  %v908_v53 = vrot.slane %v856_v21, 4  ;;  %v909_v56 = vrot.slane %v857_v1, 4  ;;  %v775_v21 = vmul.f32 %v773_v26, %v3622_v18  ;;  %v757_v1 = vsel %vm529_vm9, %v3589_v63, %v3581_v58 }
 0x1a5   : > { %v846_v51 = vsel %vm502_vm8, %v843_v14, %v845_v38  ;;  %v847_v54 = vsel %vm502_vm8, %v845_v38, %v843_v14  ;;  %v3791_v14 = vld [vmem:[%s5409_s7 + $0x18] ss:$0 sm:$0xff]  ;;  %v740_v26 = vsel %vm511_vm7, %v3585_v61, %v3597_v4  ;;  %v748_v58 = vsel %vm520_vm10, %v3591_v2, %v3614_v28 }
 0x1a6   : > { %v848_v9 = vmul.f32 %v847_v54, %v3672_v48  ;;  %v849_v19 = vmul.f32 %v846_v51, %v3674_v29  ;;  %v3778_v8 = vpop.permute.xlu0 %516  ;;  %v3807_v38 = vmul.f32 %v3791_v14, %v789_v31  ;;  %v774_v51 = vmul.f32 %v772_v24, %v3620_v25 }
 0x1a7   : > { %v807_v63 = vrot.slane %v767_v37, 4  ;;  %v741_v31 = vsel %vm511_vm7, %v3597_v4, %v3585_v61  ;;  %v749_v24 = vsel %vm520_vm10, %v3614_v28, %v3591_v2  ;;  %v758_v37 = vmul.f32 %v757_v1, %v3631_v11 }
 0x1a8   : > { %v3798_v13 = vpop.permute.xlu1 %527  ;;  %v3801_v47 = vsel %vm408_vm0, %v849_v19, %v909_v56  ;;  %v3804_v49 = vsel %vm408_vm0, %v848_v9, %v908_v53  ;;  %v759_v19 = vmul.f32 %v756_v59, %v3637_v15  ;;  %v812_v53 = vrot.slane %v782_v36, 4 }
 0x1a9   : > { %5461 = vst [vmem:[#allocation21_spill] sm:$0xff] %v3801_v47  ;;  %5462 = vst [vmem:[#allocation22_spill] sm:$0xff] %v3804_v49  ;;  %1002 = vmatprep.subr.mxu1 %v3801_v47  ;;  %v806_v56 = vrot.slane %v766_v55, 4  ;;  %v732_v9 = vsel %vm502_vm8, %v3604_v10, %v3653_v22  ;;  %v743_v61 = vmul.f32 %v740_v26, %v3641_v12 }
 0x1aa   : > { %1003 = vmatpush1.msra.mxu1 %v3804_v49  ;;  %v3829_v54 = vpop.permute.xlu0 %496  ;;  %v751_v2 = vmul.f32 %v748_v58, %v3651_v32  ;;  %v733_v4 = vsel %vm502_vm8, %v3653_v22, %v3604_v10  ;;  %v3849_v36 = vsel %vm408_vm0, %v775_v21, %v813_v34  ;;  %v3852_v55 = vmul.f32 %v656_v50, %v3616_v57 }
 0x1ab   : > { %3157 = vmatprep.subr.msk.mxu1 %vm408_vm0, %v3807_v38  ;;  %v742_v59 = vmul.f32 %v741_v31, %v3639_v7  ;;  %v750_v1 = vmul.f32 %v749_v24, %v3649_v60  ;;  %v3858_v26 = vsel %vm408_vm0, %v774_v51, %v812_v53  ;;  %v659_v10 = vmul.f32 %v657_v35, %v3618_v0 }
 0x1ac   : > { %v3844_v28 = vpop.permute.xlu1 %509  ;;  %3158 = vmatpush1.msk.msra.mxu1 %vm408_vm0, %v3781_v27  ;;  %v801_v22 = vrot.slane %v759_v19, 4  ;;  %v735_v58 = vmul.f32 %v732_v9, %v3674_v29  ;;  %v3867_v50 = vsel %vm408_vm0, %v3425_v20, %v807_v63  ;;  %v665_v21 = vsel %vm547_vm6, %v3547_v40, %v3545_v39 }
 0x1ad   : > { %1006 = vmatprep.subr.mxu1 %v3849_v36  ;;  %v800_v51 = vrot.slane %v758_v37, 4  ;;  %v734_v31 = vmul.f32 %v733_v4, %v3672_v48  ;;  %v3877_v35 = vsel %vm408_vm0, %v3412_v17, %v806_v56  ;;  %v3881_v19 = vmul.f32 %v3791_v14, %v3732_v52 }
 0x1ae   : > { %1007 = vmatpush1.msra.mxu1 %v3858_v26  ;;  %v3863_v34 = vpop.permute.xlu0 %890  ;;  %v664_v20 = vsel %vm547_vm6, %v3545_v39, %v3547_v40  ;;  %v795_v63 = vrot.slane %v743_v61, 4  ;;  %v3891_v53 = vsel %vm408_vm0, %v751_v2, %v801_v22  ;;  %v698_v17 = vrot.slane %v3852_v55, 4  ;;  %v5466_v22 = vld [vmem:[#allocation12_spill] sm:$0xff] }
 0x1af   : > { %1008 = vmatprep.subr.mxu1 %v3867_v50  ;;  %5463 = vst [vmem:[#allocation23_spill] sm:$0xff] %v3881_v19  ;;  %v648_v52 = vsel %vm529_vm9, %v3549_v41, %v3551_v42  ;;  %v794_v56 = vrot.slane %v742_v59, 4  ;;  %v3900_v39 = vsel %vm408_vm0, %v750_v1, %v800_v51  ;;  %v667_v40 = vmul.f32 %v665_v21, %v3622_v18 }
 0x1b0   : > { %v3887_v24 = vpop.permute.xlu1 %518  ;;  %1009 = vmatpush1.msra.mxu1 %v3877_v35  ;;  %v649_v37 = vsel %vm529_vm9, %v3551_v42, %v3549_v41  ;;  %v632_v9 = vsel %vm511_vm7, %v3553_v43, %v3555_v44  ;;  %v3913_v61 = vsel %vm408_vm0, %v735_v58, %v795_v63  ;;  %v699_v2 = vrot.slane %v659_v10, 4  ;;  %v5465_v10 = vld [vmem:[#allocation13_spill] sm:$0xff] }
 0x1b1   : > { %1010 = vmatprep.subr.mxu1 %v3891_v53  ;;  %v666_v4 = vmul.f32 %v664_v20, %v3620_v25  ;;  %v640_v55 = vsel %vm520_vm10, %v3557_v45, %v3559_v46  ;;  %v3922_v41 = vsel %vm408_vm0, %v734_v31, %v794_v56  ;;  %v651_v42 = vmul.f32 %v648_v52, %v3637_v15  ;;  %v5467_v31 = vld [vmem:[#allocation11_spill] sm:$0xff]  ;;  %v5468_v20 = vld [vmem:[#allocation10_spill] sm:$0xff] }
 0x1b2   : > { %1011 = vmatpush1.msra.mxu1 %v3900_v39  ;;  %5464 = vst [vmem:[#allocation24_spill] sm:$0xff] %v3922_v41  ;;  %v633_v59 = vsel %vm511_vm7, %v3555_v44, %v3553_v43  ;;  %v641_v1 = vsel %vm520_vm10, %v3559_v46, %v3557_v45  ;;  %v624_v58 = vsel %vm502_vm8, %v5466_v22, %v5465_v10  ;;  %v3937_v21 = vpop.permute.xlu0 %898  ;;  %v704_v44 = vrot.slane %v3701_v5, 4 }
 0x1b3   : > { %1012 = vmatprep.subr.mxu1 %v3913_v61  ;;  %v548_v43 = vsel %vm547_vm6, %v5468_v20, %v5467_v31  ;;  %v650_v63 = vmul.f32 %v649_v37, %v3631_v11  ;;  %v635_v45 = vmul.f32 %v632_v9, %v3641_v12  ;;  %v549_v46 = vsel %vm547_vm6, %v5467_v31, %v5468_v20 }
 0x1b4   : > { %v499_v51 = vpop.permute.xlu1 %498  ;;  %1013 = vmatpush1.msra.mxu1 %v3922_v41  ;;  %v643_v52 = vmul.f32 %v640_v55, %v3651_v32  ;;  %v625_v56 = vsel %vm502_vm8, %v5465_v10, %v5466_v22  ;;  %v5469_v5 = vrot.slane %v3664_v16, 4  ;;  %v634_v9 = vmul.f32 %v633_v59, %v3639_v7  ;;  %v5471_v16 = vld [vmem:[#allocation6_spill] sm:$0xff]  ;;  %v5472_v59 = vld [vmem:[#allocation5_spill] sm:$0xff] }
 0x1b5   : > { %3159 = vmatprep.subr.msk.mxu1 %vm408_vm0, %v3881_v19  ;;  %v642_v19 = vmul.f32 %v641_v1, %v3649_v60  ;;  %v627_v31 = vmul.f32 %v624_v58, %v3674_v29  ;;  %v3970_v55 = vsel %vm408_vm0, %v666_v4, %v704_v44  ;;  %v585_v10 = vrot.slane %v3698_v3, 4 }
 0x1b6   : > { %3160 = vmatpush1.msk.msra.mxu1 %vm408_vm0, %v3735_v23  ;;  %v3963_v37 = vsel %vm408_vm0, %v667_v40, %v5469_v5  ;;  %v693_v22 = vrot.slane %v651_v42, 4  ;;  %v3976_v40 = vsel %vm408_vm0, %v5471_v16, %v699_v2  ;;  %v3980_v1 = vsel %vm408_vm0, %v5472_v59, %v698_v17  ;;  %v875_v42 = vpop.permute.xlu0 %874  ;;  %v5477_v59 = vld [vmem:[#allocation18_spill] sm:$0xff] }
 0x1b7   : > { %5470 = vst [vmem:[#allocation13_spill] sm:$0xff] %v3963_v37  ;;  %1016 = vmatprep.subr.mxu1 %v3963_v37  ;;  %v692_v58 = vrot.slane %v650_v63, 4  ;;  %v687_v5 = vrot.slane %v635_v45, 4  ;;  %v626_v37 = vmul.f32 %v625_v56, %v3672_v48  ;;  %v531_v3 = vsel %vm529_vm9, %v3798_v13, %v3676_v30 }
 0x1b8   : > { %v893_v20 = vpop.permute.xlu1 %892  ;;  %1017 = vmatpush1.msra.mxu1 %v3970_v55  ;;  %v550_v4 = vmul.f32 %v548_v43, %v3620_v25  ;;  %v551_v2 = vmul.f32 %v549_v46, %v3622_v18  ;;  %v530_v17 = vsel %vm529_vm9, %v3676_v30, %v3798_v13  ;;  %v3996_v44 = vsel %vm408_vm0, %v643_v52, %v693_v22  ;;  %v5475_v22 = vld [vmem:[#allocation19_spill] sm:$0xff] }
 0x1b9   : > { %1018 = vmatprep.subr.mxu1 %v3976_v40  ;;  %v686_v63 = vrot.slane %v634_v9, 4  ;;  %v513_v45 = vsel %vm511_vm7, %v3844_v28, %v3739_v33  ;;  %v4004_v43 = vsel %vm408_vm0, %v642_v19, %v692_v58  ;;  %v4007_v46 = vsel %vm408_vm0, %v627_v31, %v687_v5  ;;  %v5474_v9 = vld [vmem:[#allocation17_spill] sm:$0xff]  ;;  %v5478_v5 = vld [vmem:[#allocation20_spill] sm:$0xff] }
 0x1ba   : > { %1019 = vmatpush1.msra.mxu1 %v3980_v1  ;;  %5473 = vst [vmem:[#allocation12_spill] sm:$0xff] %v4007_v46  ;;  %v532_v30 = vmul.f32 %v531_v3, %v3631_v11  ;;  %v512_v13 = vsel %vm511_vm7, %v3739_v33, %v3844_v28  ;;  %v521_v52 = vsel %vm520_vm10, %v3778_v8, %v3887_v24  ;;  %v591_v31 = vrot.slane %v5474_v9, 4  ;;  %v5479_v3 = vld [vmem:[#allocation4_spill] sm:$0xff] }
 0x1bb   : > { %1020 = vmatprep.subr.mxu1 %v3996_v44  ;;  %v522_v19 = vsel %vm520_vm10, %v3887_v24, %v3778_v8  ;;  %v569_v16 = vmul.f32 %v3791_v14, %v5475_v22  ;;  %v533_v33 = vmul.f32 %v530_v17, %v3637_v15  ;;  %v4029_v28 = vsel %vm408_vm0, %v626_v37, %v686_v63 }
 0x1bc   : > { %v901_v56 = vpop.permute.xlu1 %900  ;;  %1021 = vmatpush1.msra.mxu1 %v4004_v43  ;;  %5476 = vst [vmem:[#allocation11_spill] sm:$0xff] %v4029_v28  ;;  %v568_v58 = vmul.f32 %v3715_v6, %v5477_v59  ;;  %v584_v8 = vrot.slane %v5478_v5, 4  ;;  %v514_v24 = vmul.f32 %v513_v45, %v3639_v7  ;;  %v599_v9 = vsel %vm408_vm0, %v5479_v3, %v585_v10  ;;  %v883_v59 = vpop.permute.xlu0 %882 }
 0x1bd   : > { %1022 = vmatprep.subr.mxu1 %v4007_v46  ;;  %v515_v22 = vmul.f32 %v512_v13, %v3641_v12  ;;  %v523_v17 = vmul.f32 %v522_v19, %v3649_v60  ;;  %v524_v46 = vmul.f32 %v521_v52, %v3651_v32  ;;  %v503_v37 = vsel %vm502_vm8, %v3829_v54, %v499_v51  ;;  %v5480_v13 = vld [vmem:[#allocation16_spill] sm:$0xff] }
 0x1be   : > { %1023 = vmatpush1.msra.mxu1 %v4029_v28  ;;  %v578_v63 = vrot.slane %v532_v30, 4  ;;  %v504_v45 = vsel %vm502_vm8, %v499_v51, %v3829_v54  ;;  %v601_v10 = vsel %vm408_vm0, %v551_v2, %v591_v31  ;;  %v5481_v19 = vrot.slane %v5480_v13, 4 }
 0x1bf   : > { %3161 = vmatprep.subr.msk.mxu1 %vm408_vm0, %v569_v16  ;;  %v579_v3 = vrot.slane %v533_v33, 4  ;;  %v894_v16 = vsel %vm556_vm3, %v3863_v34, %v893_v20  ;;  %v895_v30 = vsel %vm556_vm3, %v893_v20, %v3863_v34  ;;  %v572_v51 = vrot.slane %v514_v24, 4  ;;  %v5484_v24 = vld [vmem:[#allocation15_spill] sm:$0xff] }
 0x1c0   : > { %v877_v5 = vpop.permute.xlu1 %876  ;;  %3162 = vmatpush1.msk.msra.mxu1 %vm408_vm0, %v568_v58  ;;  %v600_v52 = vsel %vm408_vm0, %v550_v4, %v5481_v19  ;;  %v506_v2 = vmul.f32 %v503_v37, %v3674_v29  ;;  %v5482_v4 = vld [vmem:[#allocation3_spill] sm:$0xff]  ;;  %v573_v58 = vrot.slane %v515_v22, 4  ;;  %v505_v13 = vmul.f32 %v504_v45, %v3672_v48  ;;  %v5483_v19 = vld [vmem:[#allocation14_spill] sm:$0xff] }
 0x1c1   : > { %v879_v54 = vsel %vm538_vm5, %v877_v5, %v875_v42  ;;  %1026 = vmatprep.subr.mxu1 %v601_v10  ;;  %v878_v31 = vsel %vm538_vm5, %v875_v42, %v877_v5  ;;  %v598_v33 = vsel %vm408_vm0, %v5482_v4, %v584_v8  ;;  %v597_v34 = vsel %vm408_vm0, %v524_v46, %v579_v3 }
 0x1c2   : > { %1027 = vmatpush1.msra.mxu1 %v600_v52  ;;  %v596_v20 = vsel %vm408_vm0, %v523_v17, %v578_v63  ;;  %v896_v10 = vmul.f32 %v894_v16, %v5483_v19  ;;  %v897_v28 = vmul.f32 %v895_v30, %v5484_v24  ;;  %v903_v42 = vsel %vm565_vm4, %v901_v56, %v3937_v21  ;;  %v867_v17 = vpop.permute.xlu0 %866 }
 0x1c3   : > { %1028 = vmatprep.subr.mxu1 %v599_v9  ;;  %v881_v37 = vmul.f32 %v879_v54, %v3618_v0  ;;  %v902_v8 = vsel %vm565_vm4, %v3937_v21, %v901_v56  ;;  %v880_v46 = vmul.f32 %v878_v31, %v3616_v57  ;;  %v595_v45 = vsel %vm408_vm0, %v506_v2, %v573_v58 }
 0x1c4   : > { %v885_v5 = vpop.permute.xlu1 %884  ;;  %1029 = vmatpush1.msra.mxu1 %v598_v33  ;;  %v4086_v52 = vmul.f32 %v3791_v14, %v903_v42  ;;  %v594_v56 = vsel %vm408_vm0, %v505_v13, %v572_v51  ;;  %v927_v3 = vrot.slane %v897_v28, 4  ;;  %v4091_v16 = vmul.f32 %v3715_v6, %v902_v8 }
 0x1c5   : > { %v886_v9 = vsel %vm547_vm6, %v883_v59, %v885_v5  ;;  %v887_v22 = vsel %vm547_vm6, %v885_v5, %v883_v59  ;;  %1030 = vmatprep.subr.mxu1 %v597_v34  ;;  %v921_v59 = vrot.slane %v881_v37, 4  ;;  %v926_v54 = vrot.slane %v896_v10, 4  ;;  %v5486_v5 = vld [vmem:[#allocation7_spill] sm:$0xff] }
 0x1c6   : > { %v889_v63 = vmul.f32 %v887_v22, %v3622_v18  ;;  %1031 = vmatpush1.msra.mxu1 %v596_v20  ;;  %v888_v21 = vmul.f32 %v886_v9, %v3620_v25  ;;  %v920_v31 = vrot.slane %v880_v46, 4  ;;  %v859_v13 = vpop.permute.xlu0 %858  ;;  %v5485_v20 = vld [vmem:[#allocation8_spill] sm:$0xff] }
 0x1c7   : > { %1032 = vmatprep.subr.mxu1 %v595_v45  ;;  %v4113_v10 = vsel %vm408_vm0, %v5485_v20, %v921_v59 }
 0x1c8   : > { %v869_v30 = vpop.permute.xlu1 %868  ;;  %1033 = vmatpush1.msra.mxu1 %v594_v56  ;;  %v4104_v33 = vsel %vm408_vm0, %v889_v63, %v927_v3  ;;  %v4108_v58 = vsel %vm408_vm0, %v888_v21, %v926_v54  ;;  %v4122_v8 = vsel %vm408_vm0, %v5486_v5, %v920_v31  ;;  %v5487_v21 = vld [vmem:[#allocation9_spill] sm:$0xff] }
 0x1c9   : > { %v870_v2 = vsel %vm529_vm9, %v867_v17, %v869_v30  ;;  %v871_v4 = vsel %vm529_vm9, %v869_v30, %v867_v17  ;;  %3163 = vmatprep.subr.msk.mxu1 %vm408_vm0, %v4086_v52  ;;  %v377_v31 = vld [vmem:[%s5403_s1 + $0x10] sm:$0xf] }
 0x1ca   : > { %v872_v51 = vmul.f32 %v871_v4, %v3631_v11  ;;  %v873_v28 = vmul.f32 %v870_v2, %v3637_v15  ;;  %3164 = vmatpush2.msk.msra.mxu1 %vm408_vm0, %v4091_v16  ;;  %3118 = vmatmul.mubr.msk.f32.gmra.mxu0 %vm398_vm1, %v377_v31  ;;  %v4179_v2 = vld [vmem:[%s5405_s3 + $0x8] sm:$0xff] }
 0x1cb   : > { %1060 = vmatprep.subr.mxu1 %v4104_v33  ;;  %v1231_v4 = vcombine.high %v4179_v2, %v4179_v2 }
 0x1cc   : > { %v861_v34 = vpop.permute.xlu1 %860  ;;  %1061 = vmatpush2.msra.mxu1 %v4108_v58  ;;  %v914_v46 = vrot.slane %v872_v51, 4  ;;  %v915_v9 = vrot.slane %v873_v28, 4  ;;  %v3121_v51 = vld [vmem:[%s5406_s4 + $0x4] sm:$0xf] }
 0x1cd   : > { %v862_v42 = vsel %vm520_vm10, %v859_v13, %v861_v34  ;;  %v863_v37 = vsel %vm520_vm10, %v861_v34, %v859_v13  ;;  %1062 = vmatprep.subr.mxu1 %v4113_v10  ;;  %3122 = vmatprep.mubr.msk.f32.mxu0 %vm999_vm2, %v1231_v4 }
 0x1ce   : > { %v864_v22 = vmul.f32 %v863_v37, %v3649_v60  ;;  %v865_v17 = vmul.f32 %v862_v42, %v3651_v32  ;;  %1063 = vmatpush2.msra.mxu1 %v4122_v8 }
 0x1cf   : > { %v995_v56 = vpop.permute.xlu0 %994 }
 0x1d0   : > { %v4128_v63 = vsel %vm408_vm0, %v865_v17, %v915_v9  ;;  %v4131_v45 = vsel %vm408_vm0, %v864_v22, %v914_v46 }
 0x1d1   : > { %1064 = vmatprep.subr.mxu1 %v4128_v63 }
 0x1d2   : > { %1065 = vmatpush2.msra.mxu1 %v4131_v45 }
 0x1d3   : > { %1067 = vmatmul.mubr.f32.vlgmr.msra.gmra.mxu1 %v5487_v21 }
 0x293   : > { %v1068_v3 = vpop.f32.mrf.mxu1 }
 0x294   : > { %v4136_v59 = vadd.f32 %v1068_v3, %v995_v56 }
 0x295   : > { %v1070_v30 = vpop.f32.mrf.mxu1 }
 0x296   : > { %v4138_v54 = vadd.f32 %v1070_v30, %v995_v56  ;;  %1081 = vrot.lane.b32.xlu1 %v4136_v59, %s3272_s24 }
 0x298   : > { %1083 = vrot.lane.b32.xlu0 %v4138_v54, %s3272_s24 }
 0x29a   : > { %1073 = vrot.lane.b32.xlu1 %v4136_v59, %s3274_s26 }
 0x29c   : > { %1075 = vrot.lane.b32.xlu0 %v4138_v54, %s3274_s26 }
 0x29e   : > { %1121 = vrot.lane.b32.xlu1 %v4136_v59, %s3267_s19 }
 0x2a0   : > { %1123 = vrot.lane.b32.xlu0 %v4138_v54, %s3267_s19 }
 0x2a2   : > { %1129 = vrot.lane.b32.xlu1 %v4136_v59, %s3268_s20 }
 0x2a4   : > { %1131 = vrot.lane.b32.xlu0 %v4138_v54, %s3268_s20 }
 0x2a6   : > { %1105 = vrot.lane.b32.xlu1 %v4136_v59, %s3269_s21 }
 0x2a8   : > { %1107 = vrot.lane.b32.xlu0 %v4138_v54, %s3269_s21 }
 0x2aa   : > { %1113 = vrot.lane.b32.xlu1 %v4136_v59, %s3270_s22 }
 0x2ac   : > { %1115 = vrot.lane.b32.xlu0 %v4138_v54, %s3270_s22 }
 0x2ae   : > { %1097 = vrot.lane.b32.xlu1 %v4136_v59, %s3271_s23 }
 0x2b0   : > { %1099 = vrot.lane.b32.xlu0 %v4138_v54, %s3271_s23 }
 0x2b2   : > { %1089 = vrot.lane.b32.xlu1 %v4136_v59, %s3273_s25 }
 0x2b4   : > { %1091 = vrot.lane.b32.xlu0 %v4138_v54, %s3273_s25 }
 0x2b6   : > { %1227 = vperm.xlu1 %3243, %v3121_v51  }
 0x308   : > { %v1082_v28 = vpop.permute.xlu1 %1081 }
 0x30a   : > { %v1084_v13 = vpop.permute.xlu0 %1083 }
 0x30b   : > { %v1085_v34 = vsel %vm511_vm7, %v1082_v28, %v1084_v13  ;;  %v1086_v20 = vsel %vm511_vm7, %v1084_v13, %v1082_v28 }
 0x30c   : > { %v1087_v42 = vmul.f32 %v1086_v20, %v3639_v7  ;;  %v1088_v37 = vmul.f32 %v1085_v34, %v3641_v12  ;;  %v1074_v5 = vpop.permute.xlu1 %1073 }
 0x30e   : > { %v1076_v46 = vpop.permute.xlu0 %1075  ;;  %v1139_v17 = vrot.slane %v1087_v42, 4  ;;  %v1140_v21 = vrot.slane %v1088_v37, 4 }
 0x30f   : > { %v1077_v9 = vsel %vm502_vm8, %v1074_v5, %v1076_v46  ;;  %v1078_v22 = vsel %vm502_vm8, %v1076_v46, %v1074_v5  ;;  %v5488_v46 = vld [vmem:[#allocation23_spill] sm:$0xff] }
 0x310   : > { %v1079_v56 = vmul.f32 %v1078_v22, %v3672_v48  ;;  %v1080_v3 = vmul.f32 %v1077_v9, %v3674_v29  ;;  %v1122_v30 = vpop.permute.xlu1 %1121 }
 0x312   : > { %v1124_v31 = vpop.permute.xlu0 %1123  ;;  %v4200_v4 = vsel %vm408_vm0, %v1080_v3, %v1140_v21  ;;  %v4203_v51 = vsel %vm408_vm0, %v1079_v56, %v1139_v17  ;;  %v5489_v21 = vld [vmem:[#allocation13_spill] sm:$0xff] }
 0x313   : > { %1234 = vmatprep.subr.mxu0 %v4200_v4  ;;  %v1126_v9 = vsel %vm556_vm3, %v1124_v31, %v1122_v30  ;;  %v1125_v56 = vsel %vm556_vm3, %v1122_v30, %v1124_v31 }
 0x314   : > { %1235 = vmatpush1.msra.mxu0 %v4203_v51  ;;  %v1130_v13 = vpop.permute.xlu1 %1129 }
 0x315   : > { %3165 = vmatprep.subr.msk.mxu0 %vm408_vm0, %v4086_v52 }
 0x316   : > { %v1132_v28 = vpop.permute.xlu0 %1131  ;;  %3166 = vmatpush1.msk.msra.mxu0 %vm408_vm0, %v4091_v16 }
 0x317   : > { %1238 = vmatprep.subr.mxu0 %v4104_v33 }
 0x318   : > { %1239 = vmatpush1.msra.mxu0 %v4108_v58  ;;  %v1106_v20 = vpop.permute.xlu1 %1105 }
 0x319   : > { %1240 = vmatprep.subr.mxu0 %v4113_v10 }
 0x31a   : > { %1241 = vmatpush1.msra.mxu0 %v4122_v8  ;;  %v1108_v34 = vpop.permute.xlu0 %1107 }
 0x31b   : > { %1242 = vmatprep.subr.mxu0 %v4128_v63  ;;  %v1110_v17 = vsel %vm538_vm5, %v1108_v34, %v1106_v20  ;;  %v1109_v3 = vsel %vm538_vm5, %v1106_v20, %v1108_v34  ;;  %v1133_v34 = vsel %vm565_vm4, %v1130_v13, %v1132_v28 }
 0x31c   : > { %1243 = vmatpush1.msra.mxu0 %v4131_v45  ;;  %v1114_v37 = vpop.permute.xlu1 %1113  ;;  %v1111_v20 = vmul.f32 %v1109_v3, %v3616_v57 }
 0x31d   : > { %1244 = vmatprep.subr.mxu0 %v3801_v47 }
 0x31e   : > { %1245 = vmatpush1.msra.mxu0 %v3804_v49  ;;  %v1116_v42 = vpop.permute.xlu0 %1115 }
 0x31f   : > { %3167 = vmatprep.subr.msk.mxu0 %vm408_vm0, %v3807_v38  ;;  %v1117_v30 = vsel %vm547_vm6, %v1114_v37, %v1116_v42 }
 0x320   : > { %3168 = vmatpush1.msk.msra.mxu0 %vm408_vm0, %v3781_v27  ;;  %v1098_v22 = vpop.permute.xlu1 %1097 }
 0x321   : > { %1248 = vmatprep.subr.mxu0 %v3849_v36 }
 0x322   : > { %1249 = vmatpush1.msra.mxu0 %v3858_v26  ;;  %v1100_v5 = vpop.permute.xlu0 %1099 }
 0x323   : > { %1250 = vmatprep.subr.mxu0 %v3867_v50 }
 0x324   : > { %1251 = vmatpush1.msra.mxu0 %v3877_v35 }
 0x325   : > { %1252 = vmatprep.subr.mxu0 %v3891_v53 }
 0x326   : > { %1253 = vmatpush1.msra.mxu0 %v3900_v39  ;;  %v1092_v31 = vpop.permute.xlu0 %1091 }
 0x327   : > { %1254 = vmatprep.subr.mxu0 %v3913_v61 }
 0x328   : > { %1255 = vmatpush1.msra.mxu0 %v3922_v41  ;;  %v1118_v41 = vsel %vm547_vm6, %v1116_v42, %v1114_v37  ;;  %v1102_v42 = vsel %vm529_vm9, %v1100_v5, %v1098_v22  ;;  %v1090_v37 = vpop.permute.xlu1 %1089 }
 0x329   : > { %3169 = vmatprep.subr.msk.mxu0 %vm408_vm0, %v5488_v46  ;;  %v1128_v46 = vmul.f32 %v1126_v9, %v5484_v24  ;;  %v1120_v9 = vmul.f32 %v1118_v41, %v3622_v18 }
 0x32a   : > { %3170 = vmatpush1.msk.msra.mxu0 %vm408_vm0, %v3735_v23  ;;  %v1134_v23 = vsel %vm565_vm4, %v1132_v28, %v1130_v13  ;;  %v1119_v28 = vmul.f32 %v1117_v30, %v3620_v25  ;;  %v1093_v13 = vsel %vm520_vm10, %v1090_v37, %v1092_v31 }
 0x32b   : > { %1258 = vmatprep.subr.mxu0 %v5489_v21  ;;  %v1112_v21 = vmul.f32 %v1110_v17, %v3618_v0  ;;  %v4267_v17 = vmul.f32 %v3791_v14, %v1134_v23  ;;  %v1103_v23 = vmul.f32 %v1102_v42, %v3631_v11  ;;  %v1096_v30 = vmul.f32 %v1093_v13, %v3651_v32 }
 0x32c   : > { %1259 = vmatpush1.msra.mxu0 %v3970_v55  ;;  %v1127_v55 = vmul.f32 %v1125_v56, %v5483_v19  ;;  %v5490_v56 = vld [vmem:[#allocation12_spill] sm:$0xff] }
 0x32d   : > { %1260 = vmatprep.subr.mxu0 %v3976_v40  ;;  %v1101_v40 = vsel %vm529_vm9, %v1098_v22, %v1100_v5  ;;  %v1152_v41 = vrot.slane %v1112_v21, 4  ;;  %v5491_v22 = vld [vmem:[#allocation11_spill] sm:$0xff] }
 0x32e   : > { %1261 = vmatpush1.msra.mxu0 %v3980_v1  ;;  %v1158_v1 = vrot.slane %v1128_v46, 4  ;;  %v1104_v5 = vmul.f32 %v1101_v40, %v3637_v15  ;;  %v1157_v3 = vrot.slane %v1127_v55, 4  ;;  %v1151_v46 = vrot.slane %v1111_v20, 4 }
 0x32f   : > { %1262 = vmatprep.subr.mxu0 %v3996_v44  ;;  %v4274_v44 = vmul.f32 %v3715_v6, %v1133_v34  ;;  %v4297_v20 = vsel %vm408_vm0, %v4138_v54, %v1152_v41  ;;  %v1145_v40 = vrot.slane %v1103_v23, 4  ;;  %v4314_v54 = vpop.f32.mrf.mxu0 }
 0x330   : > { %1263 = vmatpush1.msra.mxu0 %v4004_v43  ;;  %v1094_v43 = vsel %vm520_vm10, %v1092_v31, %v1090_v37  ;;  %v4287_v21 = vsel %vm408_vm0, %v1120_v9, %v1158_v1  ;;  %v4292_v31 = vsel %vm408_vm0, %v1119_v28, %v1157_v3  ;;  %v1146_v55 = vrot.slane %v1104_v5, 4  ;;  %5492 = vst [vmem:[#allocation10_spill] sm:$0xff] %v4314_v54  ;;  %v4360_v5 = vld [vmem:[%s5405_s3 + $0x10] sm:$0xff] }
 0x331   : > { %1264 = vmatprep.subr.mxu0 %v5490_v56  ;;  %v1095_v34 = vmul.f32 %v1094_v43, %v3649_v60  ;;  %v4302_v9 = vsel %vm408_vm0, %v4136_v59, %v1151_v46  ;;  %v4316_v1 = vpop.f32.mrf.mxu0  ;;  %v1228_v59 = vpop.permute.xlu1 %1227  ;;  %v1463_v43 = vcombine.high %v4360_v5, %v4360_v5 }
 0x332   : > { %1265 = vmatpush1.msra.mxu0 %v5491_v22  ;;  %v4306_v42 = vsel %vm408_vm0, %v1096_v30, %v1146_v55  ;;  %5493 = vst [vmem:[#allocation6_spill] sm:$0xff] %v4316_v1 }
 0x333   : > { %3171 = vmatprep.subr.msk.mxu0 %vm408_vm0, %v4267_v17  ;;  %v4310_v37 = vsel %vm408_vm0, %v1095_v34, %v1145_v40  ;;  %3125 = vmatprep.mubr.msk.f32.mxu1 %vm999_vm2, %v1463_v43 }
 0x334   : > { %3172 = vmatpush2.msk.msra.mxu0 %vm408_vm0, %v4274_v44 }
 0x335   : > { %1292 = vmatprep.subr.mxu0 %v4287_v21 }
 0x336   : > { %1293 = vmatpush2.msra.mxu0 %v4292_v31 }
 0x337   : > { %1294 = vmatprep.subr.mxu0 %v4297_v20 }
 0x338   : > { %1295 = vmatpush2.msra.mxu0 %v4302_v9 }
 0x339   : > { %1296 = vmatprep.subr.mxu0 %v4306_v42 }
 0x33a   : > { %1297 = vmatpush2.msra.mxu0 %v4310_v37 }
 0x33b   : > { %1299 = vmatmul.mubr.f32.vlgmr.msra.gmra.mxu0 %v4179_v2  ;;  %v3124_v2 = vld [vmem:[%s5406_s4 + $0x8] sm:$0xf] }
 0x3fb   : > { %v1300_v28 = vpop.f32.mrf.mxu0 }
 0x3fc   : > { %v4318_v13 = vadd.f32 %v1300_v28, %v1228_v59 }
 0x3fd   : > { %v1302_v56 = vpop.f32.mrf.mxu0 }
 0x3fe   : > { %v4320_v41 = vadd.f32 %v1302_v56, %v1228_v59  ;;  %1313 = vrot.lane.b32.xlu0 %v4318_v13, %s3272_s24 }
 0x400   : > { %1315 = vrot.lane.b32.xlu1 %v4320_v41, %s3272_s24 }
 0x402   : > { %1305 = vrot.lane.b32.xlu0 %v4318_v13, %s3274_s26 }
 0x404   : > { %1307 = vrot.lane.b32.xlu1 %v4320_v41, %s3274_s26 }
 0x406   : > { %1353 = vrot.lane.b32.xlu0 %v4318_v13, %s3267_s19 }
 0x408   : > { %1355 = vrot.lane.b32.xlu1 %v4320_v41, %s3267_s19 }
 0x40a   : > { %1361 = vrot.lane.b32.xlu0 %v4318_v13, %s3268_s20 }
 0x40c   : > { %1363 = vrot.lane.b32.xlu1 %v4320_v41, %s3268_s20 }
 0x40e   : > { %1337 = vrot.lane.b32.xlu0 %v4318_v13, %s3269_s21 }
 0x410   : > { %1339 = vrot.lane.b32.xlu1 %v4320_v41, %s3269_s21 }
 0x412   : > { %1345 = vrot.lane.b32.xlu0 %v4318_v13, %s3270_s22 }
 0x414   : > { %1347 = vrot.lane.b32.xlu1 %v4320_v41, %s3270_s22 }
 0x416   : > { %1329 = vrot.lane.b32.xlu0 %v4318_v13, %s3271_s23 }
 0x418   : > { %1331 = vrot.lane.b32.xlu1 %v4320_v41, %s3271_s23 }
 0x41a   : > { %1321 = vrot.lane.b32.xlu0 %v4318_v13, %s3273_s25 }
 0x41c   : > { %1323 = vrot.lane.b32.xlu1 %v4320_v41, %s3273_s25 }
 0x41e   : > { %1459 = vperm.xlu0 %3242, %v3124_v2  }
 0x470   : > { %v1314_v22 = vpop.permute.xlu0 %1313 }
 0x472   : > { %v1316_v3 = vpop.permute.xlu1 %1315 }
 0x473   : > { %v1317_v46 = vsel %vm511_vm7, %v1314_v22, %v1316_v3  ;;  %v1318_v23 = vsel %vm511_vm7, %v1316_v3, %v1314_v22 }
 0x474   : > { %v1319_v30 = vmul.f32 %v1318_v23, %v3639_v7  ;;  %v1320_v34 = vmul.f32 %v1317_v46, %v3641_v12  ;;  %v1306_v55 = vpop.permute.xlu0 %1305 }
 0x476   : > { %v1308_v40 = vpop.permute.xlu1 %1307  ;;  %v1371_v56 = vrot.slane %v1319_v30, 4  ;;  %v1372_v2 = vrot.slane %v1320_v34, 4 }
 0x477   : > { %v1309_v59 = vsel %vm502_vm8, %v1306_v55, %v1308_v40  ;;  %v1310_v28 = vsel %vm502_vm8, %v1308_v40, %v1306_v55 }
 0x478   : > { %v1311_v43 = vmul.f32 %v1310_v28, %v3672_v48  ;;  %v1312_v1 = vmul.f32 %v1309_v59, %v3674_v29  ;;  %v1354_v54 = vpop.permute.xlu0 %1353 }
 0x47a   : > { %v1356_v22 = vpop.permute.xlu1 %1355  ;;  %v4378_v3 = vsel %vm408_vm0, %v1312_v1, %v1372_v2  ;;  %v4381_v46 = vsel %vm408_vm0, %v1311_v43, %v1371_v56 }
 0x47b   : > { %5494 = vst [vmem:[#allocation5_spill] sm:$0xff] %v4378_v3  ;;  %5495 = vst [vmem:[#allocation17_spill] sm:$0xff] %v4381_v46  ;;  %1466 = vmatprep.subr.mxu1 %v4378_v3  ;;  %v1358_v28 = vsel %vm556_vm3, %v1356_v22, %v1354_v54  ;;  %v1357_v43 = vsel %vm556_vm3, %v1354_v54, %v1356_v22 }
 0x47c   : > { %1467 = vmatpush1.msra.mxu1 %v4381_v46  ;;  %v1362_v30 = vpop.permute.xlu0 %1361 }
 0x47d   : > { %3173 = vmatprep.subr.msk.mxu1 %vm408_vm0, %v4267_v17 }
 0x47e   : > { %v1364_v23 = vpop.permute.xlu1 %1363  ;;  %3174 = vmatpush1.msk.msra.mxu1 %vm408_vm0, %v4274_v44 }
 0x47f   : > { %1470 = vmatprep.subr.mxu1 %v4287_v21 }
 0x480   : > { %1471 = vmatpush1.msra.mxu1 %v4292_v31  ;;  %v1338_v34 = vpop.permute.xlu0 %1337 }
 0x481   : > { %1472 = vmatprep.subr.mxu1 %v4297_v20 }
 0x482   : > { %1473 = vmatpush1.msra.mxu1 %v4302_v9  ;;  %v1340_v1 = vpop.permute.xlu1 %1339 }
 0x483   : > { %1474 = vmatprep.subr.mxu1 %v4306_v42  ;;  %v1342_v2 = vsel %vm538_vm5, %v1340_v1, %v1338_v34 }
 0x484   : > { %1475 = vmatpush1.msra.mxu1 %v4310_v37  ;;  %v1346_v40 = vpop.permute.xlu0 %1345 }
 0x485   : > { %1476 = vmatprep.subr.mxu1 %v4200_v4 }
 0x486   : > { %1477 = vmatpush1.msra.mxu1 %v4203_v51  ;;  %v1348_v55 = vpop.permute.xlu1 %1347 }
 0x487   : > { %3175 = vmatprep.subr.msk.mxu1 %vm408_vm0, %v4086_v52  ;;  %v1349_v54 = vsel %vm547_vm6, %v1346_v40, %v1348_v55 }
 0x488   : > { %3176 = vmatpush1.msk.msra.mxu1 %vm408_vm0, %v4091_v16  ;;  %v1330_v56 = vpop.permute.xlu0 %1329 }
 0x489   : > { %1480 = vmatprep.subr.mxu1 %v4104_v33 }
 0x48a   : > { %1481 = vmatpush1.msra.mxu1 %v4108_v58  ;;  %v1332_v59 = vpop.permute.xlu1 %1331 }
 0x48b   : > { %1482 = vmatprep.subr.mxu1 %v4113_v10 }
 0x48c   : > { %1483 = vmatpush1.msra.mxu1 %v4122_v8 }
 0x48d   : > { %1484 = vmatprep.subr.mxu1 %v4128_v63 }
 0x48e   : > { %1485 = vmatpush1.msra.mxu1 %v4131_v45  ;;  %v1324_v22 = vpop.permute.xlu1 %1323 }
 0x48f   : > { %1486 = vmatprep.subr.mxu1 %v3801_v47  ;;  %v1350_v47 = vsel %vm547_vm6, %v1348_v55, %v1346_v40  ;;  %v1334_v55 = vsel %vm529_vm9, %v1332_v59, %v1330_v56  ;;  %v1322_v40 = vpop.permute.xlu0 %1321 }
 0x490   : > { %1487 = vmatpush1.msra.mxu1 %v3804_v49  ;;  %v1341_v49 = vsel %vm538_vm5, %v1338_v34, %v1340_v1  ;;  %v1365_v1 = vsel %vm565_vm4, %v1362_v30, %v1364_v23 }
 0x491   : > { %3177 = vmatprep.subr.msk.mxu1 %vm408_vm0, %v3807_v38  ;;  %v1360_v38 = vmul.f32 %v1358_v28, %v5484_v24  ;;  %v1343_v34 = vmul.f32 %v1341_v49, %v3616_v57  ;;  %v1352_v28 = vmul.f32 %v1350_v47, %v3622_v18  ;;  %v1325_v49 = vsel %vm520_vm10, %v1322_v40, %v1324_v22 }
 0x492   : > { %3178 = vmatpush1.msk.msra.mxu1 %vm408_vm0, %v3781_v27  ;;  %v1366_v27 = vsel %vm565_vm4, %v1364_v23, %v1362_v30  ;;  %v1351_v23 = vmul.f32 %v1349_v54, %v3620_v25 }
 0x493   : > { %1490 = vmatprep.subr.mxu1 %v3849_v36  ;;  %v1344_v36 = vmul.f32 %v1342_v2, %v3618_v0  ;;  %v4445_v2 = vmul.f32 %v3791_v14, %v1366_v27 }
 0x494   : > { %1491 = vmatpush1.msra.mxu1 %v3858_v26  ;;  %v1359_v26 = vmul.f32 %v1357_v43, %v5483_v19  ;;  %v1335_v43 = vmul.f32 %v1334_v55, %v3631_v11 }
 0x495   : > { %1492 = vmatprep.subr.mxu1 %v3867_v50  ;;  %v1333_v50 = vsel %vm529_vm9, %v1330_v56, %v1332_v59  ;;  %v1384_v47 = vrot.slane %v1344_v36, 4  ;;  %v5496_v59 = vld [vmem:[#allocation24_spill] sm:$0xff]  ;;  %v1383_v56 = vrot.slane %v1343_v34, 4 }
 0x496   : > { %1493 = vmatpush1.msra.mxu1 %v3877_v35  ;;  %v1390_v35 = vrot.slane %v1360_v38, 4  ;;  %v1336_v30 = vmul.f32 %v1333_v50, %v3637_v15  ;;  %v1389_v14 = vrot.slane %v1359_v26, 4 }
 0x497   : > { %1494 = vmatprep.subr.mxu1 %v3891_v53  ;;  %v4452_v53 = vmul.f32 %v3715_v6, %v1365_v1  ;;  %v4475_v54 = vsel %vm408_vm0, %v4320_v41, %v1384_v47  ;;  %v4480_v26 = vsel %vm408_vm0, %v4318_v13, %v1383_v56 }
 0x498   : > { %1495 = vmatpush1.msra.mxu1 %v3900_v39  ;;  %v1326_v39 = vsel %vm520_vm10, %v1324_v22, %v1322_v40  ;;  %v4465_v6 = vsel %vm408_vm0, %v1352_v28, %v1390_v35  ;;  %v4470_v27 = vsel %vm408_vm0, %v1351_v23, %v1389_v14  ;;  %v1378_v36 = vrot.slane %v1336_v30, 4  ;;  %v4534_v40 = vld [vmem:[%s5405_s3 + $0x18] sm:$0xff] }
 0x499   : > { %1496 = vmatprep.subr.mxu1 %v3913_v61  ;;  %v1328_v61 = vmul.f32 %v1325_v49, %v3651_v32  ;;  %v1327_v38 = vmul.f32 %v1326_v39, %v3649_v60  ;;  %v1377_v22 = vrot.slane %v1335_v43, 4  ;;  %v1460_v41 = vpop.permute.xlu0 %1459  ;;  %v1695_v35 = vcombine.high %v4534_v40, %v4534_v40 }
 0x49a   : > { %1497 = vmatpush1.msra.mxu1 %v5496_v59 }
 0x49b   : > { %3179 = vmatprep.subr.msk.mxu1 %vm408_vm0, %v4445_v2  ;;  %v4484_v1 = vsel %vm408_vm0, %v1328_v61, %v1378_v36  ;;  %v4488_v34 = vsel %vm408_vm0, %v1327_v38, %v1377_v22  ;;  %3128 = vmatprep.mubr.msk.f32.mxu0 %vm999_vm2, %v1695_v35 }
 0x49c   : > { %3180 = vmatpush2.msk.msra.mxu1 %vm408_vm0, %v4452_v53 }
 0x49d   : > { %1524 = vmatprep.subr.mxu1 %v4465_v6 }
 0x49e   : > { %1525 = vmatpush2.msra.mxu1 %v4470_v27 }
 0x49f   : > { %1526 = vmatprep.subr.mxu1 %v4475_v54 }
 0x4a0   : > { %1527 = vmatpush2.msra.mxu1 %v4480_v26 }
 0x4a1   : > { %1528 = vmatprep.subr.mxu1 %v4484_v1 }
 0x4a2   : > { %1529 = vmatpush2.msra.mxu1 %v4488_v34 }
 0x4a3   : > { %1531 = vmatmul.mubr.f32.vlgmr.msra.gmra.mxu1 %v4360_v5  ;;  %v3127_v5 = vld [vmem:[%s5406_s4 + $0xc] sm:$0xf] }
 0x563   : > { %v1532_v50 = vpop.f32.mrf.mxu1 }
 0x564   : > { %v4492_v28 = vadd.f32 %v1532_v50, %v1460_v41 }
 0x565   : > { %v1534_v13 = vpop.f32.mrf.mxu1 }
 0x566   : > { %v4494_v55 = vadd.f32 %v1534_v13, %v1460_v41  ;;  %1545 = vrot.lane.b32.xlu1 %v4492_v28, %s3272_s24 }
 0x568   : > { %1547 = vrot.lane.b32.xlu0 %v4494_v55, %s3272_s24 }
 0x56a   : > { %1537 = vrot.lane.b32.xlu1 %v4492_v28, %s3274_s26 }
 0x56c   : > { %1539 = vrot.lane.b32.xlu0 %v4494_v55, %s3274_s26 }
 0x56e   : > { %1585 = vrot.lane.b32.xlu1 %v4492_v28, %s3267_s19 }
 0x570   : > { %1587 = vrot.lane.b32.xlu0 %v4494_v55, %s3267_s19 }
 0x572   : > { %1593 = vrot.lane.b32.xlu1 %v4492_v28, %s3268_s20 }
 0x574   : > { %1595 = vrot.lane.b32.xlu0 %v4494_v55, %s3268_s20 }
 0x576   : > { %1569 = vrot.lane.b32.xlu1 %v4492_v28, %s3269_s21 }
 0x578   : > { %1571 = vrot.lane.b32.xlu0 %v4494_v55, %s3269_s21 }
 0x57a   : > { %1577 = vrot.lane.b32.xlu1 %v4492_v28, %s3270_s22 }
 0x57c   : > { %1579 = vrot.lane.b32.xlu0 %v4494_v55, %s3270_s22 }
 0x57e   : > { %1561 = vrot.lane.b32.xlu1 %v4492_v28, %s3271_s23 }
 0x580   : > { %1563 = vrot.lane.b32.xlu0 %v4494_v55, %s3271_s23 }
 0x582   : > { %1553 = vrot.lane.b32.xlu1 %v4492_v28, %s3273_s25 }
 0x584   : > { %1555 = vrot.lane.b32.xlu0 %v4494_v55, %s3273_s25 }
 0x586   : > { %1691 = vperm.xlu1 %3243, %v3127_v5  }
 0x5d8   : > { %v1546_v23 = vpop.permute.xlu1 %1545 }
 0x5da   : > { %v1548_v49 = vpop.permute.xlu0 %1547 }
 0x5db   : > { %v1549_v47 = vsel %vm511_vm7, %v1546_v23, %v1548_v49  ;;  %v1550_v30 = vsel %vm511_vm7, %v1548_v49, %v1546_v23 }
 0x5dc   : > { %v1551_v39 = vmul.f32 %v1550_v30, %v3639_v7  ;;  %v1552_v59 = vmul.f32 %v1549_v47, %v3641_v12  ;;  %v1538_v14 = vpop.permute.xlu1 %1537 }
 0x5de   : > { %v1540_v56 = vpop.permute.xlu0 %1539  ;;  %v1603_v38 = vrot.slane %v1551_v39, 4  ;;  %v1604_v36 = vrot.slane %v1552_v59, 4 }
 0x5df   : > { %v1541_v43 = vsel %vm502_vm8, %v1538_v14, %v1540_v56  ;;  %v1542_v61 = vsel %vm502_vm8, %v1540_v56, %v1538_v14 }
 0x5e0   : > { %v1543_v22 = vmul.f32 %v1542_v61, %v3672_v48  ;;  %v1544_v41 = vmul.f32 %v1541_v43, %v3674_v29  ;;  %v1586_v50 = vpop.permute.xlu1 %1585 }
 0x5e2   : > { %v1588_v13 = vpop.permute.xlu0 %1587  ;;  %v4552_v5 = vsel %vm408_vm0, %v1544_v41, %v1604_v36  ;;  %v4555_v35 = vsel %vm408_vm0, %v1543_v22, %v1603_v38 }
 0x5e3   : > { %5497 = vst [vmem:[#allocation19_spill] sm:$0xff] %v4552_v5  ;;  %5498 = vst [vmem:[#allocation18_spill] sm:$0xff] %v4555_v35  ;;  %1698 = vmatprep.subr.mxu0 %v4552_v5  ;;  %v1590_v56 = vsel %vm556_vm3, %v1588_v13, %v1586_v50  ;;  %v1589_v38 = vsel %vm556_vm3, %v1586_v50, %v1588_v13 }
 0x5e4   : > { %1699 = vmatpush1.msra.mxu0 %v4555_v35  ;;  %v1594_v49 = vpop.permute.xlu1 %1593 }
 0x5e5   : > { %3181 = vmatprep.subr.msk.mxu0 %vm408_vm0, %v4445_v2 }
 0x5e6   : > { %v1596_v23 = vpop.permute.xlu0 %1595  ;;  %3182 = vmatpush1.msk.msra.mxu0 %vm408_vm0, %v4452_v53 }
 0x5e7   : > { %1702 = vmatprep.subr.mxu0 %v4465_v6  ;;  %v1597_v13 = vsel %vm565_vm4, %v1594_v49, %v1596_v23 }
 0x5e8   : > { %1703 = vmatpush1.msra.mxu0 %v4470_v27  ;;  %v1570_v30 = vpop.permute.xlu1 %1569 }
 0x5e9   : > { %1704 = vmatprep.subr.mxu0 %v4475_v54 }
 0x5ea   : > { %1705 = vmatpush1.msra.mxu0 %v4480_v26  ;;  %v1572_v47 = vpop.permute.xlu0 %1571 }
 0x5eb   : > { %1706 = vmatprep.subr.mxu0 %v4484_v1  ;;  %v1574_v61 = vsel %vm538_vm5, %v1572_v47, %v1570_v30  ;;  %v1573_v36 = vsel %vm538_vm5, %v1570_v30, %v1572_v47 }
 0x5ec   : > { %1707 = vmatpush1.msra.mxu0 %v4488_v34  ;;  %v1578_v59 = vpop.permute.xlu1 %1577  ;;  %v1575_v47 = vmul.f32 %v1573_v36, %v3616_v57 }
 0x5ed   : > { %1708 = vmatprep.subr.mxu0 %v4378_v3 }
 0x5ee   : > { %1709 = vmatpush1.msra.mxu0 %v4381_v46  ;;  %v1580_v39 = vpop.permute.xlu0 %1579 }
 0x5ef   : > { %3183 = vmatprep.subr.msk.mxu0 %vm408_vm0, %v4267_v17  ;;  %v1582_v22 = vsel %vm547_vm6, %v1580_v39, %v1578_v59  ;;  %v1581_v41 = vsel %vm547_vm6, %v1578_v59, %v1580_v39 }
 0x5f0   : > { %3184 = vmatpush1.msk.msra.mxu0 %vm408_vm0, %v4274_v44  ;;  %v1562_v43 = vpop.permute.xlu1 %1561  ;;  %v1584_v30 = vmul.f32 %v1582_v22, %v3622_v18 }
 0x5f1   : > { %1712 = vmatprep.subr.mxu0 %v4287_v21 }
 0x5f2   : > { %1713 = vmatpush1.msra.mxu0 %v4292_v31  ;;  %v1564_v14 = vpop.permute.xlu0 %1563 }
 0x5f3   : > { %1714 = vmatprep.subr.mxu0 %v4297_v20  ;;  %v1566_v39 = vsel %vm529_vm9, %v1564_v14, %v1562_v43 }
 0x5f4   : > { %1715 = vmatpush1.msra.mxu0 %v4302_v9  ;;  %v1554_v59 = vpop.permute.xlu1 %1553 }
 0x5f5   : > { %1716 = vmatprep.subr.mxu0 %v4306_v42 }
 0x5f6   : > { %1717 = vmatpush1.msra.mxu0 %v4310_v37  ;;  %v1556_v50 = vpop.permute.xlu0 %1555 }
 0x5f7   : > { %1718 = vmatprep.subr.mxu0 %v4200_v4  ;;  %v1558_v36 = vsel %vm520_vm10, %v1556_v50, %v1554_v59 }
 0x5f8   : > { %1719 = vmatpush1.msra.mxu0 %v4203_v51 }
 0x5f9   : > { %3185 = vmatprep.subr.msk.mxu0 %vm408_vm0, %v4086_v52  ;;  %v1592_v52 = vmul.f32 %v1590_v56, %v5484_v24  ;;  %v1583_v56 = vmul.f32 %v1581_v41, %v3620_v25  ;;  %v1567_v41 = vmul.f32 %v1566_v39, %v3631_v11 }
 0x5fa   : > { %3186 = vmatpush1.msk.msra.mxu0 %vm408_vm0, %v4091_v16  ;;  %v1598_v16 = vsel %vm565_vm4, %v1596_v23, %v1594_v49  ;;  %v4621_v23 = vld [vmem:[%s5409_s7 + $0x18] ss:$0 sm:$0xff] }
 0x5fb   : > { %1722 = vmatprep.subr.mxu0 %v4104_v33  ;;  %v1576_v33 = vmul.f32 %v1574_v61, %v3618_v0  ;;  %v4624_v49 = vmul.f32 %v4621_v23, %v1598_v16  ;;  %v5499_v61 = vld [vmem:[#allocation21_spill] sm:$0xff]  ;;  %v1615_v16 = vrot.slane %v1575_v47, 4 }
 0x5fc   : > { %1723 = vmatpush1.msra.mxu0 %v4108_v58  ;;  %v1591_v58 = vmul.f32 %v1589_v38, %v5483_v19 }
 0x5fd   : > { %1724 = vmatprep.subr.mxu0 %v4113_v10  ;;  %v1565_v10 = vsel %vm529_vm9, %v1562_v43, %v1564_v14  ;;  %v1616_v43 = vrot.slane %v1576_v33, 4 }
 0x5fe   : > { %1725 = vmatpush1.msra.mxu0 %v4122_v8  ;;  %v1622_v8 = vrot.slane %v1592_v52, 4  ;;  %v1568_v38 = vmul.f32 %v1565_v10, %v3637_v15  ;;  %v5500_v52 = vld [vmem:[#allocation22_spill] sm:$0xff]  ;;  %v1621_v22 = vrot.slane %v1591_v58, 4  ;;  %v1609_v10 = vrot.slane %v1567_v41, 4 }
 0x5ff   : > { %1726 = vmatprep.subr.mxu0 %v4128_v63  ;;  %v1557_v63 = vsel %vm520_vm10, %v1554_v59, %v1556_v50  ;;  %v4659_v47 = vsel %vm408_vm0, %v4494_v55, %v1616_v43  ;;  %v4718_v43 = vld [vmem:[%s5405_s3 + $0x20] sm:$0xff] }
 0x600   : > { %1727 = vmatpush1.msra.mxu0 %v4131_v45  ;;  %v4633_v45 = vld [vmem:[%s5409_s7 + $0x10] ss:$0 sm:$0xff]  ;;  %v4649_v33 = vsel %vm408_vm0, %v1584_v30, %v1622_v8  ;;  %v4654_v50 = vsel %vm408_vm0, %v1583_v56, %v1621_v22  ;;  %v1610_v58 = vrot.slane %v1568_v38, 4  ;;  %v4664_v30 = vsel %vm408_vm0, %v4492_v28, %v1615_v16  ;;  %5501 = vst [vmem:[#allocation20_spill] sm:$0xff] %v4718_v43 }
 0x601   : > { %1728 = vmatprep.subr.mxu0 %v5499_v61  ;;  %v4636_v14 = vmul.f32 %v4633_v45, %v1597_v13  ;;  %v1560_v61 = vmul.f32 %v1557_v63, %v3651_v32  ;;  %v1559_v13 = vmul.f32 %v1558_v36, %v3649_v60  ;;  %v1692_v55 = vpop.permute.xlu1 %1691  ;;  %v1927_v38 = vcombine.high %v4718_v43, %v4718_v43 }
 0x602   : > { %1729 = vmatpush1.msra.mxu0 %v5500_v52 }
 0x603   : > { %3187 = vmatprep.subr.msk.mxu0 %vm408_vm0, %v4624_v49  ;;  %v4668_v39 = vsel %vm408_vm0, %v1560_v61, %v1610_v58  ;;  %v4672_v59 = vsel %vm408_vm0, %v1559_v13, %v1609_v10  ;;  %3131 = vmatprep.mubr.msk.f32.mxu1 %vm999_vm2, %v1927_v38 }
 0x604   : > { %3188 = vmatpush2.msk.msra.mxu0 %vm408_vm0, %v4636_v14 }
 0x605   : > { %1756 = vmatprep.subr.mxu0 %v4649_v33 }
 0x606   : > { %1757 = vmatpush2.msra.mxu0 %v4654_v50 }
 0x607   : > { %1758 = vmatprep.subr.mxu0 %v4659_v47 }
 0x608   : > { %1759 = vmatpush2.msra.mxu0 %v4664_v30 }
 0x609   : > { %1760 = vmatprep.subr.mxu0 %v4668_v39 }
 0x60a   : > { %1761 = vmatpush2.msra.mxu0 %v4672_v59 }
 0x60b   : > { %1763 = vmatmul.mubr.f32.vlgmr.msra.gmra.mxu0 %v4534_v40  ;;  %v3130_v40 = vld [vmem:[%s5406_s4 + $0x10] sm:$0xf] }
 0x6cb   : > { %v1764_v8 = vpop.f32.mrf.mxu0 }
 0x6cc   : > { %v4676_v56 = vadd.f32 %v1764_v8, %v1692_v55 }
 0x6cd   : > { %v1766_v28 = vpop.f32.mrf.mxu0 }
 0x6ce   : > { %v4678_v63 = vadd.f32 %v1766_v28, %v1692_v55  ;;  %1777 = vrot.lane.b32.xlu0 %v4676_v56, %s3272_s24 }
 0x6d0   : > { %1779 = vrot.lane.b32.xlu1 %v4678_v63, %s3272_s24 }
 0x6d2   : > { %1769 = vrot.lane.b32.xlu0 %v4676_v56, %s3274_s26 }
 0x6d4   : > { %1771 = vrot.lane.b32.xlu1 %v4678_v63, %s3274_s26 }
 0x6d6   : > { %1817 = vrot.lane.b32.xlu0 %v4676_v56, %s3267_s19 }
 0x6d8   : > { %1819 = vrot.lane.b32.xlu1 %v4678_v63, %s3267_s19 }
 0x6da   : > { %1825 = vrot.lane.b32.xlu0 %v4676_v56, %s3268_s20 }
 0x6dc   : > { %1827 = vrot.lane.b32.xlu1 %v4678_v63, %s3268_s20 }
 0x6de   : > { %1801 = vrot.lane.b32.xlu0 %v4676_v56, %s3269_s21 }
 0x6e0   : > { %1803 = vrot.lane.b32.xlu1 %v4678_v63, %s3269_s21 }
 0x6e2   : > { %1809 = vrot.lane.b32.xlu0 %v4676_v56, %s3270_s22 }
 0x6e4   : > { %1811 = vrot.lane.b32.xlu1 %v4678_v63, %s3270_s22 }
 0x6e6   : > { %1793 = vrot.lane.b32.xlu0 %v4676_v56, %s3271_s23 }
 0x6e8   : > { %1795 = vrot.lane.b32.xlu1 %v4678_v63, %s3271_s23 }
 0x6ea   : > { %1785 = vrot.lane.b32.xlu0 %v4676_v56, %s3273_s25 }
 0x6ec   : > { %1787 = vrot.lane.b32.xlu1 %v4678_v63, %s3273_s25 }
 0x6ee   : > { %1923 = vperm.xlu0 %3242, %v3130_v40  }
 0x740   : > { %v1778_v36 = vpop.permute.xlu0 %1777 }
 0x742   : > { %v1780_v52 = vpop.permute.xlu1 %1779 }
 0x743   : > { %v1781_v22 = vsel %vm511_vm7, %v1778_v36, %v1780_v52  ;;  %v1782_v16 = vsel %vm511_vm7, %v1780_v52, %v1778_v36 }
 0x744   : > { %v1783_v41 = vmul.f32 %v1782_v16, %v3639_v7  ;;  %v1784_v61 = vmul.f32 %v1781_v22, %v3641_v12  ;;  %v1770_v13 = vpop.permute.xlu0 %1769 }
 0x746   : > { %v1772_v58 = vpop.permute.xlu1 %1771  ;;  %v1835_v8 = vrot.slane %v1783_v41, 4  ;;  %v1836_v28 = vrot.slane %v1784_v61, 4 }
 0x747   : > { %v1773_v10 = vsel %vm502_vm8, %v1770_v13, %v1772_v58  ;;  %v1774_v55 = vsel %vm502_vm8, %v1772_v58, %v1770_v13 }
 0x748   : > { %v1775_v40 = vmul.f32 %v1774_v55, %v3672_v48  ;;  %v1776_v38 = vmul.f32 %v1773_v10, %v3674_v29  ;;  %v1818_v43 = vpop.permute.xlu0 %1817 }
 0x74a   : > { %v1820_v36 = vpop.permute.xlu1 %1819  ;;  %v4736_v52 = vsel %vm408_vm0, %v1776_v38, %v1836_v28  ;;  %v4739_v22 = vsel %vm408_vm0, %v1775_v40, %v1835_v8 }
 0x74b   : > { %5502 = vst [vmem:[#allocation4_spill] sm:$0xff] %v4736_v52  ;;  %5503 = vst [vmem:[#allocation16_spill] sm:$0xff] %v4739_v22  ;;  %1930 = vmatprep.subr.mxu1 %v4736_v52  ;;  %v1822_v8 = vsel %vm556_vm3, %v1820_v36, %v1818_v43  ;;  %v1821_v38 = vsel %vm556_vm3, %v1818_v43, %v1820_v36 }
 0x74c   : > { %1931 = vmatpush1.msra.mxu1 %v4739_v22  ;;  %v1826_v41 = vpop.permute.xlu0 %1825 }
 0x74d   : > { %3189 = vmatprep.subr.msk.mxu1 %vm408_vm0, %v4624_v49 }
 0x74e   : > { %v1828_v16 = vpop.permute.xlu1 %1827  ;;  %3190 = vmatpush1.msk.msra.mxu1 %vm408_vm0, %v4636_v14 }
 0x74f   : > { %1934 = vmatprep.subr.mxu1 %v4649_v33 }
 0x750   : > { %1935 = vmatpush1.msra.mxu1 %v4654_v50  ;;  %v1802_v13 = vpop.permute.xlu0 %1801 }
 0x751   : > { %1936 = vmatprep.subr.mxu1 %v4659_v47 }
 0x752   : > { %1937 = vmatpush1.msra.mxu1 %v4664_v30  ;;  %v1804_v61 = vpop.permute.xlu1 %1803 }
 0x753   : > { %1938 = vmatprep.subr.mxu1 %v4668_v39  ;;  %v1806_v40 = vsel %vm538_vm5, %v1804_v61, %v1802_v13 }
 0x754   : > { %1939 = vmatpush1.msra.mxu1 %v4672_v59  ;;  %v1810_v10 = vpop.permute.xlu0 %1809 }
 0x755   : > { %1940 = vmatprep.subr.mxu1 %v4552_v5 }
 0x756   : > { %1941 = vmatpush1.msra.mxu1 %v4555_v35  ;;  %v1812_v58 = vpop.permute.xlu1 %1811 }
 0x757   : > { %3191 = vmatprep.subr.msk.mxu1 %vm408_vm0, %v4445_v2  ;;  %v1813_v43 = vsel %vm547_vm6, %v1810_v10, %v1812_v58 }
 0x758   : > { %3192 = vmatpush1.msk.msra.mxu1 %vm408_vm0, %v4452_v53  ;;  %v1794_v28 = vpop.permute.xlu0 %1793 }
 0x759   : > { %1944 = vmatprep.subr.mxu1 %v4465_v6 }
 0x75a   : > { %1945 = vmatpush1.msra.mxu1 %v4470_v27  ;;  %v1796_v55 = vpop.permute.xlu1 %1795 }
 0x75b   : > { %1946 = vmatprep.subr.mxu1 %v4475_v54 }
 0x75c   : > { %1947 = vmatpush1.msra.mxu1 %v4480_v26 }
 0x75d   : > { %1948 = vmatprep.subr.mxu1 %v4484_v1 }
 0x75e   : > { %1949 = vmatpush1.msra.mxu1 %v4488_v34  ;;  %v1788_v36 = vpop.permute.xlu1 %1787 }
 0x75f   : > { %1950 = vmatprep.subr.mxu1 %v4378_v3  ;;  %v1814_v3 = vsel %vm547_vm6, %v1812_v58, %v1810_v10  ;;  %v1798_v58 = vsel %vm529_vm9, %v1796_v55, %v1794_v28  ;;  %v1786_v10 = vpop.permute.xlu0 %1785 }
 0x760   : > { %1951 = vmatpush1.msra.mxu1 %v4381_v46  ;;  %v1805_v46 = vsel %vm538_vm5, %v1802_v13, %v1804_v61  ;;  %v1829_v61 = vsel %vm565_vm4, %v1826_v41, %v1828_v16 }
 0x761   : > { %3193 = vmatprep.subr.msk.mxu1 %vm408_vm0, %v4267_v17  ;;  %v1824_v17 = vmul.f32 %v1822_v8, %v5484_v24  ;;  %v1807_v13 = vmul.f32 %v1805_v46, %v3616_v57  ;;  %v1816_v8 = vmul.f32 %v1814_v3, %v3622_v18  ;;  %v1789_v46 = vsel %vm520_vm10, %v1786_v10, %v1788_v36 }
 0x762   : > { %3194 = vmatpush1.msk.msra.mxu1 %vm408_vm0, %v4274_v44  ;;  %v1830_v44 = vsel %vm565_vm4, %v1828_v16, %v1826_v41  ;;  %v1815_v16 = vmul.f32 %v1813_v43, %v3620_v25 }
 0x763   : > { %1954 = vmatprep.subr.mxu1 %v4287_v21  ;;  %v1808_v21 = vmul.f32 %v1806_v40, %v3618_v0  ;;  %v4803_v40 = vmul.f32 %v4621_v23, %v1830_v44 }
 0x764   : > { %1955 = vmatpush1.msra.mxu1 %v4292_v31  ;;  %v1823_v31 = vmul.f32 %v1821_v38, %v5483_v19  ;;  %v1799_v38 = vmul.f32 %v1798_v58, %v3631_v11 }
 0x765   : > { %1956 = vmatprep.subr.mxu1 %v4297_v20  ;;  %v1797_v20 = vsel %vm529_vm9, %v1794_v28, %v1796_v55  ;;  %v1848_v3 = vrot.slane %v1808_v21, 4  ;;  %v1847_v28 = vrot.slane %v1807_v13, 4 }
 0x766   : > { %1957 = vmatpush1.msra.mxu1 %v4302_v9  ;;  %v1854_v9 = vrot.slane %v1824_v17, 4  ;;  %v1800_v41 = vmul.f32 %v1797_v20, %v3637_v15  ;;  %v1853_v55 = vrot.slane %v1823_v31, 4  ;;  %v5505_v20 = vmov 0.0  }
 0x767   : > { %1958 = vmatprep.subr.mxu1 %v4306_v42  ;;  %v4810_v42 = vmul.f32 %v4633_v45, %v1829_v61  ;;  %v4833_v43 = vsel %vm408_vm0, %v4678_v63, %v1848_v3  ;;  %v4838_v31 = vsel %vm408_vm0, %v4676_v56, %v1847_v28  ;;  %v5504_v63 = vld [vmem:[#allocation20_spill] sm:$0xff] }
 0x768   : > { %1959 = vmatpush1.msra.mxu1 %v4310_v37  ;;  %v1790_v37 = vsel %vm520_vm10, %v1788_v36, %v1786_v10  ;;  %v4823_v17 = vsel %vm408_vm0, %v1816_v8, %v1854_v9  ;;  %v1842_v21 = vrot.slane %v1800_v41, 4  ;;  %v1841_v36 = vrot.slane %v1799_v38, 4 }
 0x769   : > { %1960 = vmatprep.subr.mxu1 %v4200_v4  ;;  %v1792_v4 = vmul.f32 %v1789_v46, %v3651_v32  ;;  %v1791_v44 = vmul.f32 %v1790_v37, %v3649_v60  ;;  %v1924_v8 = vpop.permute.xlu0 %1923  ;;  %v4893_v46 = vld [vmem:[%s5405_s3 + $0x28] sm:$0xff] }
 0x76a   : > { %1961 = vmatpush1.msra.mxu1 %v4203_v51  ;;  %v4828_v51 = vsel %vm408_vm0, %v1815_v16, %v1853_v55  ;;  %v3133_v16 = vld [vmem:[%s5406_s4 + $0x14] sm:$0xf]  ;;  %v2160_v3 = vcombine.high %v4893_v46, %v4893_v46 }
 0x76b   : > { %3195 = vmatprep.subr.msk.mxu1 %vm408_vm0, %v4803_v40  ;;  %v4842_v61 = vsel %vm408_vm0, %v1792_v4, %v1842_v21  ;;  %v4846_v13 = vsel %vm408_vm0, %v1791_v44, %v1841_v36 }
 0x76c   : > { %3196 = vmatpush2.msk.msra.mxu1 %vm408_vm0, %v4810_v42  ;;  %3134 = vmatprep.mubr.msk.f32.mxu0 %vm999_vm2, %v2160_v3 }
 0x76d   : > { %1988 = vmatprep.subr.mxu1 %v4823_v17 }
 0x76e   : > { %1989 = vmatpush2.msra.mxu1 %v4828_v51 }
 0x76f   : > { %1990 = vmatprep.subr.mxu1 %v4833_v43 }
 0x770   : > { %1991 = vmatpush2.msra.mxu1 %v4838_v31 }
 0x771   : > { %1992 = vmatprep.subr.mxu1 %v4842_v61 }
 0x772   : > { %1993 = vmatpush2.msra.mxu1 %v4846_v13 }
 0x773   : > { %1995 = vmatmul.mubr.f32.vlgmr.msra.gmra.mxu1 %v5504_v63 }
 0x774   : > { %2310 = vmatprep.mubr.f32.mxu1 %v5505_v20 }
 0x833   : > { %v1996_v58 = vpop.f32.mrf.mxu1 }
 0x834   : > { %v4851_v56 = vadd.f32 %v1996_v58, %v1924_v8 }
 0x835   : > { %v1998_v10 = vpop.f32.mrf.mxu1 }
 0x836   : > { %v4853_v9 = vadd.f32 %v1998_v10, %v1924_v8  ;;  %2010 = vrot.lane.b32.xlu1 %v4851_v56, %s3272_s24 }
 0x838   : > { %2012 = vrot.lane.b32.xlu0 %v4853_v9, %s3272_s24 }
 0x83a   : > { %2002 = vrot.lane.b32.xlu1 %v4851_v56, %s3274_s26 }
 0x83c   : > { %2004 = vrot.lane.b32.xlu0 %v4853_v9, %s3274_s26 }
 0x83e   : > { %2050 = vrot.lane.b32.xlu1 %v4851_v56, %s3267_s19 }
 0x840   : > { %2052 = vrot.lane.b32.xlu0 %v4853_v9, %s3267_s19 }
 0x842   : > { %2058 = vrot.lane.b32.xlu1 %v4851_v56, %s3268_s20 }
 0x844   : > { %2060 = vrot.lane.b32.xlu0 %v4853_v9, %s3268_s20 }
 0x846   : > { %2034 = vrot.lane.b32.xlu1 %v4851_v56, %s3269_s21 }
 0x848   : > { %2036 = vrot.lane.b32.xlu0 %v4853_v9, %s3269_s21 }
 0x84a   : > { %2042 = vrot.lane.b32.xlu1 %v4851_v56, %s3270_s22 }
 0x84c   : > { %2044 = vrot.lane.b32.xlu0 %v4853_v9, %s3270_s22 }
 0x84e   : > { %2026 = vrot.lane.b32.xlu1 %v4851_v56, %s3271_s23 }
 0x850   : > { %2028 = vrot.lane.b32.xlu0 %v4853_v9, %s3271_s23 }
 0x852   : > { %2018 = vrot.lane.b32.xlu1 %v4851_v56, %s3273_s25 }
 0x854   : > { %2020 = vrot.lane.b32.xlu0 %v4853_v9, %s3273_s25 }
 0x856   : > { %2156 = vperm.xlu1 %3243, %v3133_v16  }
 0x8a8   : > { %v2011_v41 = vpop.permute.xlu1 %2010 }
 0x8aa   : > { %v2013_v37 = vpop.permute.xlu0 %2012 }
 0x8ab   : > { %v2014_v55 = vsel %vm511_vm7, %v2011_v41, %v2013_v37  ;;  %v2015_v28 = vsel %vm511_vm7, %v2013_v37, %v2011_v41 }
 0x8ac   : > { %v2016_v38 = vmul.f32 %v2015_v28, %v3639_v7  ;;  %v2017_v4 = vmul.f32 %v2014_v55, %v3641_v12  ;;  %v2003_v44 = vpop.permute.xlu1 %2002 }
 0x8ae   : > { %v2005_v21 = vpop.permute.xlu0 %2004  ;;  %v2068_v8 = vrot.slane %v2016_v38, 4  ;;  %v2069_v58 = vrot.slane %v2017_v4, 4 }
 0x8af   : > { %v2006_v36 = vsel %vm502_vm8, %v2003_v44, %v2005_v21  ;;  %v2007_v63 = vsel %vm502_vm8, %v2005_v21, %v2003_v44 }
 0x8b0   : > { %v2008_v10 = vmul.f32 %v2007_v63, %v3672_v48  ;;  %v2009_v16 = vmul.f32 %v2006_v36, %v3674_v29  ;;  %v2051_v3 = vpop.permute.xlu1 %2050 }
 0x8b2   : > { %v2053_v41 = vpop.permute.xlu0 %2052  ;;  %v4911_v37 = vsel %vm408_vm0, %v2009_v16, %v2069_v58  ;;  %v4914_v55 = vsel %vm408_vm0, %v2008_v10, %v2068_v8 }
 0x8b3   : > { %2163 = vmatprep.subr.mxu0 %v4911_v37  ;;  %v2055_v8 = vsel %vm556_vm3, %v2053_v41, %v2051_v3  ;;  %v2054_v16 = vsel %vm556_vm3, %v2051_v3, %v2053_v41 }
 0x8b4   : > { %2164 = vmatpush1.msra.mxu0 %v4914_v55  ;;  %v2059_v38 = vpop.permute.xlu1 %2058 }
 0x8b5   : > { %3197 = vmatprep.subr.msk.mxu0 %vm408_vm0, %v4803_v40 }
 0x8b6   : > { %v2061_v28 = vpop.permute.xlu0 %2060  ;;  %3198 = vmatpush1.msk.msra.mxu0 %vm408_vm0, %v4810_v42 }
 0x8b7   : > { %2167 = vmatprep.subr.mxu0 %v4823_v17 }
 0x8b8   : > { %2168 = vmatpush1.msra.mxu0 %v4828_v51  ;;  %v2035_v44 = vpop.permute.xlu1 %2034 }
 0x8b9   : > { %2169 = vmatprep.subr.mxu0 %v4833_v43 }
 0x8ba   : > { %2170 = vmatpush1.msra.mxu0 %v4838_v31  ;;  %v2037_v4 = vpop.permute.xlu0 %2036 }
 0x8bb   : > { %2171 = vmatprep.subr.mxu0 %v4842_v61  ;;  %v2039_v10 = vsel %vm538_vm5, %v2037_v4, %v2035_v44 }
 0x8bc   : > { %2172 = vmatpush1.msra.mxu0 %v4846_v13  ;;  %v2043_v36 = vpop.permute.xlu1 %2042 }
 0x8bd   : > { %2173 = vmatprep.subr.mxu0 %v4736_v52 }
 0x8be   : > { %2174 = vmatpush1.msra.mxu0 %v4739_v22  ;;  %v2045_v21 = vpop.permute.xlu0 %2044 }
 0x8bf   : > { %3199 = vmatprep.subr.msk.mxu0 %vm408_vm0, %v4624_v49  ;;  %v2046_v3 = vsel %vm547_vm6, %v2043_v36, %v2045_v21 }
 0x8c0   : > { %3200 = vmatpush1.msk.msra.mxu0 %vm408_vm0, %v4636_v14  ;;  %v2027_v58 = vpop.permute.xlu1 %2026 }
 0x8c1   : > { %2177 = vmatprep.subr.mxu0 %v4649_v33 }
 0x8c2   : > { %2178 = vmatpush1.msra.mxu0 %v4654_v50  ;;  %v2029_v63 = vpop.permute.xlu0 %2028 }
 0x8c3   : > { %2179 = vmatprep.subr.mxu0 %v4659_v47 }
 0x8c4   : > { %2180 = vmatpush1.msra.mxu0 %v4664_v30 }
 0x8c5   : > { %2181 = vmatprep.subr.mxu0 %v4668_v39 }
 0x8c6   : > { %2182 = vmatpush1.msra.mxu0 %v4672_v59  ;;  %v2021_v41 = vpop.permute.xlu0 %2020 }
 0x8c7   : > { %2183 = vmatprep.subr.mxu0 %v4552_v5  ;;  %v2047_v5 = vsel %vm547_vm6, %v2045_v21, %v2043_v36  ;;  %v2031_v21 = vsel %vm529_vm9, %v2029_v63, %v2027_v58  ;;  %v2019_v36 = vpop.permute.xlu1 %2018 }
 0x8c8   : > { %2184 = vmatpush1.msra.mxu0 %v4555_v35  ;;  %v2038_v35 = vsel %vm538_vm5, %v2035_v44, %v2037_v4  ;;  %v2062_v4 = vsel %vm565_vm4, %v2059_v38, %v2061_v28 }
 0x8c9   : > { %3201 = vmatprep.subr.msk.mxu0 %vm408_vm0, %v4445_v2  ;;  %v2057_v2 = vmul.f32 %v2055_v8, %v5484_v24  ;;  %v2040_v44 = vmul.f32 %v2038_v35, %v3616_v57  ;;  %v2049_v8 = vmul.f32 %v2047_v5, %v3622_v18  ;;  %v2022_v35 = vsel %vm520_vm10, %v2019_v36, %v2021_v41 }
 0x8ca   : > { %3202 = vmatpush1.msk.msra.mxu0 %vm408_vm0, %v4452_v53  ;;  %v2063_v53 = vsel %vm565_vm4, %v2061_v28, %v2059_v38  ;;  %v2048_v28 = vmul.f32 %v2046_v3, %v3620_v25  ;;  %v5506_v38 = vld [vmem:[#allocation5_spill] sm:$0xff]  ;;  %v2025_v3 = vmul.f32 %v2022_v35, %v3651_v32 }
 0x8cb   : > { %2187 = vmatprep.subr.mxu0 %v4465_v6  ;;  %v2041_v6 = vmul.f32 %v2039_v10, %v3618_v0  ;;  %v4978_v10 = vmul.f32 %v4621_v23, %v2063_v53  ;;  %v2032_v53 = vmul.f32 %v2031_v21, %v3631_v11 }
 0x8cc   : > { %2188 = vmatpush1.msra.mxu0 %v4470_v27  ;;  %v2056_v27 = vmul.f32 %v2054_v16, %v5483_v19 }
 0x8cd   : > { %2189 = vmatprep.subr.mxu0 %v4475_v54  ;;  %v2030_v54 = vsel %vm529_vm9, %v2027_v58, %v2029_v63  ;;  %v2081_v5 = vrot.slane %v2041_v6, 4  ;;  %v5507_v58 = vld [vmem:[#allocation17_spill] sm:$0xff] }
 0x8ce   : > { %2190 = vmatpush1.msra.mxu0 %v4480_v26  ;;  %v2087_v26 = vrot.slane %v2057_v2, 4  ;;  %v2033_v63 = vmul.f32 %v2030_v54, %v3637_v15  ;;  %v2086_v16 = vrot.slane %v2056_v27, 4  ;;  %v2080_v2 = vrot.slane %v2040_v44, 4 }
 0x8cf   : > { %2191 = vmatprep.subr.mxu0 %v4484_v1  ;;  %v4985_v1 = vmul.f32 %v4633_v45, %v2062_v4  ;;  %v5008_v44 = vsel %vm408_vm0, %v4853_v9, %v2081_v5  ;;  %v2074_v54 = vrot.slane %v2032_v53, 4 }
 0x8d0   : > { %2192 = vmatpush1.msra.mxu0 %v4488_v34  ;;  %v2023_v34 = vsel %vm520_vm10, %v2021_v41, %v2019_v36  ;;  %v4998_v6 = vsel %vm408_vm0, %v2049_v8, %v2087_v26  ;;  %v5003_v41 = vsel %vm408_vm0, %v2048_v28, %v2086_v16  ;;  %v2075_v27 = vrot.slane %v2033_v63, 4  ;;  %v2001_v26 = vld [vmem:[%s5407_s5] sm:$0xf] }
 0x8d1   : > { %2193 = vmatprep.subr.mxu0 %v5506_v38  ;;  %v2024_v4 = vmul.f32 %v2023_v34, %v3649_v60  ;;  %v5013_v8 = vsel %vm408_vm0, %v4851_v56, %v2080_v2  ;;  %v2157_v28 = vpop.permute.xlu1 %2156  ;;  %v5088_v2 = vld [vmem:[%s5405_s3 + $0x30] sm:$0xff] }
 0x8d2   : > { %2194 = vmatpush1.msra.mxu0 %v5507_v58  ;;  %v5017_v21 = vsel %vm408_vm0, %v2025_v3, %v2075_v27 }
 0x8d3   : > { %3203 = vmatprep.subr.msk.mxu0 %vm408_vm0, %v4978_v10  ;;  %v5021_v36 = vsel %vm408_vm0, %v2024_v4, %v2074_v54  ;;  %v2555_v54 = vcombine.high %v5088_v2, %v5088_v2 }
 0x8d4   : > { %3204 = vmatpush2.msk.msra.mxu0 %vm408_vm0, %v4985_v1 }
 0x8d5   : > { %2221 = vmatprep.subr.mxu0 %v4998_v6 }
 0x8d6   : > { %2222 = vmatpush2.msra.mxu0 %v5003_v41 }
 0x8d7   : > { %2223 = vmatprep.subr.mxu0 %v5008_v44 }
 0x8d8   : > { %2224 = vmatpush2.msra.mxu0 %v5013_v8 }
 0x8d9   : > { %2225 = vmatprep.subr.mxu0 %v5017_v21 }
 0x8da   : > { %2226 = vmatpush2.msra.mxu0 %v5021_v36 }
 0x8db   : > { %2228 = vmatmul.mubr.f32.vlgmr.msra.gmra.mxu0 %v4893_v46  ;;  %3138 = vmatprep.subr.msk.mxu0 %vm408_vm0, %v4853_v9  ;;  %v3142_v9 = vld [vmem:[%s5406_s4 + $0x18] sm:$0xf] }
 0x8dc   : > { %3139 = vmatpush1.msk.msra.mxu0 %vm408_vm0, %v4851_v56  ;;  %2390 = vmatprep.mubr.f32.mxu0 %v5505_v20  ;;  %v2234_v56 = vld [vmem:[%s5407_s5] sm:$0xf] }
 0x8df   : > { %3140 = vmatmul.mubr.msk.f32.vlgmr.msra.gmra.mxu0 %vm398_vm1, %v2001_v26 }
 0x8e0   : > { %2705 = vmatprep.mubr.f32.mxu0 %v5505_v20 }
 0x99b   : > { %v2229_v35 = vpop.f32.mrf.mxu0 }
 0x99c   : > { %v5035_v38 = vadd.f32 %v2229_v35, %v2157_v28 }
 0x99d   : > { %v2231_v46 = vpop.f32.mrf.mxu0 }
 0x99e   : > { %v5037_v5 = vadd.f32 %v2231_v46, %v2157_v28  ;;  %2405 = vrot.lane.b32.xlu0 %v5035_v38, %s3272_s24 }
 0x9a0   : > { %2407 = vrot.lane.b32.xlu1 %v5037_v5, %s3272_s24  ;;  %3135 = vmatprep.subr.msk.mxu1 %vm408_vm0, %v5037_v5 }
 0x9a1   : > { %3136 = vmatpush1.msk.msra.mxu1 %vm408_vm0, %v5035_v38 }
 0x9a2   : > { %2397 = vrot.lane.b32.xlu0 %v5035_v38, %s3274_s26 }
 0x9a4   : > { %2399 = vrot.lane.b32.xlu1 %v5037_v5, %s3274_s26 }
 0x9a6   : > { %2236 = vrot.lane.b32.xlu0 %v2234_v56, %s3275_s17 }
 0x9a8   : > { %2445 = vrot.lane.b32.xlu1 %v5035_v38, %s3267_s19 }
 0x9aa   : > { %2447 = vrot.lane.b32.xlu0 %v5037_v5, %s3267_s19 }
 0x9ac   : > { %2453 = vrot.lane.b32.xlu1 %v5035_v38, %s3268_s20 }
 0x9ae   : > { %2455 = vrot.lane.b32.xlu0 %v5037_v5, %s3268_s20 }
 0x9b0   : > { %2429 = vrot.lane.b32.xlu1 %v5035_v38, %s3269_s21 }
 0x9b2   : > { %2431 = vrot.lane.b32.xlu0 %v5037_v5, %s3269_s21 }
 0x9b4   : > { %2437 = vrot.lane.b32.xlu1 %v5035_v38, %s3270_s22 }
 0x9b6   : > { %2439 = vrot.lane.b32.xlu0 %v5037_v5, %s3270_s22 }
 0x9b8   : > { %2421 = vrot.lane.b32.xlu1 %v5035_v38, %s3271_s23 }
 0x9ba   : > { %2423 = vrot.lane.b32.xlu0 %v5037_v5, %s3271_s23 }
 0x9bc   : > { %2413 = vrot.lane.b32.xlu1 %v5035_v38, %s3273_s25 }
 0x9be   : > { %2415 = vrot.lane.b32.xlu0 %v5037_v5, %s3273_s25 }
 0x9c0   : > { %2551 = vperm.xlu1 %3243, %v3142_v9  }
 0xa10   : > { %v2406_v63 = vpop.permute.xlu0 %2405 }
 0xa12   : > { %v2408_v34 = vpop.permute.xlu1 %2407 }
 0xa13   : > { %v2409_v58 = vsel %vm511_vm7, %v2406_v63, %v2408_v34  ;;  %v2410_v16 = vsel %vm511_vm7, %v2408_v34, %v2406_v63 }
 0xa14   : > { %v2411_v53 = vmul.f32 %v2410_v16, %v3639_v7  ;;  %v2412_v3 = vmul.f32 %v2409_v58, %v3641_v12  ;;  %v2398_v4 = vpop.permute.xlu0 %2397 }
 0xa16   : > { %v2400_v27 = vpop.permute.xlu1 %2399  ;;  %v2463_v35 = vrot.slane %v2411_v53, 4  ;;  %v2464_v46 = vrot.slane %v2412_v3, 4 }
 0xa17   : > { %v2401_v26 = vsel %vm502_vm8, %v2398_v4, %v2400_v27  ;;  %v2402_v28 = vsel %vm502_vm8, %v2400_v27, %v2398_v4 }
 0xa18   : > { %v2403_v56 = vmul.f32 %v2402_v28, %v3672_v48  ;;  %v2404_v9 = vmul.f32 %v2401_v26, %v3674_v29  ;;  %v2237_v63 = vpop.permute.xlu0 %2236 }
 0xa19   : > { %3137 = vmatmul.mubr.msk.f32.vlgmr.msra.gmra.mxu1 %vm398_vm1, %v2237_v63 }
 0xa1a   : > { %v2446_v34 = vpop.permute.xlu1 %2445  ;;  %v5102_v58 = vsel %vm408_vm0, %v2404_v9, %v2464_v46  ;;  %v5105_v16 = vsel %vm408_vm0, %v2403_v56, %v2463_v35  ;;  %3143 = vmatprep.mubr.msk.f32.mxu1 %vm999_vm2, %v2555_v54 }
 0xa1b   : > { %2558 = vmatprep.subr.mxu1 %v5102_v58 }
 0xa1c   : > { %v2448_v53 = vpop.permute.xlu0 %2447  ;;  %2559 = vmatpush1.msra.mxu1 %v5105_v16 }
 0xa1d   : > { %3205 = vmatprep.subr.msk.mxu1 %vm408_vm0, %v4978_v10  ;;  %v2450_v46 = vsel %vm556_vm3, %v2448_v53, %v2446_v34  ;;  %v2449_v63 = vsel %vm556_vm3, %v2446_v34, %v2448_v53 }
 0xa1e   : > { %3206 = vmatpush1.msk.msra.mxu1 %vm408_vm0, %v4985_v1  ;;  %v2454_v3 = vpop.permute.xlu1 %2453 }
 0xa1f   : > { %2562 = vmatprep.subr.mxu1 %v4998_v6 }
 0xa20   : > { %v2456_v4 = vpop.permute.xlu0 %2455  ;;  %2563 = vmatpush1.msra.mxu1 %v5003_v41 }
 0xa21   : > { %2564 = vmatprep.subr.mxu1 %v5008_v44 }
 0xa22   : > { %2565 = vmatpush1.msra.mxu1 %v5013_v8  ;;  %v2430_v54 = vpop.permute.xlu1 %2429 }
 0xa23   : > { %2566 = vmatprep.subr.mxu1 %v5017_v21 }
 0xa24   : > { %v2432_v27 = vpop.permute.xlu0 %2431  ;;  %2567 = vmatpush1.msra.mxu1 %v5021_v36 }
 0xa25   : > { %2568 = vmatprep.subr.mxu1 %v4911_v37  ;;  %v2434_v9 = vsel %vm538_vm5, %v2432_v27, %v2430_v54 }
 0xa26   : > { %2569 = vmatpush1.msra.mxu1 %v4914_v55  ;;  %v2438_v28 = vpop.permute.xlu1 %2437 }
 0xa27   : > { %3207 = vmatprep.subr.msk.mxu1 %vm408_vm0, %v4803_v40 }
 0xa28   : > { %3208 = vmatpush1.msk.msra.mxu1 %vm408_vm0, %v4810_v42  ;;  %v2440_v26 = vpop.permute.xlu0 %2439 }
 0xa29   : > { %2572 = vmatprep.subr.mxu1 %v4823_v17  ;;  %v2441_v34 = vsel %vm547_vm6, %v2438_v28, %v2440_v26 }
 0xa2a   : > { %2573 = vmatpush1.msra.mxu1 %v4828_v51  ;;  %v2422_v56 = vpop.permute.xlu1 %2421 }
 0xa2b   : > { %2574 = vmatprep.subr.mxu1 %v4833_v43 }
 0xa2c   : > { %2575 = vmatpush1.msra.mxu1 %v4838_v31  ;;  %v2424_v35 = vpop.permute.xlu0 %2423 }
 0xa2d   : > { %2576 = vmatprep.subr.mxu1 %v4842_v61 }
 0xa2e   : > { %2577 = vmatpush1.msra.mxu1 %v4846_v13 }
 0xa2f   : > { %2578 = vmatprep.subr.mxu1 %v4736_v52  ;;  %v2442_v52 = vsel %vm547_vm6, %v2440_v26, %v2438_v28  ;;  %v2426_v26 = vsel %vm529_vm9, %v2424_v35, %v2422_v56  ;;  %v2414_v28 = vpop.permute.xlu1 %2413 }
 0xa30   : > { %2579 = vmatpush1.msra.mxu1 %v4739_v22  ;;  %v2433_v22 = vsel %vm538_vm5, %v2430_v54, %v2432_v27  ;;  %v2416_v53 = vpop.permute.xlu0 %2415  ;;  %v2457_v27 = vsel %vm565_vm4, %v2454_v3, %v2456_v4 }
 0xa31   : > { %3209 = vmatprep.subr.msk.mxu1 %vm408_vm0, %v4624_v49  ;;  %v2452_v49 = vmul.f32 %v2450_v46, %v5484_v24  ;;  %v2435_v54 = vmul.f32 %v2433_v22, %v3616_v57  ;;  %v2444_v46 = vmul.f32 %v2442_v52, %v3622_v18  ;;  %v2417_v22 = vsel %vm520_vm10, %v2414_v28, %v2416_v53 }
 0xa32   : > { %3210 = vmatpush1.msk.msra.mxu1 %vm408_vm0, %v4636_v14  ;;  %v2458_v14 = vsel %vm565_vm4, %v2456_v4, %v2454_v3  ;;  %v2443_v3 = vmul.f32 %v2441_v34, %v3620_v25  ;;  %v5508_v4 = vld [vmem:[#allocation19_spill] sm:$0xff] }
 0xa33   : > { %2582 = vmatprep.subr.mxu1 %v4649_v33  ;;  %v2436_v33 = vmul.f32 %v2434_v9, %v3618_v0  ;;  %v5170_v9 = vmul.f32 %v4621_v23, %v2458_v14  ;;  %v2420_v14 = vmul.f32 %v2417_v22, %v3651_v32 }
 0xa34   : > { %2583 = vmatpush1.msra.mxu1 %v4654_v50  ;;  %v2451_v50 = vmul.f32 %v2449_v63, %v5483_v19  ;;  %v2475_v63 = vrot.slane %v2435_v54, 4 }
 0xa35   : > { %2584 = vmatprep.subr.mxu1 %v4659_v47  ;;  %v2425_v47 = vsel %vm529_vm9, %v2422_v56, %v2424_v35  ;;  %v2476_v52 = vrot.slane %v2436_v33, 4  ;;  %v5509_v56 = vld [vmem:[#allocation18_spill] sm:$0xff] }
 0xa36   : > { %2585 = vmatpush1.msra.mxu1 %v4664_v30  ;;  %v2482_v30 = vrot.slane %v2452_v49, 4  ;;  %v2428_v35 = vmul.f32 %v2425_v47, %v3637_v15  ;;  %v2481_v23 = vrot.slane %v2451_v50, 4  ;;  %v2427_v49 = vmul.f32 %v2426_v26, %v3631_v11 }
 0xa37   : > { %2586 = vmatprep.subr.mxu1 %v4668_v39  ;;  %v5177_v39 = vmul.f32 %v4633_v45, %v2457_v27  ;;  %v5200_v50 = vsel %vm408_vm0, %v5037_v5, %v2476_v52  ;;  %v5205_v54 = vsel %vm408_vm0, %v5035_v38, %v2475_v63  ;;  %v380_v52 = vld [vmem:[%s5404_s2 + $0x10] sm:$0xf] }
 0xa38   : > { %2587 = vmatpush1.msra.mxu1 %v4672_v59  ;;  %v2418_v59 = vsel %vm520_vm10, %v2416_v53, %v2414_v28  ;;  %v5190_v45 = vsel %vm408_vm0, %v2444_v46, %v2482_v30  ;;  %v5195_v34 = vsel %vm408_vm0, %v2443_v3, %v2481_v23  ;;  %v2470_v53 = vrot.slane %v2428_v35, 4  ;;  %v3031_v35 = vld [vmem:[%s5408_s6] sm:$0xf] }
 0xa39   : > { %2588 = vmatprep.subr.mxu1 %v5508_v4  ;;  %v2419_v33 = vmul.f32 %v2418_v59, %v3649_v60  ;;  %v2469_v27 = vrot.slane %v2427_v49, 4  ;;  %v2946_v4 = vld [vmem:[%s5407_s5] sm:$0xf]  ;;  %v5284_v49 = vld [vmem:[%s5405_s3 + $0x38] sm:$0xff] }
 0xa3a   : > { %2589 = vmatpush1.msra.mxu1 %v5509_v56  ;;  %v5209_v47 = vsel %vm408_vm0, %v2420_v14, %v2470_v53 }
 0xa3b   : > { %3211 = vmatprep.subr.msk.mxu1 %vm408_vm0, %v5170_v9  ;;  %v5213_v46 = vsel %vm408_vm0, %v2419_v33, %v2469_v27  ;;  %v2552_v26 = vpop.permute.xlu1 %2551 }
 0xa3c   : > { %3212 = vmatpush2.msk.msra.mxu1 %vm408_vm0, %v5177_v39 }
 0xa3d   : > { %2616 = vmatprep.subr.mxu1 %v5190_v45 }
 0xa3e   : > { %2617 = vmatpush2.msra.mxu1 %v5195_v34 }
 0xa3f   : > { %2618 = vmatprep.subr.mxu1 %v5200_v50 }
 0xa40   : > { %2619 = vmatpush2.msra.mxu1 %v5205_v54 }
 0xa41   : > { %2620 = vmatprep.subr.mxu1 %v5209_v47 }
 0xa42   : > { %2621 = vmatpush2.msra.mxu1 %v5213_v46 }
 0xa43   : > { %2623 = vmatmul.mubr.f32.vlgmr.msra.gmra.mxu1 %v5088_v2  ;;  %v3148_v2 = vld [vmem:[%s5406_s4 + $0x1c] sm:$0xf] }
 0xa44   : > { %3022 = vmatprep.mubr.f32.mxu1 %v5505_v20  ;;  %v2629_v20 = vld [vmem:[%s5407_s5] sm:$0xf] }
 0xad9   : > { %v5218_v5 = vpop.f32.mrf.mxu1 }
 0xadb   : > { %v5220_v38 = vpop.f32.mrf.mxu1 }
 0xb03   : > { %v2624_v28 = vpop.f32.mrf.mxu1 }
 0xb04   : > { %v5222_v30 = vadd.f32 %v2624_v28, %v2552_v26 }
 0xb05   : > { %v2626_v3 = vpop.f32.mrf.mxu1 }
 0xb06   : > { %v5224_v22 = vadd.f32 %v2626_v3, %v2552_v26  ;;  %2722 = vrot.lane.b32.xlu0 %v5222_v30, %s3272_s24  ;;  %v2872_v26 = vcombine.high %v5284_v49, %v5284_v49 }
 0xb08   : > { %2724 = vrot.lane.b32.xlu1 %v5224_v22, %s3272_s24  ;;  %3144 = vmatprep.subr.msk.mxu0 %vm408_vm0, %v5224_v22 }
 0xb09   : > { %3145 = vmatpush1.msk.msra.mxu0 %vm408_vm0, %v5222_v30 }
 0xb0a   : > { %2714 = vrot.lane.b32.xlu0 %v5222_v30, %s3274_s26 }
 0xb0c   : > { %2716 = vrot.lane.b32.xlu1 %v5224_v22, %s3274_s26 }
 0xb0e   : > { %2631 = vrot.lane.b32.xlu0 %v2629_v20, %s3276_s13 }
 0xb10   : > { %2762 = vrot.lane.b32.xlu1 %v5222_v30, %s3267_s19 }
 0xb12   : > { %2764 = vrot.lane.b32.xlu0 %v5224_v22, %s3267_s19 }
 0xb14   : > { %2770 = vrot.lane.b32.xlu1 %v5222_v30, %s3268_s20 }
 0xb16   : > { %2772 = vrot.lane.b32.xlu0 %v5224_v22, %s3268_s20 }
 0xb18   : > { %2746 = vrot.lane.b32.xlu1 %v5222_v30, %s3269_s21 }
 0xb1a   : > { %2748 = vrot.lane.b32.xlu0 %v5224_v22, %s3269_s21 }
 0xb1c   : > { %2754 = vrot.lane.b32.xlu1 %v5222_v30, %s3270_s22 }
 0xb1e   : > { %2756 = vrot.lane.b32.xlu0 %v5224_v22, %s3270_s22 }
 0xb20   : > { %2738 = vrot.lane.b32.xlu1 %v5222_v30, %s3271_s23 }
 0xb22   : > { %2740 = vrot.lane.b32.xlu0 %v5224_v22, %s3271_s23  ;;  %s3277_s23 = smov 116  }
 0xb24   : > { %2730 = vrot.lane.b32.xlu1 %v5222_v30, %s3273_s25 }
 0xb26   : > { %2732 = vrot.lane.b32.xlu0 %v5224_v22, %s3273_s25 }
 0xb28   : > { %2868 = vperm.xlu1 %3243, %v3148_v2  }
 0xb2a   : > { %2948 = vrot.lane.b32.xlu0 %v2946_v4, %s3277_s23 }
 0xb2c   : > { %393 = vperm.xlu1 %3243, %v380_v52  }
 0xb2e   : > { %3034 = vperm.xlu0 %3242, %v3031_v35  }
 0xb78   : > { %v2723_v59 = vpop.permute.xlu0 %2722 }
 0xb7a   : > { %v2725_v56 = vpop.permute.xlu1 %2724 }
 0xb7b   : > { %v2726_v23 = vsel %vm511_vm7, %v2723_v59, %v2725_v56  ;;  %v2727_v63 = vsel %vm511_vm7, %v2725_v56, %v2723_v59 }
 0xb7c   : > { %v2728_v14 = vmul.f32 %v2727_v63, %v3639_v7  ;;  %v2729_v33 = vmul.f32 %v2726_v23, %v3641_v12  ;;  %v2715_v53 = vpop.permute.xlu0 %2714  ;;  %v5511_v63 = vld [vmem:[#allocation16_spill] sm:$0xff] }
 0xb7e   : > { %v2717_v27 = vpop.permute.xlu1 %2716  ;;  %v2780_v20 = vrot.slane %v2728_v14, 4  ;;  %v2781_v2 = vrot.slane %v2729_v33, 4 }
 0xb7f   : > { %v2718_v28 = vsel %vm502_vm8, %v2715_v53, %v2717_v27  ;;  %v2719_v3 = vsel %vm502_vm8, %v2717_v27, %v2715_v53 }
 0xb80   : > { %v2720_v4 = vmul.f32 %v2719_v3, %v3672_v48  ;;  %v2721_v52 = vmul.f32 %v2718_v28, %v3674_v29  ;;  %v2632_v7 = vpop.permute.xlu0 %2631 }
 0xb81   : > { %3146 = vmatmul.mubr.msk.f32.vlgmr.msra.gmra.mxu0 %vm398_vm1, %v2632_v7 }
 0xb82   : > { %v2763_v12 = vpop.permute.xlu1 %2762  ;;  %v2803_v35 = vsel %vm408_vm0, %v2721_v52, %v2781_v2  ;;  %v2802_v59 = vsel %vm408_vm0, %v2720_v4, %v2780_v20  ;;  %3149 = vmatprep.mubr.msk.f32.mxu0 %vm999_vm2, %v2872_v26 }
 0xb83   : > { %2875 = vmatprep.subr.mxu0 %v2803_v35 }
 0xb84   : > { %v2765_v56 = vpop.permute.xlu0 %2764  ;;  %2876 = vmatpush1.msra.mxu0 %v2802_v59 }
 0xb85   : > { %3213 = vmatprep.subr.msk.mxu0 %vm408_vm0, %v5170_v9 }
 0xb86   : > { %3214 = vmatpush1.msk.msra.mxu0 %vm408_vm0, %v5177_v39  ;;  %v2771_v48 = vpop.permute.xlu1 %2770 }
 0xb87   : > { %2879 = vmatprep.subr.mxu0 %v5190_v45 }
 0xb88   : > { %v2773_v29 = vpop.permute.xlu0 %2772  ;;  %2880 = vmatpush1.msra.mxu0 %v5195_v34 }
 0xb89   : > { %2881 = vmatprep.subr.mxu0 %v5200_v50 }
 0xb8a   : > { %2882 = vmatpush1.msra.mxu0 %v5205_v54  ;;  %v2747_v9 = vpop.permute.xlu1 %2746 }
 0xb8b   : > { %2883 = vmatprep.subr.mxu0 %v5209_v47 }
 0xb8c   : > { %v2749_v23 = vpop.permute.xlu0 %2748  ;;  %2884 = vmatpush1.msra.mxu0 %v5213_v46 }
 0xb8d   : > { %2885 = vmatprep.subr.mxu0 %v5102_v58 }
 0xb8e   : > { %2886 = vmatpush1.msra.mxu0 %v5105_v16  ;;  %v2755_v45 = vpop.permute.xlu1 %2754 }
 0xb8f   : > { %3215 = vmatprep.subr.msk.mxu0 %vm408_vm0, %v4978_v10 }
 0xb90   : > { %3216 = vmatpush1.msk.msra.mxu0 %vm408_vm0, %v4985_v1  ;;  %v2757_v39 = vpop.permute.xlu0 %2756  ;;  %v2767_v1 = vsel %vm556_vm3, %v2765_v56, %v2763_v12 }
 0xb91   : > { %2889 = vmatprep.subr.mxu0 %v4998_v6 }
 0xb92   : > { %2890 = vmatpush1.msra.mxu0 %v5003_v41  ;;  %v2739_v6 = vpop.permute.xlu1 %2738  ;;  %v2751_v41 = vsel %vm538_vm5, %v2749_v23, %v2747_v9 }
 0xb93   : > { %2891 = vmatprep.subr.mxu0 %v5008_v44  ;;  %v2759_v44 = vsel %vm547_vm6, %v2757_v39, %v2755_v45 }
 0xb94   : > { %2892 = vmatpush1.msra.mxu0 %v5013_v8  ;;  %v2741_v10 = vpop.permute.xlu0 %2740  ;;  %v2758_v8 = vsel %vm547_vm6, %v2755_v45, %v2757_v39  ;;  %v5512_v45 = vld [vmem:[#allocation10_spill] sm:$0xff] }
 0xb95   : > { %2893 = vmatprep.subr.mxu0 %v5017_v21  ;;  %v2743_v58 = vsel %vm529_vm9, %v2741_v10, %v2739_v6 }
 0xb96   : > { %2894 = vmatpush1.msra.mxu0 %v5021_v36  ;;  %v2731_v16 = vpop.permute.xlu1 %2730  ;;  %v2744_v33 = vmul.f32 %v2743_v58, %v3631_v11 }
 0xb97   : > { %2895 = vmatprep.subr.mxu0 %v4911_v37  ;;  %v2766_v37 = vsel %vm556_vm3, %v2763_v12, %v2765_v56 }
 0xb98   : > { %2896 = vmatpush1.msra.mxu0 %v4914_v55  ;;  %v2750_v55 = vsel %vm538_vm5, %v2747_v9, %v2749_v23  ;;  %v2733_v21 = vpop.permute.xlu0 %2732  ;;  %v2786_v3 = vrot.slane %v2744_v33, 4 }
 0xb99   : > { %3217 = vmatprep.subr.msk.mxu0 %vm408_vm0, %v4803_v40  ;;  %v2769_v40 = vmul.f32 %v2767_v1, %v5484_v24  ;;  %v2774_v24 = vsel %vm565_vm4, %v2771_v48, %v2773_v29  ;;  %v2752_v36 = vmul.f32 %v2750_v55, %v3616_v57  ;;  %v2760_v57 = vmul.f32 %v2758_v8, %v3620_v25 }
 0xb9a   : > { %3218 = vmatpush1.msk.msra.mxu0 %vm408_vm0, %v4810_v42  ;;  %v2775_v42 = vsel %vm565_vm4, %v2773_v29, %v2771_v48  ;;  %v2734_v50 = vsel %vm520_vm10, %v2731_v16, %v2733_v21  ;;  %v2735_v46 = vsel %vm520_vm10, %v2733_v21, %v2731_v16 }
 0xb9b   : > { %2899 = vmatprep.subr.mxu0 %v4823_v17  ;;  %v2753_v17 = vmul.f32 %v2751_v41, %v3618_v0  ;;  %v2761_v0 = vmul.f32 %v2759_v44, %v3622_v18  ;;  %v3256_v18 = vld [vmem:[%s5409_s7 + $0x10] ss:$0 sm:$0xff]  ;;  %v2792_v25 = vrot.slane %v2752_v36, 4  ;;  %v2737_v53 = vmul.f32 %v2734_v50, %v3651_v32  ;;  %v5513_v41 = vld [vmem:[#allocation6_spill] sm:$0xff] }
 0xb9c   : > { %2900 = vmatpush1.msra.mxu0 %v4828_v51  ;;  %v2768_v51 = vmul.f32 %v2766_v37, %v5483_v19  ;;  %v3255_v19 = vld [vmem:[%s5409_s7 + $0x18] ss:$0 sm:$0xff]  ;;  %v2776_v54 = vmul.f32 %v3256_v18, %v2774_v24  ;;  %v2736_v26 = vmul.f32 %v2735_v46, %v3649_v60  ;;  %v2392_v60 = vpop.f32.mrf.mxu0  ;;  %v2949_v23 = vpop.permute.xlu0 %2948 }
 0xb9d   : > { %2901 = vmatprep.subr.mxu0 %v4833_v43  ;;  %v2742_v43 = vsel %vm529_vm9, %v2739_v6, %v2741_v10  ;;  %v2777_v34 = vmul.f32 %v3255_v19, %v2775_v42  ;;  %v2793_v47 = vrot.slane %v2753_v17, 4  ;;  %v2806_v11 = vsel %vm408_vm0, %v5222_v30, %v2792_v25 }
 0xb9e   : > { %2902 = vmatpush1.msra.mxu0 %v4838_v31  ;;  %v2799_v31 = vrot.slane %v2769_v40, 4  ;;  %v2798_v14 = vrot.slane %v2768_v51, 4  ;;  %v2804_v20 = vsel %vm408_vm0, %v2736_v26, %v2786_v3  ;;  %v2394_v2 = vpop.f32.mrf.mxu0  ;;  %v2393_v4 = vadd.f32 %v2392_v60, %v5218_v5 }
 0xb9f   : > { %2903 = vmatprep.subr.mxu0 %v4842_v61  ;;  %v5510_v61 = vld [vmem:[#allocation4_spill] sm:$0xff]  ;;  %v2807_v28 = vsel %vm408_vm0, %v5224_v22, %v2793_v47  ;;  %v2395_v22 = vadd.f32 %v2394_v2, %v5220_v38 }
 0xba0   : > { %2904 = vmatpush1.msra.mxu0 %v4846_v13  ;;  %v2745_v13 = vmul.f32 %v2742_v43, %v3637_v15  ;;  %v2809_v27 = vsel %vm408_vm0, %v2761_v0, %v2799_v31  ;;  %v2808_v15 = vsel %vm408_vm0, %v2760_v57, %v2798_v14 }
 0xba1   : > { %2905 = vmatprep.subr.mxu0 %v5510_v61 }
 0xba2   : > { %2906 = vmatpush1.msra.mxu0 %v5511_v63  ;;  %v2787_v62 = vrot.slane %v2745_v13, 4 }
 0xba3   : > { %3219 = vmatprep.subr.msk.mxu0 %vm408_vm0, %v2777_v34  ;;  %v2869_v59 = vpop.permute.xlu1 %2868 }
 0xba4   : > { %3220 = vmatpush2.msk.msra.mxu0 %vm408_vm0, %v2776_v54  ;;  %v2805_v32 = vsel %vm408_vm0, %v2737_v53, %v2787_v62 }
 0xba5   : > { %2933 = vmatprep.subr.mxu0 %v2809_v27 }
 0xba6   : > { %2934 = vmatpush2.msra.mxu0 %v2808_v15 }
 0xba7   : > { %2935 = vmatprep.subr.mxu0 %v2807_v28  ;;  %v394_v5 = vpop.permute.xlu1 %393 }
 0xba8   : > { %2936 = vmatpush2.msra.mxu0 %v2806_v11  ;;  %v492_v10 = vadd.f32 %v5512_v45, %v394_v5  ;;  %v494_v37 = vadd.f32 %v5513_v41, %v394_v5 }
 0xba9   : > { %2937 = vmatprep.subr.mxu0 %v2805_v32  ;;  %v3035_v38 = vpop.permute.xlu0 %3034 }
 0xbaa   : > { %2938 = vmatpush2.msra.mxu0 %v2804_v20 }
 0xbab   : > { %2940 = vmatmul.mubr.f32.vlgmr.msra.gmra.mxu0 %v5284_v49 }
 0xc41   : > { %v2707_v52 = vpop.f32.mrf.mxu0 }
 0xc42   : > { %v2712_v7 = vadd.f32 %v2707_v52, %v2393_v4 }
 0xc43   : > { %v2709_v12 = vpop.f32.mrf.mxu0 }
 0xc44   : > { %v2713_v35 = vadd.f32 %v2709_v12, %v2395_v22 }
 0xc6b   : > { %v2941_v30 = vpop.f32.mrf.mxu0 }
 0xc6c   : > { %v2942_v29 = vadd.f32 %v2941_v30, %v2869_v59 }
 0xc6d   : > { %v2943_v56 = vpop.f32.mrf.mxu0 }
 0xc6e   : > { %v2944_v48 = vadd.f32 %v2943_v56, %v2869_v59 }
 0xc70   : > { %3150 = vmatprep.subr.msk.mxu1 %vm408_vm0, %v2944_v48 }
 0xc71   : > { %3151 = vmatpush1.msk.msra.mxu1 %vm408_vm0, %v2942_v29 }
 0xc72   : > { %3152 = vmatmul.mubr.msk.f32.vlgmr.msra.gmra.mxu1 %vm398_vm1, %v2949_v23 }
 0xd32   : > { %v3024_v49 = vpop.f32.mrf.mxu1 }
 0xd33   : > { %v3029_v9 = vadd.f32 %v3024_v49, %v2712_v7 }
 0xd34   : > { %v3026_v39 = vpop.f32.mrf.mxu1 }
 0xd35   : > { %v3037_v1 = vadd.f32 %v3035_v38, %v3029_v9  ;;  %v3030_v6 = vadd.f32 %v3026_v39, %v2713_v35 }
 0xd37   : > { %v3039_v55 = vadd.f32 %v3037_v1, %v492_v10  ;;  %v3038_v40 = vadd.f32 %v3035_v38, %v3030_v6 }
 0xd39   : > { %v3040_v44 = vadd.f32 %v3038_v40, %v494_v37  ;;  %v3041_v42 = vmax.f32 %v3039_v55, 0.0 }
 0xd3b   : > { %v3042_v17 = vmax.f32 %v3040_v44, 0.0 }
 0xd3d   : > { %v3045_v8 = vcombine.low %v3041_v42, %v3042_v17 }
 0xd3f   : > { %3047 = vst [vmem:[%s305_s12] sm:$0xff] %v3045_v8 }
 0xd40 PF: > { %s18_s27 = sadd.s32 1, %s3263_s27  }
 0xd41   : > { %p15_p4 = scmp.ge.s32.totalorder %s18_s27, 4  }
 0xd43   :  { %17 = sbr.rel (!%p15_p4) target bundleno = 1 (0x1), region = 96 }

</bundles_post_ra>
